<compile_context>
chip_gen: v6e
topology: v6e:2x2x1
jax: 0.10.0
libtpu: 0.0.40
codegen_flags: <defaults>
</compile_context>

<pallas_src>
import functools

import jax
import jax.numpy as jnp
from jax import lax
from jax.experimental import pallas as pl
from jax.experimental.pallas import tpu as pltpu

F32 = jnp.float32
BF16 = jnp.bfloat16
_VMEM_LIMIT = 32 * 1024 * 1024


def _cparams(n_grid_axes=0):
    if n_grid_axes:
        return pltpu.CompilerParams(
            dimension_semantics=("parallel",) * n_grid_axes,
            vmem_limit_bytes=_VMEM_LIMIT)
    return pltpu.CompilerParams(vmem_limit_bytes=_VMEM_LIMIT)


def _pick_tile(m, cap=1024):
    """Largest row tile that divides m, is a multiple of 8 (sublane-aligned) and <= cap,
    preferring >=2 grid steps so v7x's two TensorCores both get work."""
    best = m
    if m % 8 == 0:
        for t in range(min(cap, m // 2), 7, -1):
            if m % t == 0 and t % 8 == 0:
                best = t
                break
    return best


# ----------------------------- Pallas kernels ---------------------------------------
def _stem_kernel(p_ref, w_ref, b_ref, o_ref):
    """down_sampling_block(3,16): ONE bf16 matmul. Cols 0..26 of the operand are the 3x3 s2
    im2col taps, cols 27..29 hold the 2x2 s2 maxpool channels (weight rows = diag of the BN
    scale); BN(eps=1e-3) folded into the weight, bias + ReLU applied here."""
    o_ref[...] = jnp.maximum(
        jnp.dot(p_ref[...], w_ref[...], preferred_element_type=F32) + b_ref[...], 0.0)


def _dsb_kernel(t_ref, w_ref, bm_ref, se_ref, be_ref, pe_ref, o_ref, *, C):
    """DownSamplingBlock_v2: depthwise 3x3 s2 + 1x1 projection fused into ONE bf16
    (TM,9C)x(9C,Cout) matmul (dw-BN and ret-BN(main) folded; main branch lands in cols [C:)),
    3x3 s2 maxpool branch = 8 lane-slice maxima over the same im2col buffer, scaled/biased,
    ReLU'd and placed into cols [0,C) via a 0/1 bf16 placement matmul."""
    taps = t_ref[...]                                              # (TM, 9C) bf16
    main = jnp.dot(taps, w_ref[...], preferred_element_type=F32)   # (TM, Cout); cols < C are 0
    main = jnp.maximum(main + bm_ref[...], 0.0)
    mp = taps[:, 0:C]
    for t in range(1, 9):
        mp = jnp.maximum(mp, taps[:, t * C:(t + 1) * C])
    ext = jnp.maximum(mp.astype(F32) * se_ref[...] + be_ref[...], 0.0)
    o_ref[...] = main + jnp.dot(ext.astype(BF16), pe_ref[...],
                                preferred_element_type=F32)


def _sfrb_kernel(x_ref, w1_ref, b123_ref, w2_ref, w3_ref, w4_ref, b4_ref,
                 o_ref, pad_ref, *, H, W, d):
    """Fully fused SFRB (one image per grid step):
       1x1 -> BN -> ReLU -> (3,1) dw dil d -> BN -> (1,3) dw dil d -> BN -> 1x1 -> BN
       + residual + ReLU. Depthwise taps come from a zero-bordered VMEM scratch; only the
       2*S border rows are (re)zeroed, the live region is always overwritten.
       TODO(synk): when W*ic == 128 an (H, W*ic) lane-dense layout with pltpu.roll W-shifts
       would cut VPU work further; the (HW, ic) layout is kept for generality."""
    HW = H * W
    S = d * W                               # flat-row shift of a +-d shift along H
    ic = w1_ref.shape[1]
    zb = jnp.zeros((S, ic), F32)
    pad_ref[pl.ds(0, S), :] = zb            # borders only; rows [S, S+HW) hold live data
    pad_ref[pl.ds(S + HW, S), :] = zb
    x = x_ref[0]                            # (HW, C) f32
    # ---- 1x1 conv (+folded BN scale) + bias + ReLU
    m = jnp.dot(x.astype(BF16), w1_ref[...], preferred_element_type=F32)
    m = jnp.maximum(m + b123_ref[0:1, :], 0.0)          # (HW, ic)
    pad_ref[pl.ds(S, HW), :] = m
    # ---- (3,1) depthwise, dilation d (per-image H boundary == flat-row boundary)
    up = pad_ref[pl.ds(0, HW), :]           # row h - d
    dn = pad_ref[pl.ds(2 * S, HW), :]       # row h + d
    m2 = up * w2_ref[0] + m * w2_ref[1] + dn * w2_ref[2] + b123_ref[1:2, :]
    # ---- (1,3) depthwise, dilation d: +-d flat-row shifts with explicit W-boundary masks
    pad_ref[pl.ds(S, HW), :] = m2
    lf = pad_ref[pl.ds(S - d, HW), :]       # col w - d
    rt = pad_ref[pl.ds(S + d, HW), :]       # col w + d
    col = lax.broadcasted_iota(jnp.int32, (HW, 1), 0) % W
    ml = (col >= d).astype(F32)
    mr = (col < (W - d)).astype(F32)
    m3 = (lf * ml) * w3_ref[0] + m2 * w3_ref[1] + (rt * mr) * w3_ref[2] + b123_ref[2:3, :]
    # ---- 1x1 conv (+folded BN scale) + bias + residual + ReLU
    y = jnp.dot(m3.astype(BF16), w4_ref[...], preferred_element_type=F32)
    o_ref[0] = jnp.maximum(y + b4_ref[...] + x, 0.0)


def _head_kernel(x_ref, wpt_ref, ak_ref, o_ref):
    """1x1 projection + bilinear x8 upsample (align_corners=True) for one image, emitting
    NCHW-flat (nb, Ho*Wo) lane-dense output directly; both matmul operands are bf16."""
    xn = x_ref[0]                                                            # (C, H*W)
    t = jnp.dot(wpt_ref[...], xn.astype(BF16), preferred_element_type=F32)   # (nb, H*W)
    o_ref[0] = jnp.dot(t.astype(BF16), ak_ref[...], preferred_element_type=F32)


# ----------------------------- plain-JAX glue (small, one-off rearrangements) --------
def _out_size(n, k, s, p, d=1):
    return (n + 2 * p - d * (k - 1) - 1) // s + 1


def conv_patches(x, kh, kw, sh, sw, ph, pw):
    """im2col (tap-major, channel-minor) for a dense/depthwise conv. x: NHWC."""
    N, H, W, C = x.shape
    Ho = _out_size(H, kh, sh, ph)
    Wo = _out_size(W, kw, sw, pw)
    xp = jnp.pad(x, ((0, 0), (ph, ph), (pw, pw), (0, 0)))
    cols = []
    for i in range(kh):
        for j in range(kw):
            cols.append(xp[:, i: i + sh * (Ho - 1) + 1: sh,
                            j: j + sw * (Wo - 1) + 1: sw, :])
    return jnp.concatenate(cols, axis=-1), Ho, Wo


def bilinear_weights(n_in, n_out):
    """align_corners=True interpolation matrix (n_out, n_in)."""
    if n_in == 1:
        return jnp.ones((n_out, 1), F32)
    src = jnp.arange(n_out, dtype=F32) * (n_in - 1) / (n_out - 1)
    j0 = jnp.clip(jnp.floor(src).astype(jnp.int32), 0, n_in - 2)
    frac = src - j0.astype(F32)
    A = jnp.zeros((n_out, n_in), F32)
    idx = jnp.arange(n_out)
    A = A.at[idx, j0].add(1.0 - frac)
    A = A.at[idx, j0 + 1].add(frac)
    return A


# ----------------------------- network blocks ---------------------------------------
def stem_block(x, p):
    """down_sampling_block(3, 16): 3x3 s2 conv (3->13) || 2x2 s2 maxpool, concat, BN, ReLU."""
    N, H, W, _ = x.shape
    Ho, Wo = H // 2, W // 2
    M = N * Ho * Wo
    patches, _, _ = conv_patches(x, 3, 3, 2, 2, 1, 1)             # (N,Ho,Wo,27)
    # 2x2 s2 maxpool branch (3 channels, no padding -> exact even on negative inputs)
    mp = jnp.maximum(jnp.maximum(x[:, 0::2, 0::2, :], x[:, 0::2, 1::2, :]),
                     jnp.maximum(x[:, 1::2, 0::2, :], x[:, 1::2, 1::2, :]))
    # single bf16 operand: [im2col taps | maxpool channels | 2 zero cols]
    P = jnp.concatenate([patches.reshape(M, 27), mp.reshape(M, 3),
                         jnp.zeros((M, 2), F32)], axis=-1).astype(BF16)       # (M, 32)
    Wt = jnp.zeros((32, 16), F32)
    Wt = Wt.at[:27, :13].set(p['w'] * p['s_conv'][None, :])       # conv weights, BN folded
    Wt = Wt.at[27 + jnp.arange(3), 13 + jnp.arange(3)].set(p['s_mp'])  # maxpool BN scale
    Wt = Wt.astype(BF16)
    bias = jnp.concatenate([p['b_conv'], p['b_mp']]).reshape(1, 16)
    TM = _pick_tile(M)
    out = pl.pallas_call(
        _stem_kernel,
        out_shape=jax.ShapeDtypeStruct((M, 16), F32),
        grid=(M // TM,),
        in_specs=[
            pl.BlockSpec((TM, 32), lambda i: (i, 0)),
            pl.BlockSpec((32, 16), lambda i: (0, 0)),
            pl.BlockSpec((1, 16), lambda i: (0, 0)),
        ],
        out_specs=pl.BlockSpec((TM, 16), lambda i: (i, 0)),
        compiler_params=_cparams(1),
    )(P, Wt, bias)
    return out.reshape(N, Ho, Wo, 16)


def dsb_v2(x, p):
    """DownSamplingBlock_v2, fully fused (one pallas_call, row-tiled 'parallel' grid)."""
    N, H, W, C = x.shape
    # one bf16 im2col buffer feeds BOTH branches; zero padding is exact for the 3x3 s2 p1
    # maxpool because the incoming activation is post-ReLU (>= 0) and every window has a
    # real center pixel.
    patches, Ho, Wo = conv_patches(x, 3, 3, 2, 2, 1, 1)            # (N,Ho,Wo,9C)
    Mo = N * Ho * Wo
    C2 = p['w_proj'].shape[1]
    Cout = C + C2
    taps = patches.reshape(Mo, 9 * C).astype(BF16)
    # dense fused weight: W9[(t,c), c2] = w_dw[t,c]*s_dw[c] * (w_proj*s_ret_main)[c,c2],
    # padded so the main branch lands directly in output cols [C:).
    wp = p['w_proj'] * p['ret_s_main'][None, :]                    # (C, C2)
    wdw = p['w_dw'].reshape(9, C) * p['dw_s'][None, :]             # (9, C)
    w9 = (wdw[:, :, None] * wp[None, :, :]).reshape(9 * C, C2)
    W9 = jnp.concatenate([jnp.zeros((9 * C, C), F32), w9], axis=1).astype(BF16)   # (9C, Cout)
    b_main = p['dw_b'] @ wp + p['ret_b_main']                      # (C2,)
    bm = jnp.concatenate([jnp.zeros((C,), F32), b_main]).reshape(1, Cout)
    se = p['ret_s_ext'].reshape(1, C)
    be = p['ret_b_ext'].reshape(1, C)
    pe = jnp.concatenate([jnp.eye(C, dtype=F32),
                          jnp.zeros((C, C2), F32)], axis=1).astype(BF16)           # (C, Cout)
    TM = _pick_tile(Mo)
    out = pl.pallas_call(
        functools.partial(_dsb_kernel, C=C),
        out_shape=jax.ShapeDtypeStruct((Mo, Cout), F32),
        grid=(Mo // TM,),
        in_specs=[
            pl.BlockSpec((TM, 9 * C), lambda i: (i, 0)),
            pl.BlockSpec((9 * C, Cout), lambda i: (0, 0)),
            pl.BlockSpec((1, Cout), lambda i: (0, 0)),
            pl.BlockSpec((1, C), lambda i: (0, 0)),
            pl.BlockSpec((1, C), lambda i: (0, 0)),
            pl.BlockSpec((C, Cout), lambda i: (0, 0)),
        ],
        out_specs=pl.BlockSpec((TM, Cout), lambda i: (i, 0)),
        compiler_params=_cparams(1),
    )(taps, W9, bm, se, be, pe)
    return out.reshape(N, Ho, Wo, Cout)


def sfrb(x, p, d):
    """Fused SFRB block; grid over batch images ('parallel')."""
    N, H, W, C = x.shape
    HW = H * W
    ic = C // 4
    S = d * W
    w1 = (p['w1'] * p['s1'][None, :]).astype(BF16)          # (C, ic)
    w2 = p['w2'] * p['s2'][None, None, :]                   # (3, 1, ic) f32
    w3 = p['w3'] * p['s3'][None, None, :]
    w4 = (p['w4'] * p['s4'][None, :]).astype(BF16)          # (ic, C)
    b123 = jnp.stack([p['b1'], p['b2'], p['b3']], axis=0)   # (3, ic) packed biases
    b4 = p['b4'].reshape(1, C)
    xr = x.reshape(N, HW, C)
    out = pl.pallas_call(
        functools.partial(_sfrb_kernel, H=H, W=W, d=d),
        out_shape=jax.ShapeDtypeStruct((N, HW, C), F32),
        grid=(N,),
        in_specs=[
            pl.BlockSpec((1, HW, C), lambda n: (n, 0, 0)),
            pl.BlockSpec((C, ic), lambda n: (0, 0)),
            pl.BlockSpec((3, ic), lambda n: (0, 0)),
            pl.BlockSpec((3, 1, ic), lambda n: (0, 0, 0)),
            pl.BlockSpec((3, 1, ic), lambda n: (0, 0, 0)),
            pl.BlockSpec((ic, C), lambda n: (0, 0)),
            pl.BlockSpec((1, C), lambda n: (0, 0)),
        ],
        out_specs=pl.BlockSpec((1, HW, C), lambda n: (n, 0, 0)),
        scratch_shapes=[pltpu.VMEM((HW + 2 * S, ic), F32)],
        compiler_params=_cparams(1),
    )(xr, w1, b123, w2, w3, w4, b4)
    return out.reshape(N, H, W, C)


def head_project_upsample(x, w_proj, scale=8):
    """1x1 projection + bilinear x8 upsample (align_corners=True) -> NCHW logits."""
    N, H, W, C = x.shape
    nb = w_proj.shape[1]
    Ho, Wo = H * scale, W * scale
    Ah = bilinear_weights(H, Ho)                  # (Ho, H)
    Aw = bilinear_weights(W, Wo)                  # (Wo, W)
    ak = jnp.kron(Ah, Aw).T.astype(BF16)          # (H*W, Ho*Wo)
    # TODO(synk): for large spatial sizes switch to separable Aw-then-Ah matmuls to avoid the
    #             O(HW * 64*HW) kron constant; at these shapes the single matmul is cheaper.
    xt = jnp.transpose(x, (0, 3, 1, 2)).reshape(N, C, H * W)   # tiny NHWC -> NC(HW)
    wpt = w_proj.T.astype(BF16)                   # (nb, C)
    out = pl.pallas_call(
        _head_kernel,
        out_shape=jax.ShapeDtypeStruct((N, nb, Ho * Wo), F32),
        grid=(N,),
        in_specs=[
            pl.BlockSpec((1, C, H * W), lambda n: (n, 0, 0)),
            pl.BlockSpec((nb, C), lambda n: (0, 0)),
            pl.BlockSpec((H * W, Ho * Wo), lambda n: (0, 0)),
        ],
        out_specs=pl.BlockSpec((1, nb, Ho * Wo), lambda n: (n, 0, 0)),
        compiler_params=_cparams(1),
    )(xt, wpt, ak)
    return out.reshape(N, nb, Ho, Wo)


def esfnet_forward(params, x_nchw):
    x = jnp.transpose(x_nchw, (0, 2, 3, 1)).astype(F32)   # NCHW -> NHWC
    x = stem_block(x, params['ds1'])                      # (N, H/2,  W/2,  16)
    x = dsb_v2(x, params['dsb2'])                         # (N, H/4,  W/4,  64)
    for p in params['sfrb_64']:
        x = sfrb(x, p, 1)
    x = dsb_v2(x, params['dsb3'])                         # (N, H/8,  W/8, 128)
    for p, d in zip(params['sfrb_128'], (2, 4, 8, 16)):
        x = sfrb(x, p, d)
    return head_project_upsample(x, params['w_proj'], scale=8)   # NCHW (N, nb, H, W)


# ----------------------------- deterministic parameter init --------------------------
def init_params(key, nb_classes):
    ks = jax.random.split(key, 128)
    ctr = iter(range(128))

    def nk():
        return ks[next(ctr)]

    def conv_w(k, fan_in, fan_out):
        return jax.random.normal(k, (fan_in, fan_out), F32) * jnp.sqrt(2.0 / fan_in)

    def dw_w(k, taps, c):
        return jax.random.normal(k, (taps, 1, c), F32) * jnp.sqrt(2.0 / taps)

    def bn(k, c, eps=1e-5):
        k1, k2, k3, k4 = jax.random.split(k, 4)
        gamma = jax.random.uniform(k1, (c,), minval=0.8, maxval=1.2)
        beta = jax.random.normal(k2, (c,)) * 0.05
        mean = jax.random.normal(k3, (c,)) * 0.05
        var = jax.random.uniform(k4, (c,), minval=0.8, maxval=1.2)
        scale = gamma / jnp.sqrt(var + eps)
        bias = beta - mean * scale
        return scale.astype(F32), bias.astype(F32)

    def dsbv2_p(cin, cout):
        dws, dwb = bn(nk(), cin)
        rs, rb = bn(nk(), cout)
        return dict(w_dw=dw_w(nk(), 9, cin), dw_s=dws, dw_b=dwb,
                    w_proj=conv_w(nk(), cin, cout - cin),
                    ret_s_ext=rs[:cin], ret_b_ext=rb[:cin],
                    ret_s_main=rs[cin:], ret_b_main=rb[cin:])

    def sfrb_p(c):
        ic = c // 4
        s1, b1 = bn(nk(), ic)
        s2, b2 = bn(nk(), ic)
        s3, b3 = bn(nk(), ic)
        s4, b4 = bn(nk(), c)
        return dict(w1=conv_w(nk(), c, ic), s1=s1, b1=b1,
                    w2=dw_w(nk(), 3, ic), s2=s2, b2=b2,
                    w3=dw_w(nk(), 3, ic), s3=s3, b3=b3,
                    w4=conv_w(nk(), ic, c), s4=s4, b4=b4)

    P = {}
    s, b = bn(nk(), 16, eps=1e-3)                 # down_sampling_block BN uses eps=0.001
    P['ds1'] = dict(w=conv_w(nk(), 27, 13),
                    s_conv=s[:13], b_conv=b[:13], s_mp=s[13:], b_mp=b[13:])
    P['dsb2'] = dsbv2_p(16, 64)
    P['sfrb_64'] = [sfrb_p(64) for _ in range(3)]
    P['dsb3'] = dsbv2_p(64, 128)
    P['sfrb_128'] = [sfrb_p(128) for _ in range(4)]
    P['w_proj'] = conv_w(nk(), 128, nb_classes)
    return P


# ----------------------------- driver -------------------------------------------------
if __name__ == "__main__":
    nb_classes = 2
    key = jax.random.PRNGKey(0)
    kp, kx = jax.random.split(key)
    params = init_params(kp, nb_classes)
    x = jax.random.normal(kx, (2, 3, 32, 32), F32)   # NCHW, like the PyTorch module

    fwd = jax.jit(esfnet_forward)
    out = fwd(params, x)
    jax.block_until_ready(out)
    assert out.shape == (2, nb_classes, 32, 32), out.shape
    assert bool(jnp.all(jnp.isfinite(out)))
    print("KERNEL_OK")
</pallas_src>

<mosaic_0001>
module attributes {stable_mosaic.version = 11 : i64} {
  func.func private @main(%arg0: i32) attributes {dimension_semantics = [#tpu.dimension_semantics<core_parallel>], iteration_bounds = array<i64: 2>, tpu.core_type = #tpu.core_type<sc_scalar_subcore>, window_params = []} {
    return
  }
}

module attributes {stable_mosaic.version = 11 : i64} {
  func.func private @main(%arg0: i32) attributes {dimension_semantics = [#tpu.dimension_semantics<core_parallel>], iteration_bounds = array<i64: 2>, tpu.core_type = #tpu.core_type<sc_scalar_subcore>, window_params = []} {
    return
  }
}

module attributes {stable_mosaic.version = 11 : i64} {
  func.func @_stem_kernel(%arg0: i32, %arg1: memref<256x32xbf16, #tpu.memory_space<vmem>>, %arg2: memref<32x16xbf16, #tpu.memory_space<vmem>>, %arg3: memref<1x16xf32, #tpu.memory_space<vmem>>, %arg4: memref<256x16xf32, #tpu.memory_space<vmem>>) attributes {dimension_semantics = [#tpu.dimension_semantics<parallel>], iteration_bounds = array<i64: 2>, scalar_prefetch = 0 : i64, scratch_operands = 0 : i64, tpu.core_type = #tpu.core_type<tc>, window_params = [{transform_indices = @transform_0, window_bounds = array<i64: 256, 32>}, {pipeline_mode = #tpu.pipeline_mode<synchronous>, transform_indices = @transform_1, window_bounds = array<i64: 32, 16>}, {pipeline_mode = #tpu.pipeline_mode<synchronous>, transform_indices = @transform_2, window_bounds = array<i64: 1, 16>}, {transform_indices = @transform_3, window_bounds = array<i64: 256, 16>}]} {
    %c0 = arith.constant 0 : index
    %c0_0 = arith.constant 0 : index
    %0 = vector.load %arg1[%c0, %c0_0] : memref<256x32xbf16, #tpu.memory_space<vmem>>, vector<256x32xbf16>
    %c0_1 = arith.constant 0 : index
    %c0_2 = arith.constant 0 : index
    %1 = vector.load %arg2[%c0_1, %c0_2] : memref<32x16xbf16, #tpu.memory_space<vmem>>, vector<32x16xbf16>
    %cst = arith.constant dense<0.000000e+00> : vector<256x16xf32>
    %2 = tpu.matmul %0, %1, %cst {dimension_numbers = #tpu.dot_dimension_numbers<[1], [0], [0], [1], [0, 0, 1, 1], [], []>} : vector<256x32xbf16>, vector<32x16xbf16>, vector<256x16xf32> -> vector<256x16xf32>
    %c0_3 = arith.constant 0 : index
    %c0_4 = arith.constant 0 : index
    %3 = vector.load %arg3[%c0_3, %c0_4] : memref<1x16xf32, #tpu.memory_space<vmem>>, vector<1x16xf32>
    %4 = vector.broadcast %3 : vector<1x16xf32> to vector<256x16xf32>
    %5 = arith.addf %2, %4 : vector<256x16xf32>
    %cst_5 = arith.constant 0.000000e+00 : f32
    %6 = vector.broadcast %cst_5 : f32 to vector<256x16xf32>
    %7 = arith.maximumf %5, %6 : vector<256x16xf32>
    %c0_6 = arith.constant 0 : index
    %c0_7 = arith.constant 0 : index
    %8 = vector.load %arg4[%c0_6, %c0_7] : memref<256x16xf32, #tpu.memory_space<vmem>>, vector<256x16xf32>
    tpu.vector_store %arg4[%c0_6, %c0_7], %7 {strides = array<i32>} : memref<256x16xf32, #tpu.memory_space<vmem>>, vector<256x16xf32>,
    return
  }
  func.func @transform_0(%arg0: i32) -> (i32, i32) {
    %c0_i32 = arith.constant 0 : i32
    %c0_i32_0 = arith.constant 0 : i32
    return %arg0, %c0_i32 : i32, i32
  }
  func.func @transform_1(%arg0: i32) -> (i32, i32) {
    %c0_i32 = arith.constant 0 : i32
    %c0_i32_0 = arith.constant 0 : i32
    %c0_i32_1 = arith.constant 0 : i32
    return %c0_i32, %c0_i32_0 : i32, i32
  }
  func.func @transform_2(%arg0: i32) -> (i32, i32) {
    %c0_i32 = arith.constant 0 : i32
    %c0_i32_0 = arith.constant 0 : i32
    %c0_i32_1 = arith.constant 0 : i32
    return %c0_i32, %c0_i32_0 : i32, i32
  }
  func.func @transform_3(%arg0: i32) -> (i32, i32) {
    %c0_i32 = arith.constant 0 : i32
    %c0_i32_0 = arith.constant 0 : i32
    return %arg0, %c0_i32 : i32, i32
  }
}

module attributes {stable_mosaic.version = 11 : i64} {
  func.func @_dsb_kernel(%arg0: i32, %arg1: memref<64x144xbf16, #tpu.memory_space<vmem>>, %arg2: memref<144x64xbf16, #tpu.memory_space<vmem>>, %arg3: memref<1x64xf32, #tpu.memory_space<vmem>>, %arg4: memref<1x16xf32, #tpu.memory_space<vmem>>, %arg5: memref<1x16xf32, #tpu.memory_space<vmem>>, %arg6: memref<16x64xbf16, #tpu.memory_space<vmem>>, %arg7: memref<64x64xf32, #tpu.memory_space<vmem>>) attributes {dimension_semantics = [#tpu.dimension_semantics<parallel>], iteration_bounds = array<i64: 2>, scalar_prefetch = 0 : i64, scratch_operands = 0 : i64, tpu.core_type = #tpu.core_type<tc>, window_params = [{transform_indices = @transform_0, window_bounds = array<i64: 64, 144>}, {pipeline_mode = #tpu.pipeline_mode<synchronous>, transform_indices = @transform_1, window_bounds = array<i64: 144, 64>}, {pipeline_mode = #tpu.pipeline_mode<synchronous>, transform_indices = @transform_2, window_bounds = array<i64: 1, 64>}, {pipeline_mode = #tpu.pipeline_mode<synchronous>, transform_indices = @transform_3, window_bounds = array<i64: 1, 16>}, {pipeline_mode = #tpu.pipeline_mode<synchronous>, transform_indices = @transform_4, window_bounds = array<i64: 1, 16>}, {pipeline_mode = #tpu.pipeline_mode<synchronous>, transform_indices = @transform_5, window_bounds = array<i64: 16, 64>}, {transform_indices = @transform_6, window_bounds = array<i64: 64, 64>}]} {
    %c0 = arith.constant 0 : index
    %c0_0 = arith.constant 0 : index
    %0 = vector.load %arg1[%c0, %c0_0] : memref<64x144xbf16, #tpu.memory_space<vmem>>, vector<64x144xbf16>
    %c0_1 = arith.constant 0 : index
    %c0_2 = arith.constant 0 : index
    %1 = vector.load %arg2[%c0_1, %c0_2] : memref<144x64xbf16, #tpu.memory_space<vmem>>, vector<144x64xbf16>
    %cst = arith.constant dense<0.000000e+00> : vector<64x64xf32>
    %2 = tpu.matmul %0, %1, %cst {dimension_numbers = #tpu.dot_dimension_numbers<[1], [0], [0], [1], [0, 0, 1, 1], [], []>} : vector<64x144xbf16>, vector<144x64xbf16>, vector<64x64xf32> -> vector<64x64xf32>
    %c0_3 = arith.constant 0 : index
    %c0_4 = arith.constant 0 : index
    %3 = vector.load %arg3[%c0_3, %c0_4] : memref<1x64xf32, #tpu.memory_space<vmem>>, vector<1x64xf32>
    %4 = vector.broadcast %3 : vector<1x64xf32> to vector<64x64xf32>
    %5 = arith.addf %2, %4 : vector<64x64xf32>
    %cst_5 = arith.constant 0.000000e+00 : f32
    %6 = vector.broadcast %cst_5 : f32 to vector<64x64xf32>
    %7 = arith.maximumf %5, %6 : vector<64x64xf32>
    %8 = vector.extract_strided_slice %0 {offsets = [0, 0], sizes = [64, 16], strides = [1, 1]} : vector<64x144xbf16> to vector<64x16xbf16>
    %9 = vector.extract_strided_slice %0 {offsets = [0, 16], sizes = [64, 16], strides = [1, 1]} : vector<64x144xbf16> to vector<64x16xbf16>
    %10 = arith.maximumf %8, %9 : vector<64x16xbf16>
    %11 = vector.extract_strided_slice %0 {offsets = [0, 32], sizes = [64, 16], strides = [1, 1]} : vector<64x144xbf16> to vector<64x16xbf16>
    %12 = arith.maximumf %10, %11 : vector<64x16xbf16>
    %13 = vector.extract_strided_slice %0 {offsets = [0, 48], sizes = [64, 16], strides = [1, 1]} : vector<64x144xbf16> to vector<64x16xbf16>
    %14 = arith.maximumf %12, %13 : vector<64x16xbf16>
    %15 = vector.extract_strided_slice %0 {offsets = [0, 64], sizes = [64, 16], strides = [1, 1]} : vector<64x144xbf16> to vector<64x16xbf16>
    %16 = arith.maximumf %14, %15 : vector<64x16xbf16>
    %17 = vector.extract_strided_slice %0 {offsets = [0, 80], sizes = [64, 16], strides = [1, 1]} : vector<64x144xbf16> to vector<64x16xbf16>
    %18 = arith.maximumf %16, %17 : vector<64x16xbf16>
    %19 = vector.extract_strided_slice %0 {offsets = [0, 96], sizes = [64, 16], strides = [1, 1]} : vector<64x144xbf16> to vector<64x16xbf16>
    %20 = arith.maximumf %18, %19 : vector<64x16xbf16>
    %21 = vector.extract_strided_slice %0 {offsets = [0, 112], sizes = [64, 16], strides = [1, 1]} : vector<64x144xbf16> to vector<64x16xbf16>
    %22 = arith.maximumf %20, %21 : vector<64x16xbf16>
    %23 = vector.extract_strided_slice %0 {offsets = [0, 128], sizes = [64, 16], strides = [1, 1]} : vector<64x144xbf16> to vector<64x16xbf16>
    %24 = arith.maximumf %22, %23 : vector<64x16xbf16>
    %25 = arith.extf %24 : vector<64x16xbf16> to vector<64x16xf32>
    %c0_6 = arith.constant 0 : index
    %c0_7 = arith.constant 0 : index
    %26 = vector.load %arg4[%c0_6, %c0_7] : memref<1x16xf32, #tpu.memory_space<vmem>>, vector<1x16xf32>
    %27 = vector.broadcast %26 : vector<1x16xf32> to vector<64x16xf32>
    %28 = arith.mulf %25, %27 : vector<64x16xf32>
    %c0_8 = arith.constant 0 : index
    %c0_9 = arith.constant 0 : index
    %29 = vector.load %arg5[%c0_8, %c0_9] : memref<1x16xf32, #tpu.memory_space<vmem>>, vector<1x16xf32>
    %30 = vector.broadcast %29 : vector<1x16xf32> to vector<64x16xf32>
    %31 = arith.addf %28, %30 : vector<64x16xf32>
    %cst_10 = arith.constant 0.000000e+00 : f32
    %32 = vector.broadcast %cst_10 : f32 to vector<64x16xf32>
    %33 = arith.maximumf %31, %32 : vector<64x16xf32>
    %34 = arith.truncf %33 : vector<64x16xf32> to vector<64x16xbf16>
    %c0_11 = arith.constant 0 : index
    %c0_12 = arith.constant 0 : index
    %35 = vector.load %arg6[%c0_11, %c0_12] : memref<16x64xbf16, #tpu.memory_space<vmem>>, vector<16x64xbf16>
    %cst_13 = arith.constant dense<0.000000e+00> : vector<64x64xf32>
    %36 = tpu.matmul %34, %35, %cst_13 {dimension_numbers = #tpu.dot_dimension_numbers<[1], [0], [0], [1], [0, 0, 1, 1], [], []>} : vector<64x16xbf16>, vector<16x64xbf16>, vector<64x64xf32> -> vector<64x64xf32>
    %37 = arith.addf %7, %36 : vector<64x64xf32>
    %c0_14 = arith.constant 0 : index
    %c0_15 = arith.constant 0 : index
    %38 = vector.load %arg7[%c0_14, %c0_15] : memref<64x64xf32, #tpu.memory_space<vmem>>, vector<64x64xf32>
    tpu.vector_store %arg7[%c0_14, %c0_15], %37 {strides = array<i32>} : memref<64x64xf32, #tpu.memory_space<vmem>>, vector<64x64xf32>,
    return
  }
  func.func @transform_0(%arg0: i32) -> (i32, i32) {
    %c0_i32 = arith.constant 0 : i32
    %c0_i32_0 = arith.constant 0 : i32
    return %arg0, %c0_i32 : i32, i32
  }
  func.func @transform_1(%arg0: i32) -> (i32, i32) {
    %c0_i32 = arith.constant 0 : i32
    %c0_i32_0 = arith.constant 0 : i32
    %c0_i32_1 = arith.constant 0 : i32
    return %c0_i32, %c0_i32_0 : i32, i32
  }
  func.func @transform_2(%arg0: i32) -> (i32, i32) {
    %c0_i32 = arith.constant 0 : i32
    %c0_i32_0 = arith.constant 0 : i32
    %c0_i32_1 = arith.constant 0 : i32
    return %c0_i32, %c0_i32_0 : i32, i32
  }
  func.func @transform_3(%arg0: i32) -> (i32, i32) {
    %c0_i32 = arith.constant 0 : i32
    %c0_i32_0 = arith.constant 0 : i32
    %c0_i32_1 = arith.constant 0 : i32
    return %c0_i32, %c0_i32_0 : i32, i32
  }
  func.func @transform_4(%arg0: i32) -> (i32, i32) {
    %c0_i32 = arith.constant 0 : i32
    %c0_i32_0 = arith.constant 0 : i32
    %c0_i32_1 = arith.constant 0 : i32
    return %c0_i32, %c0_i32_0 : i32, i32
  }
  func.func @transform_5(%arg0: i32) -> (i32, i32) {
    %c0_i32 = arith.constant 0 : i32
    %c0_i32_0 = arith.constant 0 : i32
    %c0_i32_1 = arith.constant 0 : i32
    return %c0_i32, %c0_i32_0 : i32, i32
  }
  func.func @transform_6(%arg0: i32) -> (i32, i32) {
    %c0_i32 = arith.constant 0 : i32
    %c0_i32_0 = arith.constant 0 : i32
    return %arg0, %c0_i32 : i32, i32
  }
}

module attributes {stable_mosaic.version = 11 : i64} {
  func.func @_sfrb_kernel(%arg0: i32, %arg1: memref<1x64x64xf32, #tpu.memory_space<vmem>>, %arg2: memref<64x16xbf16, #tpu.memory_space<vmem>>, %arg3: memref<3x16xf32, #tpu.memory_space<vmem>>, %arg4: memref<3x1x16xf32, #tpu.memory_space<vmem>>, %arg5: memref<3x1x16xf32, #tpu.memory_space<vmem>>, %arg6: memref<16x64xbf16, #tpu.memory_space<vmem>>, %arg7: memref<1x64xf32, #tpu.memory_space<vmem>>, %arg8: memref<1x64x64xf32, #tpu.memory_space<vmem>>, %arg9: memref<80x16xf32, #tpu.memory_space<vmem>>) attributes {dimension_semantics = [#tpu.dimension_semantics<parallel>], iteration_bounds = array<i64: 2>, scalar_prefetch = 0 : i64, scratch_operands = 1 : i64, tpu.core_type = #tpu.core_type<tc>, window_params = [{transform_indices = @transform_0, window_bounds = array<i64: 1, 64, 64>}, {pipeline_mode = #tpu.pipeline_mode<synchronous>, transform_indices = @transform_1, window_bounds = array<i64: 64, 16>}, {pipeline_mode = #tpu.pipeline_mode<synchronous>, transform_indices = @transform_2, window_bounds = array<i64: 3, 16>}, {pipeline_mode = #tpu.pipeline_mode<synchronous>, transform_indices = @transform_3, window_bounds = array<i64: 3, 1, 16>}, {pipeline_mode = #tpu.pipeline_mode<synchronous>, transform_indices = @transform_4, window_bounds = array<i64: 3, 1, 16>}, {pipeline_mode = #tpu.pipeline_mode<synchronous>, transform_indices = @transform_5, window_bounds = array<i64: 16, 64>}, {pipeline_mode = #tpu.pipeline_mode<synchronous>, transform_indices = @transform_6, window_bounds = array<i64: 1, 64>}, {transform_indices = @transform_7, window_bounds = array<i64: 1, 64, 64>}]} {
    %cst = arith.constant 0.000000e+00 : f32
    %0 = vector.broadcast %cst : f32 to vector<8x16xf32>
    %c0 = arith.constant 0 : index
    %c0_0 = arith.constant 0 : index
    %1 = vector.load %arg9[%c0, %c0_0] : memref<80x16xf32, #tpu.memory_space<vmem>>, vector<8x16xf32>
    tpu.vector_store %arg9[%c0, %c0_0], %0 {strides = array<i32>} : memref<80x16xf32, #tpu.memory_space<vmem>>, vector<8x16xf32>,
    %c72 = arith.constant 72 : index
    %c0_1 = arith.constant 0 : index
    %2 = vector.load %arg9[%c72, %c0_1] : memref<80x16xf32, #tpu.memory_space<vmem>>, vector<8x16xf32>
    tpu.vector_store %arg9[%c72, %c0_1], %0 {strides = array<i32>} : memref<80x16xf32, #tpu.memory_space<vmem>>, vector<8x16xf32>,
    %c0_2 = arith.constant 0 : index
    %c0_3 = arith.constant 0 : index
    %c0_4 = arith.constant 0 : index
    %3 = vector.load %arg1[%c0_2, %c0_3, %c0_4] : memref<1x64x64xf32, #tpu.memory_space<vmem>>, vector<1x64x64xf32>
    %4 = vector.shape_cast %3 : vector<1x64x64xf32> to vector<64x64xf32>
    %5 = arith.truncf %4 : vector<64x64xf32> to vector<64x64xbf16>
    %c0_5 = arith.constant 0 : index
    %c0_6 = arith.constant 0 : index
    %6 = vector.load %arg2[%c0_5, %c0_6] : memref<64x16xbf16, #tpu.memory_space<vmem>>, vector<64x16xbf16>
    %cst_7 = arith.constant dense<0.000000e+00> : vector<64x16xf32>
    %7 = tpu.matmul %5, %6, %cst_7 {dimension_numbers = #tpu.dot_dimension_numbers<[1], [0], [0], [1], [0, 0, 1, 1], [], []>} : vector<64x64xbf16>, vector<64x16xbf16>, vector<64x16xf32> -> vector<64x16xf32>
    %c0_8 = arith.constant 0 : index
    %c0_9 = arith.constant 0 : index
    %8 = vector.load %arg3[%c0_8, %c0_9] : memref<3x16xf32, #tpu.memory_space<vmem>>, vector<1x16xf32>
    %9 = vector.broadcast %8 : vector<1x16xf32> to vector<64x16xf32>
    %10 = arith.addf %7, %9 : vector<64x16xf32>
    %cst_10 = arith.constant 0.000000e+00 : f32
    %11 = vector.broadcast %cst_10 : f32 to vector<64x16xf32>
    %12 = arith.maximumf %10, %11 : vector<64x16xf32>
    %c8 = arith.constant 8 : index
    %c0_11 = arith.constant 0 : index
    %13 = vector.load %arg9[%c8, %c0_11] : memref<80x16xf32, #tpu.memory_space<vmem>>, vector<64x16xf32>
    tpu.vector_store %arg9[%c8, %c0_11], %12 {strides = array<i32>} : memref<80x16xf32, #tpu.memory_space<vmem>>, vector<64x16xf32>,
    %c0_12 = arith.constant 0 : index
    %c0_13 = arith.constant 0 : index
    %14 = vector.load %arg9[%c0_12, %c0_13] : memref<80x16xf32, #tpu.memory_space<vmem>>, vector<64x16xf32>
    %c16 = arith.constant 16 : index
    %c0_14 = arith.constant 0 : index
    %15 = vector.load %arg9[%c16, %c0_14] : memref<80x16xf32, #tpu.memory_space<vmem>>, vector<64x16xf32>
    %c0_15 = arith.constant 0 : index
    %c0_16 = arith.constant 0 : index
    %c0_17 = arith.constant 0 : index
    %16 = vector.load %arg4[%c0_15, %c0_16, %c0_17] : memref<3x1x16xf32, #tpu.memory_space<vmem>>, vector<1x1x16xf32>
    %17 = vector.shape_cast %16 : vector<1x1x16xf32> to vector<1x16xf32>
    %18 = vector.broadcast %17 : vector<1x16xf32> to vector<64x16xf32>
    %19 = arith.mulf %14, %18 : vector<64x16xf32>
    %c1 = arith.constant 1 : index
    %c0_18 = arith.constant 0 : index
    %c0_19 = arith.constant 0 : index
    %20 = vector.load %arg4[%c1, %c0_18, %c0_19] : memref<3x1x16xf32, #tpu.memory_space<vmem>>, vector<1x1x16xf32>
    %21 = vector.shape_cast %20 : vector<1x1x16xf32> to vector<1x16xf32>
    %22 = vector.broadcast %21 : vector<1x16xf32> to vector<64x16xf32>
    %23 = arith.mulf %12, %22 : vector<64x16xf32>
    %24 = arith.addf %19, %23 : vector<64x16xf32>
    %c2 = arith.constant 2 : index
    %c0_20 = arith.constant 0 : index
    %c0_21 = arith.constant 0 : index
    %25 = vector.load %arg4[%c2, %c0_20, %c0_21] : memref<3x1x16xf32, #tpu.memory_space<vmem>>, vector<1x1x16xf32>
    %26 = vector.shape_cast %25 : vector<1x1x16xf32> to vector<1x16xf32>
    %27 = vector.broadcast %26 : vector<1x16xf32> to vector<64x16xf32>
    %28 = arith.mulf %15, %27 : vector<64x16xf32>
    %29 = arith.addf %24, %28 : vector<64x16xf32>
    %c1_22 = arith.constant 1 : index
    %c0_23 = arith.constant 0 : index
    %30 = vector.load %arg3[%c1_22, %c0_23] : memref<3x16xf32, #tpu.memory_space<vmem>>, vector<1x16xf32>
    %31 = vector.broadcast %30 : vector<1x16xf32> to vector<64x16xf32>
    %32 = arith.addf %29, %31 : vector<64x16xf32>
    %c8_24 = arith.constant 8 : index
    %c0_25 = arith.constant 0 : index
    %33 = vector.load %arg9[%c8_24, %c0_25] : memref<80x16xf32, #tpu.memory_space<vmem>>, vector<64x16xf32>
    tpu.vector_store %arg9[%c8_24, %c0_25], %32 {strides = array<i32>} : memref<80x16xf32, #tpu.memory_space<vmem>>, vector<64x16xf32>,
    %c7 = arith.constant 7 : index
    %c0_26 = arith.constant 0 : index
    %34 = vector.load %arg9[%c7, %c0_26] : memref<80x16xf32, #tpu.memory_space<vmem>>, vector<64x16xf32>
    %c9 = arith.constant 9 : index
    %c0_27 = arith.constant 0 : index
    %35 = vector.load %arg9[%c9, %c0_27] : memref<80x16xf32, #tpu.memory_space<vmem>>, vector<64x16xf32>
    %36 = tpu.iota {dimensions = array<i32: 0>} : vector<64x1xi32>
    %c8_i32 = arith.constant 8 : i32
    %c0_i32 = arith.constant 0 : i32
    %37 = arith.cmpi eq, %c8_i32, %c0_i32 : i32
    %c1_i32 = arith.constant 1 : i32
    %38 = arith.select %37, %c1_i32, %c8_i32 : i32
    %39 = vector.broadcast %38 : i32 to vector<64x1xi32>
    %40 = arith.remsi %36, %39 : vector<64x1xi32>
    %c0_i32_28 = arith.constant 0 : i32
    %41 = vector.broadcast %c0_i32_28 : i32 to vector<64x1xi32>
    %42 = arith.cmpi ne, %40, %41 : vector<64x1xi32>
    %c0_i32_29 = arith.constant 0 : i32
    %43 = vector.broadcast %c0_i32_29 : i32 to vector<64x1xi32>
    %44 = arith.cmpi slt, %40, %43 : vector<64x1xi32>
    %c0_i32_30 = arith.constant 0 : i32
    %45 = arith.cmpi slt, %38, %c0_i32_30 : i32
    %46 = vector.broadcast %45 : i1 to vector<64x1xi1>
    %47 = vector.broadcast %46 : vector<64x1xi1> to vector<64x1xi1>
    %48 = arith.xori %44, %47 : vector<64x1xi1>
    %49 = arith.andi %48, %42 : vector<64x1xi1>
    %50 = vector.broadcast %38 : i32 to vector<64x1xi32>
    %51 = arith.addi %40, %50 : vector<64x1xi32>
    %52 = arith.select %49, %51, %40 : vector<64x1xi1>, vector<64x1xi32>
    %c1_i32_31 = arith.constant 1 : i32
    %53 = vector.broadcast %c1_i32_31 : i32 to vector<64x1xi32>
    %54 = arith.cmpi sge, %52, %53 : vector<64x1xi32>
    %55 = arith.extui %54 : vector<64x1xi1> to vector<64x1xi32>
    %56 = arith.sitofp %55 : vector<64x1xi32> to vector<64x1xf32>
    %c7_i32 = arith.constant 7 : i32
    %57 = vector.broadcast %c7_i32 : i32 to vector<64x1xi32>
    %58 = arith.cmpi slt, %52, %57 : vector<64x1xi32>
    %59 = arith.extui %58 : vector<64x1xi1> to vector<64x1xi32>
    %60 = arith.sitofp %59 : vector<64x1xi32> to vector<64x1xf32>
    %61 = vector.broadcast %56 : vector<64x1xf32> to vector<64x16xf32>
    %62 = arith.mulf %34, %61 : vector<64x16xf32>
    %c0_32 = arith.constant 0 : index
    %c0_33 = arith.constant 0 : index
    %c0_34 = arith.constant 0 : index
    %63 = vector.load %arg5[%c0_32, %c0_33, %c0_34] : memref<3x1x16xf32, #tpu.memory_space<vmem>>, vector<1x1x16xf32>
    %64 = vector.shape_cast %63 : vector<1x1x16xf32> to vector<1x16xf32>
    %65 = vector.broadcast %64 : vector<1x16xf32> to vector<64x16xf32>
    %66 = arith.mulf %62, %65 : vector<64x16xf32>
    %c1_35 = arith.constant 1 : index
    %c0_36 = arith.constant 0 : index
    %c0_37 = arith.constant 0 : index
    %67 = vector.load %arg5[%c1_35, %c0_36, %c0_37] : memref<3x1x16xf32, #tpu.memory_space<vmem>>, vector<1x1x16xf32>
    %68 = vector.shape_cast %67 : vector<1x1x16xf32> to vector<1x16xf32>
    %69 = vector.broadcast %68 : vector<1x16xf32> to vector<64x16xf32>
    %70 = arith.mulf %32, %69 : vector<64x16xf32>
    %71 = arith.addf %66, %70 : vector<64x16xf32>
    %72 = vector.broadcast %60 : vector<64x1xf32> to vector<64x16xf32>
    %73 = arith.mulf %35, %72 : vector<64x16xf32>
    %c2_38 = arith.constant 2 : index
    %c0_39 = arith.constant 0 : index
    %c0_40 = arith.constant 0 : index
    %74 = vector.load %arg5[%c2_38, %c0_39, %c0_40] : memref<3x1x16xf32, #tpu.memory_space<vmem>>, vector<1x1x16xf32>
    %75 = vector.shape_cast %74 : vector<1x1x16xf32> to vector<1x16xf32>
    %76 = vector.broadcast %75 : vector<1x16xf32> to vector<64x16xf32>
    %77 = arith.mulf %73, %76 : vector<64x16xf32>
    %78 = arith.addf %71, %77 : vector<64x16xf32>
    %c2_41 = arith.constant 2 : index
    %c0_42 = arith.constant 0 : index
    %79 = vector.load %arg3[%c2_41, %c0_42] : memref<3x16xf32, #tpu.memory_space<vmem>>, vector<1x16xf32>
    %80 = vector.broadcast %79 : vector<1x16xf32> to vector<64x16xf32>
    %81 = arith.addf %78, %80 : vector<64x16xf32>
    %82 = arith.truncf %81 : vector<64x16xf32> to vector<64x16xbf16>
    %c0_43 = arith.constant 0 : index
    %c0_44 = arith.constant 0 : index
    %83 = vector.load %arg6[%c0_43, %c0_44] : memref<16x64xbf16, #tpu.memory_space<vmem>>, vector<16x64xbf16>
    %cst_45 = arith.constant dense<0.000000e+00> : vector<64x64xf32>
    %84 = tpu.matmul %82, %83, %cst_45 {dimension_numbers = #tpu.dot_dimension_numbers<[1], [0], [0], [1], [0, 0, 1, 1], [], []>} : vector<64x16xbf16>, vector<16x64xbf16>, vector<64x64xf32> -> vector<64x64xf32>
    %c0_46 = arith.constant 0 : index
    %c0_47 = arith.constant 0 : index
    %85 = vector.load %arg7[%c0_46, %c0_47] : memref<1x64xf32, #tpu.memory_space<vmem>>, vector<1x64xf32>
    %86 = vector.broadcast %85 : vector<1x64xf32> to vector<64x64xf32>
    %87 = arith.addf %84, %86 : vector<64x64xf32>
    %88 = arith.addf %87, %4 : vector<64x64xf32>
    %cst_48 = arith.constant 0.000000e+00 : f32
    %89 = vector.broadcast %cst_48 : f32 to vector<64x64xf32>
    %90 = arith.maximumf %88, %89 : vector<64x64xf32>
    %c0_49 = arith.constant 0 : index
    %c0_50 = arith.constant 0 : index
    %c0_51 = arith.constant 0 : index
    %91 = vector.load %arg8[%c0_49, %c0_50, %c0_51] : memref<1x64x64xf32, #tpu.memory_space<vmem>>, vector<1x64x64xf32>
    %92 = vector.shape_cast %91 : vector<1x64x64xf32> to vector<64x64xf32>
    %93 = vector.shape_cast %90 : vector<64x64xf32> to vector<1x64x64xf32>
    tpu.vector_store %arg8[%c0_49, %c0_50, %c0_51], %93 {strides = array<i32>} : memref<1x64x64xf32, #tpu.memory_space<vmem>>, vector<1x64x64xf32>,
    return
  }
  func.func @transform_0(%arg0: i32) -> (i32, i32, i32) {
    %c0_i32 = arith.constant 0 : i32
    %c0_i32_0 = arith.constant 0 : i32
    %c0_i32_1 = arith.constant 0 : i32
    return %arg0, %c0_i32, %c0_i32_0 : i32, i32, i32
  }
  func.func @transform_1(%arg0: i32) -> (i32, i32) {
    %c0_i32 = arith.constant 0 : i32
    %c0_i32_0 = arith.constant 0 : i32
    %c0_i32_1 = arith.constant 0 : i32
    return %c0_i32, %c0_i32_0 : i32, i32
  }
  func.func @transform_2(%arg0: i32) -> (i32, i32) {
    %c0_i32 = arith.constant 0 : i32
    %c0_i32_0 = arith.constant 0 : i32
    %c0_i32_1 = arith.constant 0 : i32
    return %c0_i32, %c0_i32_0 : i32, i32
  }
  func.func @transform_3(%arg0: i32) -> (i32, i32, i32) {
    %c0_i32 = arith.constant 0 : i32
    %c0_i32_0 = arith.constant 0 : i32
    %c0_i32_1 = arith.constant 0 : i32
    %c0_i32_2 = arith.constant 0 : i32
    return %c0_i32, %c0_i32_0, %c0_i32_1 : i32, i32, i32
  }
  func.func @transform_4(%arg0: i32) -> (i32, i32, i32) {
    %c0_i32 = arith.constant 0 : i32
    %c0_i32_0 = arith.constant 0 : i32
    %c0_i32_1 = arith.constant 0 : i32
    %c0_i32_2 = arith.constant 0 : i32
    return %c0_i32, %c0_i32_0, %c0_i32_1 : i32, i32, i32
  }
  func.func @transform_5(%arg0: i32) -> (i32, i32) {
    %c0_i32 = arith.constant 0 : i32
    %c0_i32_0 = arith.constant 0 : i32
    %c0_i32_1 = arith.constant 0 : i32
    return %c0_i32, %c0_i32_0 : i32, i32
  }
  func.func @transform_6(%arg0: i32) -> (i32, i32) {
    %c0_i32 = arith.constant 0 : i32
    %c0_i32_0 = arith.constant 0 : i32
    %c0_i32_1 = arith.constant 0 : i32
    return %c0_i32, %c0_i32_0 : i32, i32
  }
  func.func @transform_7(%arg0: i32) -> (i32, i32, i32) {
    %c0_i32 = arith.constant 0 : i32
    %c0_i32_0 = arith.constant 0 : i32
    %c0_i32_1 = arith.constant 0 : i32
    return %arg0, %c0_i32, %c0_i32_0 : i32, i32, i32
  }
}

module attributes {stable_mosaic.version = 11 : i64} {
  func.func @_sfrb_kernel(%arg0: i32, %arg1: memref<1x16x128xf32, #tpu.memory_space<vmem>>, %arg2: memref<128x32xbf16, #tpu.memory_space<vmem>>, %arg3: memref<3x32xf32, #tpu.memory_space<vmem>>, %arg4: memref<3x1x32xf32, #tpu.memory_space<vmem>>, %arg5: memref<3x1x32xf32, #tpu.memory_space<vmem>>, %arg6: memref<32x128xbf16, #tpu.memory_space<vmem>>, %arg7: memref<1x128xf32, #tpu.memory_space<vmem>>, %arg8: memref<1x16x128xf32, #tpu.memory_space<vmem>>, %arg9: memref<48x32xf32, #tpu.memory_space<vmem>>) attributes {dimension_semantics = [#tpu.dimension_semantics<parallel>], iteration_bounds = array<i64: 2>, scalar_prefetch = 0 : i64, scratch_operands = 1 : i64, tpu.core_type = #tpu.core_type<tc>, window_params = [{transform_indices = @transform_0, window_bounds = array<i64: 1, 16, 128>}, {pipeline_mode = #tpu.pipeline_mode<synchronous>, transform_indices = @transform_1, window_bounds = array<i64: 128, 32>}, {pipeline_mode = #tpu.pipeline_mode<synchronous>, transform_indices = @transform_2, window_bounds = array<i64: 3, 32>}, {pipeline_mode = #tpu.pipeline_mode<synchronous>, transform_indices = @transform_3, window_bounds = array<i64: 3, 1, 32>}, {pipeline_mode = #tpu.pipeline_mode<synchronous>, transform_indices = @transform_4, window_bounds = array<i64: 3, 1, 32>}, {pipeline_mode = #tpu.pipeline_mode<synchronous>, transform_indices = @transform_5, window_bounds = array<i64: 32, 128>}, {pipeline_mode = #tpu.pipeline_mode<synchronous>, transform_indices = @transform_6, window_bounds = array<i64: 1, 128>}, {transform_indices = @transform_7, window_bounds = array<i64: 1, 16, 128>}]} {
    %cst = arith.constant 0.000000e+00 : f32
    %0 = vector.broadcast %cst : f32 to vector<16x32xf32>
    %c0 = arith.constant 0 : index
    %c0_0 = arith.constant 0 : index
    %1 = vector.load %arg9[%c0, %c0_0] : memref<48x32xf32, #tpu.memory_space<vmem>>, vector<16x32xf32>
    tpu.vector_store %arg9[%c0, %c0_0], %0 {strides = array<i32>} : memref<48x32xf32, #tpu.memory_space<vmem>>, vector<16x32xf32>,
    %c32 = arith.constant 32 : index
    %c0_1 = arith.constant 0 : index
    %2 = vector.load %arg9[%c32, %c0_1] : memref<48x32xf32, #tpu.memory_space<vmem>>, vector<16x32xf32>
    tpu.vector_store %arg9[%c32, %c0_1], %0 {strides = array<i32>} : memref<48x32xf32, #tpu.memory_space<vmem>>, vector<16x32xf32>,
    %c0_2 = arith.constant 0 : index
    %c0_3 = arith.constant 0 : index
    %c0_4 = arith.constant 0 : index
    %3 = vector.load %arg1[%c0_2, %c0_3, %c0_4] : memref<1x16x128xf32, #tpu.memory_space<vmem>>, vector<1x16x128xf32>
    %4 = vector.shape_cast %3 : vector<1x16x128xf32> to vector<16x128xf32>
    %5 = arith.truncf %4 : vector<16x128xf32> to vector<16x128xbf16>
    %c0_5 = arith.constant 0 : index
    %c0_6 = arith.constant 0 : index
    %6 = vector.load %arg2[%c0_5, %c0_6] : memref<128x32xbf16, #tpu.memory_space<vmem>>, vector<128x32xbf16>
    %cst_7 = arith.constant dense<0.000000e+00> : vector<16x32xf32>
    %7 = tpu.matmul %5, %6, %cst_7 {dimension_numbers = #tpu.dot_dimension_numbers<[1], [0], [0], [1], [0, 0, 1, 1], [], []>} : vector<16x128xbf16>, vector<128x32xbf16>, vector<16x32xf32> -> vector<16x32xf32>
    %c0_8 = arith.constant 0 : index
    %c0_9 = arith.constant 0 : index
    %8 = vector.load %arg3[%c0_8, %c0_9] : memref<3x32xf32, #tpu.memory_space<vmem>>, vector<1x32xf32>
    %9 = vector.broadcast %8 : vector<1x32xf32> to vector<16x32xf32>
    %10 = arith.addf %7, %9 : vector<16x32xf32>
    %cst_10 = arith.constant 0.000000e+00 : f32
    %11 = vector.broadcast %cst_10 : f32 to vector<16x32xf32>
    %12 = arith.maximumf %10, %11 : vector<16x32xf32>
    %c16 = arith.constant 16 : index
    %c0_11 = arith.constant 0 : index
    %13 = vector.load %arg9[%c16, %c0_11] : memref<48x32xf32, #tpu.memory_space<vmem>>, vector<16x32xf32>
    tpu.vector_store %arg9[%c16, %c0_11], %12 {strides = array<i32>} : memref<48x32xf32, #tpu.memory_space<vmem>>, vector<16x32xf32>,
    %c0_12 = arith.constant 0 : index
    %c0_13 = arith.constant 0 : index
    %14 = vector.load %arg9[%c0_12, %c0_13] : memref<48x32xf32, #tpu.memory_space<vmem>>, vector<16x32xf32>
    %c32_14 = arith.constant 32 : index
    %c0_15 = arith.constant 0 : index
    %15 = vector.load %arg9[%c32_14, %c0_15] : memref<48x32xf32, #tpu.memory_space<vmem>>, vector<16x32xf32>
    %c0_16 = arith.constant 0 : index
    %c0_17 = arith.constant 0 : index
    %c0_18 = arith.constant 0 : index
    %16 = vector.load %arg4[%c0_16, %c0_17, %c0_18] : memref<3x1x32xf32, #tpu.memory_space<vmem>>, vector<1x1x32xf32>
    %17 = vector.shape_cast %16 : vector<1x1x32xf32> to vector<1x32xf32>
    %18 = vector.broadcast %17 : vector<1x32xf32> to vector<16x32xf32>
    %19 = arith.mulf %14, %18 : vector<16x32xf32>
    %c1 = arith.constant 1 : index
    %c0_19 = arith.constant 0 : index
    %c0_20 = arith.constant 0 : index
    %20 = vector.load %arg4[%c1, %c0_19, %c0_20] : memref<3x1x32xf32, #tpu.memory_space<vmem>>, vector<1x1x32xf32>
    %21 = vector.shape_cast %20 : vector<1x1x32xf32> to vector<1x32xf32>
    %22 = vector.broadcast %21 : vector<1x32xf32> to vector<16x32xf32>
    %23 = arith.mulf %12, %22 : vector<16x32xf32>
    %24 = arith.addf %19, %23 : vector<16x32xf32>
    %c2 = arith.constant 2 : index
    %c0_21 = arith.constant 0 : index
    %c0_22 = arith.constant 0 : index
    %25 = vector.load %arg4[%c2, %c0_21, %c0_22] : memref<3x1x32xf32, #tpu.memory_space<vmem>>, vector<1x1x32xf32>
    %26 = vector.shape_cast %25 : vector<1x1x32xf32> to vector<1x32xf32>
    %27 = vector.broadcast %26 : vector<1x32xf32> to vector<16x32xf32>
    %28 = arith.mulf %15, %27 : vector<16x32xf32>
    %29 = arith.addf %24, %28 : vector<16x32xf32>
    %c1_23 = arith.constant 1 : index
    %c0_24 = arith.constant 0 : index
    %30 = vector.load %arg3[%c1_23, %c0_24] : memref<3x32xf32, #tpu.memory_space<vmem>>, vector<1x32xf32>
    %31 = vector.broadcast %30 : vector<1x32xf32> to vector<16x32xf32>
    %32 = arith.addf %29, %31 : vector<16x32xf32>
    %c16_25 = arith.constant 16 : index
    %c0_26 = arith.constant 0 : index
    %33 = vector.load %arg9[%c16_25, %c0_26] : memref<48x32xf32, #tpu.memory_space<vmem>>, vector<16x32xf32>
    tpu.vector_store %arg9[%c16_25, %c0_26], %32 {strides = array<i32>} : memref<48x32xf32, #tpu.memory_space<vmem>>, vector<16x32xf32>,
    %c12 = arith.constant 12 : index
    %c0_27 = arith.constant 0 : index
    %34 = vector.load %arg9[%c12, %c0_27] : memref<48x32xf32, #tpu.memory_space<vmem>>, vector<16x32xf32>
    %c20 = arith.constant 20 : index
    %c0_28 = arith.constant 0 : index
    %35 = vector.load %arg9[%c20, %c0_28] : memref<48x32xf32, #tpu.memory_space<vmem>>, vector<16x32xf32>
    %36 = tpu.iota {dimensions = array<i32: 0>} : vector<16x1xi32>
    %c4_i32 = arith.constant 4 : i32
    %c0_i32 = arith.constant 0 : i32
    %37 = arith.cmpi eq, %c4_i32, %c0_i32 : i32
    %c1_i32 = arith.constant 1 : i32
    %38 = arith.select %37, %c1_i32, %c4_i32 : i32
    %39 = vector.broadcast %38 : i32 to vector<16x1xi32>
    %40 = arith.remsi %36, %39 : vector<16x1xi32>
    %c0_i32_29 = arith.constant 0 : i32
    %41 = vector.broadcast %c0_i32_29 : i32 to vector<16x1xi32>
    %42 = arith.cmpi ne, %40, %41 : vector<16x1xi32>
    %c0_i32_30 = arith.constant 0 : i32
    %43 = vector.broadcast %c0_i32_30 : i32 to vector<16x1xi32>
    %44 = arith.cmpi slt, %40, %43 : vector<16x1xi32>
    %c0_i32_31 = arith.constant 0 : i32
    %45 = arith.cmpi slt, %38, %c0_i32_31 : i32
    %46 = vector.broadcast %45 : i1 to vector<16x1xi1>
    %47 = vector.broadcast %46 : vector<16x1xi1> to vector<16x1xi1>
    %48 = arith.xori %44, %47 : vector<16x1xi1>
    %49 = arith.andi %48, %42 : vector<16x1xi1>
    %50 = vector.broadcast %38 : i32 to vector<16x1xi32>
    %51 = arith.addi %40, %50 : vector<16x1xi32>
    %52 = arith.select %49, %51, %40 : vector<16x1xi1>, vector<16x1xi32>
    %c4_i32_32 = arith.constant 4 : i32
    %53 = vector.broadcast %c4_i32_32 : i32 to vector<16x1xi32>
    %54 = arith.cmpi sge, %52, %53 : vector<16x1xi32>
    %55 = arith.extui %54 : vector<16x1xi1> to vector<16x1xi32>
    %56 = arith.sitofp %55 : vector<16x1xi32> to vector<16x1xf32>
    %c0_i32_33 = arith.constant 0 : i32
    %57 = vector.broadcast %c0_i32_33 : i32 to vector<16x1xi32>
    %58 = arith.cmpi slt, %52, %57 : vector<16x1xi32>
    %59 = arith.extui %58 : vector<16x1xi1> to vector<16x1xi32>
    %60 = arith.sitofp %59 : vector<16x1xi32> to vector<16x1xf32>
    %61 = vector.broadcast %56 : vector<16x1xf32> to vector<16x32xf32>
    %62 = arith.mulf %34, %61 : vector<16x32xf32>
    %c0_34 = arith.constant 0 : index
    %c0_35 = arith.constant 0 : index
    %c0_36 = arith.constant 0 : index
    %63 = vector.load %arg5[%c0_34, %c0_35, %c0_36] : memref<3x1x32xf32, #tpu.memory_space<vmem>>, vector<1x1x32xf32>
    %64 = vector.shape_cast %63 : vector<1x1x32xf32> to vector<1x32xf32>
    %65 = vector.broadcast %64 : vector<1x32xf32> to vector<16x32xf32>
    %66 = arith.mulf %62, %65 : vector<16x32xf32>
    %c1_37 = arith.constant 1 : index
    %c0_38 = arith.constant 0 : index
    %c0_39 = arith.constant 0 : index
    %67 = vector.load %arg5[%c1_37, %c0_38, %c0_39] : memref<3x1x32xf32, #tpu.memory_space<vmem>>, vector<1x1x32xf32>
    %68 = vector.shape_cast %67 : vector<1x1x32xf32> to vector<1x32xf32>
    %69 = vector.broadcast %68 : vector<1x32xf32> to vector<16x32xf32>
    %70 = arith.mulf %32, %69 : vector<16x32xf32>
    %71 = arith.addf %66, %70 : vector<16x32xf32>
    %72 = vector.broadcast %60 : vector<16x1xf32> to vector<16x32xf32>
    %73 = arith.mulf %35, %72 : vector<16x32xf32>
    %c2_40 = arith.constant 2 : index
    %c0_41 = arith.constant 0 : index
    %c0_42 = arith.constant 0 : index
    %74 = vector.load %arg5[%c2_40, %c0_41, %c0_42] : memref<3x1x32xf32, #tpu.memory_space<vmem>>, vector<1x1x32xf32>
    %75 = vector.shape_cast %74 : vector<1x1x32xf32> to vector<1x32xf32>
    %76 = vector.broadcast %75 : vector<1x32xf32> to vector<16x32xf32>
    %77 = arith.mulf %73, %76 : vector<16x32xf32>
    %78 = arith.addf %71, %77 : vector<16x32xf32>
    %c2_43 = arith.constant 2 : index
    %c0_44 = arith.constant 0 : index
    %79 = vector.load %arg3[%c2_43, %c0_44] : memref<3x32xf32, #tpu.memory_space<vmem>>, vector<1x32xf32>
    %80 = vector.broadcast %79 : vector<1x32xf32> to vector<16x32xf32>
    %81 = arith.addf %78, %80 : vector<16x32xf32>
    %82 = arith.truncf %81 : vector<16x32xf32> to vector<16x32xbf16>
    %c0_45 = arith.constant 0 : index
    %c0_46 = arith.constant 0 : index
    %83 = vector.load %arg6[%c0_45, %c0_46] : memref<32x128xbf16, #tpu.memory_space<vmem>>, vector<32x128xbf16>
    %cst_47 = arith.constant dense<0.000000e+00> : vector<16x128xf32>
    %84 = tpu.matmul %82, %83, %cst_47 {dimension_numbers = #tpu.dot_dimension_numbers<[1], [0], [0], [1], [0, 0, 1, 1], [], []>} : vector<16x32xbf16>, vector<32x128xbf16>, vector<16x128xf32> -> vector<16x128xf32>
    %c0_48 = arith.constant 0 : index
    %c0_49 = arith.constant 0 : index
    %85 = vector.load %arg7[%c0_48, %c0_49] : memref<1x128xf32, #tpu.memory_space<vmem>>, vector<1x128xf32>
    %86 = vector.broadcast %85 : vector<1x128xf32> to vector<16x128xf32>
    %87 = arith.addf %84, %86 : vector<16x128xf32>
    %88 = arith.addf %87, %4 : vector<16x128xf32>
    %cst_50 = arith.constant 0.000000e+00 : f32
    %89 = vector.broadcast %cst_50 : f32 to vector<16x128xf32>
    %90 = arith.maximumf %88, %89 : vector<16x128xf32>
    %c0_51 = arith.constant 0 : index
    %c0_52 = arith.constant 0 : index
    %c0_53 = arith.constant 0 : index
    %91 = vector.load %arg8[%c0_51, %c0_52, %c0_53] : memref<1x16x128xf32, #tpu.memory_space<vmem>>, vector<1x16x128xf32>
    %92 = vector.shape_cast %91 : vector<1x16x128xf32> to vector<16x128xf32>
    %93 = vector.shape_cast %90 : vector<16x128xf32> to vector<1x16x128xf32>
    tpu.vector_store %arg8[%c0_51, %c0_52, %c0_53], %93 {strides = array<i32>} : memref<1x16x128xf32, #tpu.memory_space<vmem>>, vector<1x16x128xf32>,
    return
  }
  func.func @transform_0(%arg0: i32) -> (i32, i32, i32) {
    %c0_i32 = arith.constant 0 : i32
    %c0_i32_0 = arith.constant 0 : i32
    %c0_i32_1 = arith.constant 0 : i32
    return %arg0, %c0_i32, %c0_i32_0 : i32, i32, i32
  }
  func.func @transform_1(%arg0: i32) -> (i32, i32) {
    %c0_i32 = arith.constant 0 : i32
    %c0_i32_0 = arith.constant 0 : i32
    %c0_i32_1 = arith.constant 0 : i32
    return %c0_i32, %c0_i32_0 : i32, i32
  }
  func.func @transform_2(%arg0: i32) -> (i32, i32) {
    %c0_i32 = arith.constant 0 : i32
    %c0_i32_0 = arith.constant 0 : i32
    %c0_i32_1 = arith.constant 0 : i32
    return %c0_i32, %c0_i32_0 : i32, i32
  }
  func.func @transform_3(%arg0: i32) -> (i32, i32, i32) {
    %c0_i32 = arith.constant 0 : i32
    %c0_i32_0 = arith.constant 0 : i32
    %c0_i32_1 = arith.constant 0 : i32
    %c0_i32_2 = arith.constant 0 : i32
    return %c0_i32, %c0_i32_0, %c0_i32_1 : i32, i32, i32
  }
  func.func @transform_4(%arg0: i32) -> (i32, i32, i32) {
    %c0_i32 = arith.constant 0 : i32
    %c0_i32_0 = arith.constant 0 : i32
    %c0_i32_1 = arith.constant 0 : i32
    %c0_i32_2 = arith.constant 0 : i32
    return %c0_i32, %c0_i32_0, %c0_i32_1 : i32, i32, i32
  }
  func.func @transform_5(%arg0: i32) -> (i32, i32) {
    %c0_i32 = arith.constant 0 : i32
    %c0_i32_0 = arith.constant 0 : i32
    %c0_i32_1 = arith.constant 0 : i32
    return %c0_i32, %c0_i32_0 : i32, i32
  }
  func.func @transform_6(%arg0: i32) -> (i32, i32) {
    %c0_i32 = arith.constant 0 : i32
    %c0_i32_0 = arith.constant 0 : i32
    %c0_i32_1 = arith.constant 0 : i32
    return %c0_i32, %c0_i32_0 : i32, i32
  }
  func.func @transform_7(%arg0: i32) -> (i32, i32, i32) {
    %c0_i32 = arith.constant 0 : i32
    %c0_i32_0 = arith.constant 0 : i32
    %c0_i32_1 = arith.constant 0 : i32
    return %arg0, %c0_i32, %c0_i32_0 : i32, i32, i32
  }
}

module attributes {stable_mosaic.version = 11 : i64} {
  func.func @_sfrb_kernel(%arg0: i32, %arg1: memref<1x16x128xf32, #tpu.memory_space<vmem>>, %arg2: memref<128x32xbf16, #tpu.memory_space<vmem>>, %arg3: memref<3x32xf32, #tpu.memory_space<vmem>>, %arg4: memref<3x1x32xf32, #tpu.memory_space<vmem>>, %arg5: memref<3x1x32xf32, #tpu.memory_space<vmem>>, %arg6: memref<32x128xbf16, #tpu.memory_space<vmem>>, %arg7: memref<1x128xf32, #tpu.memory_space<vmem>>, %arg8: memref<1x16x128xf32, #tpu.memory_space<vmem>>, %arg9: memref<32x32xf32, #tpu.memory_space<vmem>>) attributes {dimension_semantics = [#tpu.dimension_semantics<parallel>], iteration_bounds = array<i64: 2>, scalar_prefetch = 0 : i64, scratch_operands = 1 : i64, tpu.core_type = #tpu.core_type<tc>, window_params = [{transform_indices = @transform_0, window_bounds = array<i64: 1, 16, 128>}, {pipeline_mode = #tpu.pipeline_mode<synchronous>, transform_indices = @transform_1, window_bounds = array<i64: 128, 32>}, {pipeline_mode = #tpu.pipeline_mode<synchronous>, transform_indices = @transform_2, window_bounds = array<i64: 3, 32>}, {pipeline_mode = #tpu.pipeline_mode<synchronous>, transform_indices = @transform_3, window_bounds = array<i64: 3, 1, 32>}, {pipeline_mode = #tpu.pipeline_mode<synchronous>, transform_indices = @transform_4, window_bounds = array<i64: 3, 1, 32>}, {pipeline_mode = #tpu.pipeline_mode<synchronous>, transform_indices = @transform_5, window_bounds = array<i64: 32, 128>}, {pipeline_mode = #tpu.pipeline_mode<synchronous>, transform_indices = @transform_6, window_bounds = array<i64: 1, 128>}, {transform_indices = @transform_7, window_bounds = array<i64: 1, 16, 128>}]} {
    %cst = arith.constant 0.000000e+00 : f32
    %0 = vector.broadcast %cst : f32 to vector<8x32xf32>
    %c0 = arith.constant 0 : index
    %c0_0 = arith.constant 0 : index
    %1 = vector.load %arg9[%c0, %c0_0] : memref<32x32xf32, #tpu.memory_space<vmem>>, vector<8x32xf32>
    tpu.vector_store %arg9[%c0, %c0_0], %0 {strides = array<i32>} : memref<32x32xf32, #tpu.memory_space<vmem>>, vector<8x32xf32>,
    %c24 = arith.constant 24 : index
    %c0_1 = arith.constant 0 : index
    %2 = vector.load %arg9[%c24, %c0_1] : memref<32x32xf32, #tpu.memory_space<vmem>>, vector<8x32xf32>
    tpu.vector_store %arg9[%c24, %c0_1], %0 {strides = array<i32>} : memref<32x32xf32, #tpu.memory_space<vmem>>, vector<8x32xf32>,
    %c0_2 = arith.constant 0 : index
    %c0_3 = arith.constant 0 : index
    %c0_4 = arith.constant 0 : index
    %3 = vector.load %arg1[%c0_2, %c0_3, %c0_4] : memref<1x16x128xf32, #tpu.memory_space<vmem>>, vector<1x16x128xf32>
    %4 = vector.shape_cast %3 : vector<1x16x128xf32> to vector<16x128xf32>
    %5 = arith.truncf %4 : vector<16x128xf32> to vector<16x128xbf16>
    %c0_5 = arith.constant 0 : index
    %c0_6 = arith.constant 0 : index
    %6 = vector.load %arg2[%c0_5, %c0_6] : memref<128x32xbf16, #tpu.memory_space<vmem>>, vector<128x32xbf16>
    %cst_7 = arith.constant dense<0.000000e+00> : vector<16x32xf32>
    %7 = tpu.matmul %5, %6, %cst_7 {dimension_numbers = #tpu.dot_dimension_numbers<[1], [0], [0], [1], [0, 0, 1, 1], [], []>} : vector<16x128xbf16>, vector<128x32xbf16>, vector<16x32xf32> -> vector<16x32xf32>
    %c0_8 = arith.constant 0 : index
    %c0_9 = arith.constant 0 : index
    %8 = vector.load %arg3[%c0_8, %c0_9] : memref<3x32xf32, #tpu.memory_space<vmem>>, vector<1x32xf32>
    %9 = vector.broadcast %8 : vector<1x32xf32> to vector<16x32xf32>
    %10 = arith.addf %7, %9 : vector<16x32xf32>
    %cst_10 = arith.constant 0.000000e+00 : f32
    %11 = vector.broadcast %cst_10 : f32 to vector<16x32xf32>
    %12 = arith.maximumf %10, %11 : vector<16x32xf32>
    %c8 = arith.constant 8 : index
    %c0_11 = arith.constant 0 : index
    %13 = vector.load %arg9[%c8, %c0_11] : memref<32x32xf32, #tpu.memory_space<vmem>>, vector<16x32xf32>
    tpu.vector_store %arg9[%c8, %c0_11], %12 {strides = array<i32>} : memref<32x32xf32, #tpu.memory_space<vmem>>, vector<16x32xf32>,
    %c0_12 = arith.constant 0 : index
    %c0_13 = arith.constant 0 : index
    %14 = vector.load %arg9[%c0_12, %c0_13] : memref<32x32xf32, #tpu.memory_space<vmem>>, vector<16x32xf32>
    %c16 = arith.constant 16 : index
    %c0_14 = arith.constant 0 : index
    %15 = vector.load %arg9[%c16, %c0_14] : memref<32x32xf32, #tpu.memory_space<vmem>>, vector<16x32xf32>
    %c0_15 = arith.constant 0 : index
    %c0_16 = arith.constant 0 : index
    %c0_17 = arith.constant 0 : index
    %16 = vector.load %arg4[%c0_15, %c0_16, %c0_17] : memref<3x1x32xf32, #tpu.memory_space<vmem>>, vector<1x1x32xf32>
    %17 = vector.shape_cast %16 : vector<1x1x32xf32> to vector<1x32xf32>
    %18 = vector.broadcast %17 : vector<1x32xf32> to vector<16x32xf32>
    %19 = arith.mulf %14, %18 : vector<16x32xf32>
    %c1 = arith.constant 1 : index
    %c0_18 = arith.constant 0 : index
    %c0_19 = arith.constant 0 : index
    %20 = vector.load %arg4[%c1, %c0_18, %c0_19] : memref<3x1x32xf32, #tpu.memory_space<vmem>>, vector<1x1x32xf32>
    %21 = vector.shape_cast %20 : vector<1x1x32xf32> to vector<1x32xf32>
    %22 = vector.broadcast %21 : vector<1x32xf32> to vector<16x32xf32>
    %23 = arith.mulf %12, %22 : vector<16x32xf32>
    %24 = arith.addf %19, %23 : vector<16x32xf32>
    %c2 = arith.constant 2 : index
    %c0_20 = arith.constant 0 : index
    %c0_21 = arith.constant 0 : index
    %25 = vector.load %arg4[%c2, %c0_20, %c0_21] : memref<3x1x32xf32, #tpu.memory_space<vmem>>, vector<1x1x32xf32>
    %26 = vector.shape_cast %25 : vector<1x1x32xf32> to vector<1x32xf32>
    %27 = vector.broadcast %26 : vector<1x32xf32> to vector<16x32xf32>
    %28 = arith.mulf %15, %27 : vector<16x32xf32>
    %29 = arith.addf %24, %28 : vector<16x32xf32>
    %c1_22 = arith.constant 1 : index
    %c0_23 = arith.constant 0 : index
    %30 = vector.load %arg3[%c1_22, %c0_23] : memref<3x32xf32, #tpu.memory_space<vmem>>, vector<1x32xf32>
    %31 = vector.broadcast %30 : vector<1x32xf32> to vector<16x32xf32>
    %32 = arith.addf %29, %31 : vector<16x32xf32>
    %c8_24 = arith.constant 8 : index
    %c0_25 = arith.constant 0 : index
    %33 = vector.load %arg9[%c8_24, %c0_25] : memref<32x32xf32, #tpu.memory_space<vmem>>, vector<16x32xf32>
    tpu.vector_store %arg9[%c8_24, %c0_25], %32 {strides = array<i32>} : memref<32x32xf32, #tpu.memory_space<vmem>>, vector<16x32xf32>,
    %c6 = arith.constant 6 : index
    %c0_26 = arith.constant 0 : index
    %34 = vector.load %arg9[%c6, %c0_26] : memref<32x32xf32, #tpu.memory_space<vmem>>, vector<16x32xf32>
    %c10 = arith.constant 10 : index
    %c0_27 = arith.constant 0 : index
    %35 = vector.load %arg9[%c10, %c0_27] : memref<32x32xf32, #tpu.memory_space<vmem>>, vector<16x32xf32>
    %36 = tpu.iota {dimensions = array<i32: 0>} : vector<16x1xi32>
    %c4_i32 = arith.constant 4 : i32
    %c0_i32 = arith.constant 0 : i32
    %37 = arith.cmpi eq, %c4_i32, %c0_i32 : i32
    %c1_i32 = arith.constant 1 : i32
    %38 = arith.select %37, %c1_i32, %c4_i32 : i32
    %39 = vector.broadcast %38 : i32 to vector<16x1xi32>
    %40 = arith.remsi %36, %39 : vector<16x1xi32>
    %c0_i32_28 = arith.constant 0 : i32
    %41 = vector.broadcast %c0_i32_28 : i32 to vector<16x1xi32>
    %42 = arith.cmpi ne, %40, %41 : vector<16x1xi32>
    %c0_i32_29 = arith.constant 0 : i32
    %43 = vector.broadcast %c0_i32_29 : i32 to vector<16x1xi32>
    %44 = arith.cmpi slt, %40, %43 : vector<16x1xi32>
    %c0_i32_30 = arith.constant 0 : i32
    %45 = arith.cmpi slt, %38, %c0_i32_30 : i32
    %46 = vector.broadcast %45 : i1 to vector<16x1xi1>
    %47 = vector.broadcast %46 : vector<16x1xi1> to vector<16x1xi1>
    %48 = arith.xori %44, %47 : vector<16x1xi1>
    %49 = arith.andi %48, %42 : vector<16x1xi1>
    %50 = vector.broadcast %38 : i32 to vector<16x1xi32>
    %51 = arith.addi %40, %50 : vector<16x1xi32>
    %52 = arith.select %49, %51, %40 : vector<16x1xi1>, vector<16x1xi32>
    %c2_i32 = arith.constant 2 : i32
    %53 = vector.broadcast %c2_i32 : i32 to vector<16x1xi32>
    %54 = arith.cmpi sge, %52, %53 : vector<16x1xi32>
    %55 = arith.extui %54 : vector<16x1xi1> to vector<16x1xi32>
    %56 = arith.sitofp %55 : vector<16x1xi32> to vector<16x1xf32>
    %c2_i32_31 = arith.constant 2 : i32
    %57 = vector.broadcast %c2_i32_31 : i32 to vector<16x1xi32>
    %58 = arith.cmpi slt, %52, %57 : vector<16x1xi32>
    %59 = arith.extui %58 : vector<16x1xi1> to vector<16x1xi32>
    %60 = arith.sitofp %59 : vector<16x1xi32> to vector<16x1xf32>
    %61 = vector.broadcast %56 : vector<16x1xf32> to vector<16x32xf32>
    %62 = arith.mulf %34, %61 : vector<16x32xf32>
    %c0_32 = arith.constant 0 : index
    %c0_33 = arith.constant 0 : index
    %c0_34 = arith.constant 0 : index
    %63 = vector.load %arg5[%c0_32, %c0_33, %c0_34] : memref<3x1x32xf32, #tpu.memory_space<vmem>>, vector<1x1x32xf32>
    %64 = vector.shape_cast %63 : vector<1x1x32xf32> to vector<1x32xf32>
    %65 = vector.broadcast %64 : vector<1x32xf32> to vector<16x32xf32>
    %66 = arith.mulf %62, %65 : vector<16x32xf32>
    %c1_35 = arith.constant 1 : index
    %c0_36 = arith.constant 0 : index
    %c0_37 = arith.constant 0 : index
    %67 = vector.load %arg5[%c1_35, %c0_36, %c0_37] : memref<3x1x32xf32, #tpu.memory_space<vmem>>, vector<1x1x32xf32>
    %68 = vector.shape_cast %67 : vector<1x1x32xf32> to vector<1x32xf32>
    %69 = vector.broadcast %68 : vector<1x32xf32> to vector<16x32xf32>
    %70 = arith.mulf %32, %69 : vector<16x32xf32>
    %71 = arith.addf %66, %70 : vector<16x32xf32>
    %72 = vector.broadcast %60 : vector<16x1xf32> to vector<16x32xf32>
    %73 = arith.mulf %35, %72 : vector<16x32xf32>
    %c2_38 = arith.constant 2 : index
    %c0_39 = arith.constant 0 : index
    %c0_40 = arith.constant 0 : index
    %74 = vector.load %arg5[%c2_38, %c0_39, %c0_40] : memref<3x1x32xf32, #tpu.memory_space<vmem>>, vector<1x1x32xf32>
    %75 = vector.shape_cast %74 : vector<1x1x32xf32> to vector<1x32xf32>
    %76 = vector.broadcast %75 : vector<1x32xf32> to vector<16x32xf32>
    %77 = arith.mulf %73, %76 : vector<16x32xf32>
    %78 = arith.addf %71, %77 : vector<16x32xf32>
    %c2_41 = arith.constant 2 : index
    %c0_42 = arith.constant 0 : index
    %79 = vector.load %arg3[%c2_41, %c0_42] : memref<3x32xf32, #tpu.memory_space<vmem>>, vector<1x32xf32>
    %80 = vector.broadcast %79 : vector<1x32xf32> to vector<16x32xf32>
    %81 = arith.addf %78, %80 : vector<16x32xf32>
    %82 = arith.truncf %81 : vector<16x32xf32> to vector<16x32xbf16>
    %c0_43 = arith.constant 0 : index
    %c0_44 = arith.constant 0 : index
    %83 = vector.load %arg6[%c0_43, %c0_44] : memref<32x128xbf16, #tpu.memory_space<vmem>>, vector<32x128xbf16>
    %cst_45 = arith.constant dense<0.000000e+00> : vector<16x128xf32>
    %84 = tpu.matmul %82, %83, %cst_45 {dimension_numbers = #tpu.dot_dimension_numbers<[1], [0], [0], [1], [0, 0, 1, 1], [], []>} : vector<16x32xbf16>, vector<32x128xbf16>, vector<16x128xf32> -> vector<16x128xf32>
    %c0_46 = arith.constant 0 : index
    %c0_47 = arith.constant 0 : index
    %85 = vector.load %arg7[%c0_46, %c0_47] : memref<1x128xf32, #tpu.memory_space<vmem>>, vector<1x128xf32>
    %86 = vector.broadcast %85 : vector<1x128xf32> to vector<16x128xf32>
    %87 = arith.addf %84, %86 : vector<16x128xf32>
    %88 = arith.addf %87, %4 : vector<16x128xf32>
    %cst_48 = arith.constant 0.000000e+00 : f32
    %89 = vector.broadcast %cst_48 : f32 to vector<16x128xf32>
    %90 = arith.maximumf %88, %89 : vector<16x128xf32>
    %c0_49 = arith.constant 0 : index
    %c0_50 = arith.constant 0 : index
    %c0_51 = arith.constant 0 : index
    %91 = vector.load %arg8[%c0_49, %c0_50, %c0_51] : memref<1x16x128xf32, #tpu.memory_space<vmem>>, vector<1x16x128xf32>
    %92 = vector.shape_cast %91 : vector<1x16x128xf32> to vector<16x128xf32>
    %93 = vector.shape_cast %90 : vector<16x128xf32> to vector<1x16x128xf32>
    tpu.vector_store %arg8[%c0_49, %c0_50, %c0_51], %93 {strides = array<i32>} : memref<1x16x128xf32, #tpu.memory_space<vmem>>, vector<1x16x128xf32>,
    return
  }
  func.func @transform_0(%arg0: i32) -> (i32, i32, i32) {
    %c0_i32 = arith.constant 0 : i32
    %c0_i32_0 = arith.constant 0 : i32
    %c0_i32_1 = arith.constant 0 : i32
    return %arg0, %c0_i32, %c0_i32_0 : i32, i32, i32
  }
  func.func @transform_1(%arg0: i32) -> (i32, i32) {
    %c0_i32 = arith.constant 0 : i32
    %c0_i32_0 = arith.constant 0 : i32
    %c0_i32_1 = arith.constant 0 : i32
    return %c0_i32, %c0_i32_0 : i32, i32
  }
  func.func @transform_2(%arg0: i32) -> (i32, i32) {
    %c0_i32 = arith.constant 0 : i32
    %c0_i32_0 = arith.constant 0 : i32
    %c0_i32_1 = arith.constant 0 : i32
    return %c0_i32, %c0_i32_0 : i32, i32
  }
  func.func @transform_3(%arg0: i32) -> (i32, i32, i32) {
    %c0_i32 = arith.constant 0 : i32
    %c0_i32_0 = arith.constant 0 : i32
    %c0_i32_1 = arith.constant 0 : i32
    %c0_i32_2 = arith.constant 0 : i32
    return %c0_i32, %c0_i32_0, %c0_i32_1 : i32, i32, i32
  }
  func.func @transform_4(%arg0: i32) -> (i32, i32, i32) {
    %c0_i32 = arith.constant 0 : i32
    %c0_i32_0 = arith.constant 0 : i32
    %c0_i32_1 = arith.constant 0 : i32
    %c0_i32_2 = arith.constant 0 : i32
    return %c0_i32, %c0_i32_0, %c0_i32_1 : i32, i32, i32
  }
  func.func @transform_5(%arg0: i32) -> (i32, i32) {
    %c0_i32 = arith.constant 0 : i32
    %c0_i32_0 = arith.constant 0 : i32
    %c0_i32_1 = arith.constant 0 : i32
    return %c0_i32, %c0_i32_0 : i32, i32
  }
  func.func @transform_6(%arg0: i32) -> (i32, i32) {
    %c0_i32 = arith.constant 0 : i32
    %c0_i32_0 = arith.constant 0 : i32
    %c0_i32_1 = arith.constant 0 : i32
    return %c0_i32, %c0_i32_0 : i32, i32
  }
  func.func @transform_7(%arg0: i32) -> (i32, i32, i32) {
    %c0_i32 = arith.constant 0 : i32
    %c0_i32_0 = arith.constant 0 : i32
    %c0_i32_1 = arith.constant 0 : i32
    return %arg0, %c0_i32, %c0_i32_0 : i32, i32, i32
  }
}

module attributes {stable_mosaic.version = 11 : i64} {
  func.func @_dsb_kernel(%arg0: i32, %arg1: memref<16x576xbf16, #tpu.memory_space<vmem>>, %arg2: memref<576x128xbf16, #tpu.memory_space<vmem>>, %arg3: memref<1x128xf32, #tpu.memory_space<vmem>>, %arg4: memref<1x64xf32, #tpu.memory_space<vmem>>, %arg5: memref<1x64xf32, #tpu.memory_space<vmem>>, %arg6: memref<64x128xbf16, #tpu.memory_space<vmem>>, %arg7: memref<16x128xf32, #tpu.memory_space<vmem>>) attributes {dimension_semantics = [#tpu.dimension_semantics<parallel>], iteration_bounds = array<i64: 2>, scalar_prefetch = 0 : i64, scratch_operands = 0 : i64, tpu.core_type = #tpu.core_type<tc>, window_params = [{transform_indices = @transform_0, window_bounds = array<i64: 16, 576>}, {pipeline_mode = #tpu.pipeline_mode<synchronous>, transform_indices = @transform_1, window_bounds = array<i64: 576, 128>}, {pipeline_mode = #tpu.pipeline_mode<synchronous>, transform_indices = @transform_2, window_bounds = array<i64: 1, 128>}, {pipeline_mode = #tpu.pipeline_mode<synchronous>, transform_indices = @transform_3, window_bounds = array<i64: 1, 64>}, {pipeline_mode = #tpu.pipeline_mode<synchronous>, transform_indices = @transform_4, window_bounds = array<i64: 1, 64>}, {pipeline_mode = #tpu.pipeline_mode<synchronous>, transform_indices = @transform_5, window_bounds = array<i64: 64, 128>}, {transform_indices = @transform_6, window_bounds = array<i64: 16, 128>}]} {
    %c0 = arith.constant 0 : index
    %c0_0 = arith.constant 0 : index
    %0 = vector.load %arg1[%c0, %c0_0] : memref<16x576xbf16, #tpu.memory_space<vmem>>, vector<16x576xbf16>
    %c0_1 = arith.constant 0 : index
    %c0_2 = arith.constant 0 : index
    %1 = vector.load %arg2[%c0_1, %c0_2] : memref<576x128xbf16, #tpu.memory_space<vmem>>, vector<576x128xbf16>
    %cst = arith.constant dense<0.000000e+00> : vector<16x128xf32>
    %2 = tpu.matmul %0, %1, %cst {dimension_numbers = #tpu.dot_dimension_numbers<[1], [0], [0], [1], [0, 0, 1, 1], [], []>} : vector<16x576xbf16>, vector<576x128xbf16>, vector<16x128xf32> -> vector<16x128xf32>
    %c0_3 = arith.constant 0 : index
    %c0_4 = arith.constant 0 : index
    %3 = vector.load %arg3[%c0_3, %c0_4] : memref<1x128xf32, #tpu.memory_space<vmem>>, vector<1x128xf32>
    %4 = vector.broadcast %3 : vector<1x128xf32> to vector<16x128xf32>
    %5 = arith.addf %2, %4 : vector<16x128xf32>
    %cst_5 = arith.constant 0.000000e+00 : f32
    %6 = vector.broadcast %cst_5 : f32 to vector<16x128xf32>
    %7 = arith.maximumf %5, %6 : vector<16x128xf32>
    %8 = vector.extract_strided_slice %0 {offsets = [0, 0], sizes = [16, 64], strides = [1, 1]} : vector<16x576xbf16> to vector<16x64xbf16>
    %9 = vector.extract_strided_slice %0 {offsets = [0, 64], sizes = [16, 64], strides = [1, 1]} : vector<16x576xbf16> to vector<16x64xbf16>
    %10 = arith.maximumf %8, %9 : vector<16x64xbf16>
    %11 = vector.extract_strided_slice %0 {offsets = [0, 128], sizes = [16, 64], strides = [1, 1]} : vector<16x576xbf16> to vector<16x64xbf16>
    %12 = arith.maximumf %10, %11 : vector<16x64xbf16>
    %13 = vector.extract_strided_slice %0 {offsets = [0, 192], sizes = [16, 64], strides = [1, 1]} : vector<16x576xbf16> to vector<16x64xbf16>
    %14 = arith.maximumf %12, %13 : vector<16x64xbf16>
    %15 = vector.extract_strided_slice %0 {offsets = [0, 256], sizes = [16, 64], strides = [1, 1]} : vector<16x576xbf16> to vector<16x64xbf16>
    %16 = arith.maximumf %14, %15 : vector<16x64xbf16>
    %17 = vector.extract_strided_slice %0 {offsets = [0, 320], sizes = [16, 64], strides = [1, 1]} : vector<16x576xbf16> to vector<16x64xbf16>
    %18 = arith.maximumf %16, %17 : vector<16x64xbf16>
    %19 = vector.extract_strided_slice %0 {offsets = [0, 384], sizes = [16, 64], strides = [1, 1]} : vector<16x576xbf16> to vector<16x64xbf16>
    %20 = arith.maximumf %18, %19 : vector<16x64xbf16>
    %21 = vector.extract_strided_slice %0 {offsets = [0, 448], sizes = [16, 64], strides = [1, 1]} : vector<16x576xbf16> to vector<16x64xbf16>
    %22 = arith.maximumf %20, %21 : vector<16x64xbf16>
    %23 = vector.extract_strided_slice %0 {offsets = [0, 512], sizes = [16, 64], strides = [1, 1]} : vector<16x576xbf16> to vector<16x64xbf16>
    %24 = arith.maximumf %22, %23 : vector<16x64xbf16>
    %25 = arith.extf %24 : vector<16x64xbf16> to vector<16x64xf32>
    %c0_6 = arith.constant 0 : index
    %c0_7 = arith.constant 0 : index
    %26 = vector.load %arg4[%c0_6, %c0_7] : memref<1x64xf32, #tpu.memory_space<vmem>>, vector<1x64xf32>
    %27 = vector.broadcast %26 : vector<1x64xf32> to vector<16x64xf32>
    %28 = arith.mulf %25, %27 : vector<16x64xf32>
    %c0_8 = arith.constant 0 : index
    %c0_9 = arith.constant 0 : index
    %29 = vector.load %arg5[%c0_8, %c0_9] : memref<1x64xf32, #tpu.memory_space<vmem>>, vector<1x64xf32>
    %30 = vector.broadcast %29 : vector<1x64xf32> to vector<16x64xf32>
    %31 = arith.addf %28, %30 : vector<16x64xf32>
    %cst_10 = arith.constant 0.000000e+00 : f32
    %32 = vector.broadcast %cst_10 : f32 to vector<16x64xf32>
    %33 = arith.maximumf %31, %32 : vector<16x64xf32>
    %34 = arith.truncf %33 : vector<16x64xf32> to vector<16x64xbf16>
    %c0_11 = arith.constant 0 : index
    %c0_12 = arith.constant 0 : index
    %35 = vector.load %arg6[%c0_11, %c0_12] : memref<64x128xbf16, #tpu.memory_space<vmem>>, vector<64x128xbf16>
    %cst_13 = arith.constant dense<0.000000e+00> : vector<16x128xf32>
    %36 = tpu.matmul %34, %35, %cst_13 {dimension_numbers = #tpu.dot_dimension_numbers<[1], [0], [0], [1], [0, 0, 1, 1], [], []>} : vector<16x64xbf16>, vector<64x128xbf16>, vector<16x128xf32> -> vector<16x128xf32>
    %37 = arith.addf %7, %36 : vector<16x128xf32>
    %c0_14 = arith.constant 0 : index
    %c0_15 = arith.constant 0 : index
    %38 = vector.load %arg7[%c0_14, %c0_15] : memref<16x128xf32, #tpu.memory_space<vmem>>, vector<16x128xf32>
    tpu.vector_store %arg7[%c0_14, %c0_15], %37 {strides = array<i32>} : memref<16x128xf32, #tpu.memory_space<vmem>>, vector<16x128xf32>,
    return
  }
  func.func @transform_0(%arg0: i32) -> (i32, i32) {
    %c0_i32 = arith.constant 0 : i32
    %c0_i32_0 = arith.constant 0 : i32
    return %arg0, %c0_i32 : i32, i32
  }
  func.func @transform_1(%arg0: i32) -> (i32, i32) {
    %c0_i32 = arith.constant 0 : i32
    %c0_i32_0 = arith.constant 0 : i32
    %c0_i32_1 = arith.constant 0 : i32
    return %c0_i32, %c0_i32_0 : i32, i32
  }
  func.func @transform_2(%arg0: i32) -> (i32, i32) {
    %c0_i32 = arith.constant 0 : i32
    %c0_i32_0 = arith.constant 0 : i32
    %c0_i32_1 = arith.constant 0 : i32
    return %c0_i32, %c0_i32_0 : i32, i32
  }
  func.func @transform_3(%arg0: i32) -> (i32, i32) {
    %c0_i32 = arith.constant 0 : i32
    %c0_i32_0 = arith.constant 0 : i32
    %c0_i32_1 = arith.constant 0 : i32
    return %c0_i32, %c0_i32_0 : i32, i32
  }
  func.func @transform_4(%arg0: i32) -> (i32, i32) {
    %c0_i32 = arith.constant 0 : i32
    %c0_i32_0 = arith.constant 0 : i32
    %c0_i32_1 = arith.constant 0 : i32
    return %c0_i32, %c0_i32_0 : i32, i32
  }
  func.func @transform_5(%arg0: i32) -> (i32, i32) {
    %c0_i32 = arith.constant 0 : i32
    %c0_i32_0 = arith.constant 0 : i32
    %c0_i32_1 = arith.constant 0 : i32
    return %c0_i32, %c0_i32_0 : i32, i32
  }
  func.func @transform_6(%arg0: i32) -> (i32, i32) {
    %c0_i32 = arith.constant 0 : i32
    %c0_i32_0 = arith.constant 0 : i32
    return %arg0, %c0_i32 : i32, i32
  }
}

module attributes {stable_mosaic.version = 11 : i64} {
  func.func @_sfrb_kernel(%arg0: i32, %arg1: memref<1x16x128xf32, #tpu.memory_space<vmem>>, %arg2: memref<128x32xbf16, #tpu.memory_space<vmem>>, %arg3: memref<3x32xf32, #tpu.memory_space<vmem>>, %arg4: memref<3x1x32xf32, #tpu.memory_space<vmem>>, %arg5: memref<3x1x32xf32, #tpu.memory_space<vmem>>, %arg6: memref<32x128xbf16, #tpu.memory_space<vmem>>, %arg7: memref<1x128xf32, #tpu.memory_space<vmem>>, %arg8: memref<1x16x128xf32, #tpu.memory_space<vmem>>, %arg9: memref<80x32xf32, #tpu.memory_space<vmem>>) attributes {dimension_semantics = [#tpu.dimension_semantics<parallel>], iteration_bounds = array<i64: 2>, scalar_prefetch = 0 : i64, scratch_operands = 1 : i64, tpu.core_type = #tpu.core_type<tc>, window_params = [{transform_indices = @transform_0, window_bounds = array<i64: 1, 16, 128>}, {pipeline_mode = #tpu.pipeline_mode<synchronous>, transform_indices = @transform_1, window_bounds = array<i64: 128, 32>}, {pipeline_mode = #tpu.pipeline_mode<synchronous>, transform_indices = @transform_2, window_bounds = array<i64: 3, 32>}, {pipeline_mode = #tpu.pipeline_mode<synchronous>, transform_indices = @transform_3, window_bounds = array<i64: 3, 1, 32>}, {pipeline_mode = #tpu.pipeline_mode<synchronous>, transform_indices = @transform_4, window_bounds = array<i64: 3, 1, 32>}, {pipeline_mode = #tpu.pipeline_mode<synchronous>, transform_indices = @transform_5, window_bounds = array<i64: 32, 128>}, {pipeline_mode = #tpu.pipeline_mode<synchronous>, transform_indices = @transform_6, window_bounds = array<i64: 1, 128>}, {transform_indices = @transform_7, window_bounds = array<i64: 1, 16, 128>}]} {
    %cst = arith.constant 0.000000e+00 : f32
    %0 = vector.broadcast %cst : f32 to vector<32x32xf32>
    %c0 = arith.constant 0 : index
    %c0_0 = arith.constant 0 : index
    %1 = vector.load %arg9[%c0, %c0_0] : memref<80x32xf32, #tpu.memory_space<vmem>>, vector<32x32xf32>
    tpu.vector_store %arg9[%c0, %c0_0], %0 {strides = array<i32>} : memref<80x32xf32, #tpu.memory_space<vmem>>, vector<32x32xf32>,
    %c48 = arith.constant 48 : index
    %c0_1 = arith.constant 0 : index
    %2 = vector.load %arg9[%c48, %c0_1] : memref<80x32xf32, #tpu.memory_space<vmem>>, vector<32x32xf32>
    tpu.vector_store %arg9[%c48, %c0_1], %0 {strides = array<i32>} : memref<80x32xf32, #tpu.memory_space<vmem>>, vector<32x32xf32>,
    %c0_2 = arith.constant 0 : index
    %c0_3 = arith.constant 0 : index
    %c0_4 = arith.constant 0 : index
    %3 = vector.load %arg1[%c0_2, %c0_3, %c0_4] : memref<1x16x128xf32, #tpu.memory_space<vmem>>, vector<1x16x128xf32>
    %4 = vector.shape_cast %3 : vector<1x16x128xf32> to vector<16x128xf32>
    %5 = arith.truncf %4 : vector<16x128xf32> to vector<16x128xbf16>
    %c0_5 = arith.constant 0 : index
    %c0_6 = arith.constant 0 : index
    %6 = vector.load %arg2[%c0_5, %c0_6] : memref<128x32xbf16, #tpu.memory_space<vmem>>, vector<128x32xbf16>
    %cst_7 = arith.constant dense<0.000000e+00> : vector<16x32xf32>
    %7 = tpu.matmul %5, %6, %cst_7 {dimension_numbers = #tpu.dot_dimension_numbers<[1], [0], [0], [1], [0, 0, 1, 1], [], []>} : vector<16x128xbf16>, vector<128x32xbf16>, vector<16x32xf32> -> vector<16x32xf32>
    %c0_8 = arith.constant 0 : index
    %c0_9 = arith.constant 0 : index
    %8 = vector.load %arg3[%c0_8, %c0_9] : memref<3x32xf32, #tpu.memory_space<vmem>>, vector<1x32xf32>
    %9 = vector.broadcast %8 : vector<1x32xf32> to vector<16x32xf32>
    %10 = arith.addf %7, %9 : vector<16x32xf32>
    %cst_10 = arith.constant 0.000000e+00 : f32
    %11 = vector.broadcast %cst_10 : f32 to vector<16x32xf32>
    %12 = arith.maximumf %10, %11 : vector<16x32xf32>
    %c32 = arith.constant 32 : index
    %c0_11 = arith.constant 0 : index
    %13 = vector.load %arg9[%c32, %c0_11] : memref<80x32xf32, #tpu.memory_space<vmem>>, vector<16x32xf32>
    tpu.vector_store %arg9[%c32, %c0_11], %12 {strides = array<i32>} : memref<80x32xf32, #tpu.memory_space<vmem>>, vector<16x32xf32>,
    %c0_12 = arith.constant 0 : index
    %c0_13 = arith.constant 0 : index
    %14 = vector.load %arg9[%c0_12, %c0_13] : memref<80x32xf32, #tpu.memory_space<vmem>>, vector<16x32xf32>
    %c64 = arith.constant 64 : index
    %c0_14 = arith.constant 0 : index
    %15 = vector.load %arg9[%c64, %c0_14] : memref<80x32xf32, #tpu.memory_space<vmem>>, vector<16x32xf32>
    %c0_15 = arith.constant 0 : index
    %c0_16 = arith.constant 0 : index
    %c0_17 = arith.constant 0 : index
    %16 = vector.load %arg4[%c0_15, %c0_16, %c0_17] : memref<3x1x32xf32, #tpu.memory_space<vmem>>, vector<1x1x32xf32>
    %17 = vector.shape_cast %16 : vector<1x1x32xf32> to vector<1x32xf32>
    %18 = vector.broadcast %17 : vector<1x32xf32> to vector<16x32xf32>
    %19 = arith.mulf %14, %18 : vector<16x32xf32>
    %c1 = arith.constant 1 : index
    %c0_18 = arith.constant 0 : index
    %c0_19 = arith.constant 0 : index
    %20 = vector.load %arg4[%c1, %c0_18, %c0_19] : memref<3x1x32xf32, #tpu.memory_space<vmem>>, vector<1x1x32xf32>
    %21 = vector.shape_cast %20 : vector<1x1x32xf32> to vector<1x32xf32>
    %22 = vector.broadcast %21 : vector<1x32xf32> to vector<16x32xf32>
    %23 = arith.mulf %12, %22 : vector<16x32xf32>
    %24 = arith.addf %19, %23 : vector<16x32xf32>
    %c2 = arith.constant 2 : index
    %c0_20 = arith.constant 0 : index
    %c0_21 = arith.constant 0 : index
    %25 = vector.load %arg4[%c2, %c0_20, %c0_21] : memref<3x1x32xf32, #tpu.memory_space<vmem>>, vector<1x1x32xf32>
    %26 = vector.shape_cast %25 : vector<1x1x32xf32> to vector<1x32xf32>
    %27 = vector.broadcast %26 : vector<1x32xf32> to vector<16x32xf32>
    %28 = arith.mulf %15, %27 : vector<16x32xf32>
    %29 = arith.addf %24, %28 : vector<16x32xf32>
    %c1_22 = arith.constant 1 : index
    %c0_23 = arith.constant 0 : index
    %30 = vector.load %arg3[%c1_22, %c0_23] : memref<3x32xf32, #tpu.memory_space<vmem>>, vector<1x32xf32>
    %31 = vector.broadcast %30 : vector<1x32xf32> to vector<16x32xf32>
    %32 = arith.addf %29, %31 : vector<16x32xf32>
    %c32_24 = arith.constant 32 : index
    %c0_25 = arith.constant 0 : index
    %33 = vector.load %arg9[%c32_24, %c0_25] : memref<80x32xf32, #tpu.memory_space<vmem>>, vector<16x32xf32>
    tpu.vector_store %arg9[%c32_24, %c0_25], %32 {strides = array<i32>} : memref<80x32xf32, #tpu.memory_space<vmem>>, vector<16x32xf32>,
    %c24 = arith.constant 24 : index
    %c0_26 = arith.constant 0 : index
    %34 = vector.load %arg9[%c24, %c0_26] : memref<80x32xf32, #tpu.memory_space<vmem>>, vector<16x32xf32>
    %c40 = arith.constant 40 : index
    %c0_27 = arith.constant 0 : index
    %35 = vector.load %arg9[%c40, %c0_27] : memref<80x32xf32, #tpu.memory_space<vmem>>, vector<16x32xf32>
    %36 = tpu.iota {dimensions = array<i32: 0>} : vector<16x1xi32>
    %c4_i32 = arith.constant 4 : i32
    %c0_i32 = arith.constant 0 : i32
    %37 = arith.cmpi eq, %c4_i32, %c0_i32 : i32
    %c1_i32 = arith.constant 1 : i32
    %38 = arith.select %37, %c1_i32, %c4_i32 : i32
    %39 = vector.broadcast %38 : i32 to vector<16x1xi32>
    %40 = arith.remsi %36, %39 : vector<16x1xi32>
    %c0_i32_28 = arith.constant 0 : i32
    %41 = vector.broadcast %c0_i32_28 : i32 to vector<16x1xi32>
    %42 = arith.cmpi ne, %40, %41 : vector<16x1xi32>
    %c0_i32_29 = arith.constant 0 : i32
    %43 = vector.broadcast %c0_i32_29 : i32 to vector<16x1xi32>
    %44 = arith.cmpi slt, %40, %43 : vector<16x1xi32>
    %c0_i32_30 = arith.constant 0 : i32
    %45 = arith.cmpi slt, %38, %c0_i32_30 : i32
    %46 = vector.broadcast %45 : i1 to vector<16x1xi1>
    %47 = vector.broadcast %46 : vector<16x1xi1> to vector<16x1xi1>
    %48 = arith.xori %44, %47 : vector<16x1xi1>
    %49 = arith.andi %48, %42 : vector<16x1xi1>
    %50 = vector.broadcast %38 : i32 to vector<16x1xi32>
    %51 = arith.addi %40, %50 : vector<16x1xi32>
    %52 = arith.select %49, %51, %40 : vector<16x1xi1>, vector<16x1xi32>
    %c8_i32 = arith.constant 8 : i32
    %53 = vector.broadcast %c8_i32 : i32 to vector<16x1xi32>
    %54 = arith.cmpi sge, %52, %53 : vector<16x1xi32>
    %55 = arith.extui %54 : vector<16x1xi1> to vector<16x1xi32>
    %56 = arith.sitofp %55 : vector<16x1xi32> to vector<16x1xf32>
    %c-4_i32 = arith.constant -4 : i32
    %57 = vector.broadcast %c-4_i32 : i32 to vector<16x1xi32>
    %58 = arith.cmpi slt, %52, %57 : vector<16x1xi32>
    %59 = arith.extui %58 : vector<16x1xi1> to vector<16x1xi32>
    %60 = arith.sitofp %59 : vector<16x1xi32> to vector<16x1xf32>
    %61 = vector.broadcast %56 : vector<16x1xf32> to vector<16x32xf32>
    %62 = arith.mulf %34, %61 : vector<16x32xf32>
    %c0_31 = arith.constant 0 : index
    %c0_32 = arith.constant 0 : index
    %c0_33 = arith.constant 0 : index
    %63 = vector.load %arg5[%c0_31, %c0_32, %c0_33] : memref<3x1x32xf32, #tpu.memory_space<vmem>>, vector<1x1x32xf32>
    %64 = vector.shape_cast %63 : vector<1x1x32xf32> to vector<1x32xf32>
    %65 = vector.broadcast %64 : vector<1x32xf32> to vector<16x32xf32>
    %66 = arith.mulf %62, %65 : vector<16x32xf32>
    %c1_34 = arith.constant 1 : index
    %c0_35 = arith.constant 0 : index
    %c0_36 = arith.constant 0 : index
    %67 = vector.load %arg5[%c1_34, %c0_35, %c0_36] : memref<3x1x32xf32, #tpu.memory_space<vmem>>, vector<1x1x32xf32>
    %68 = vector.shape_cast %67 : vector<1x1x32xf32> to vector<1x32xf32>
    %69 = vector.broadcast %68 : vector<1x32xf32> to vector<16x32xf32>
    %70 = arith.mulf %32, %69 : vector<16x32xf32>
    %71 = arith.addf %66, %70 : vector<16x32xf32>
    %72 = vector.broadcast %60 : vector<16x1xf32> to vector<16x32xf32>
    %73 = arith.mulf %35, %72 : vector<16x32xf32>
    %c2_37 = arith.constant 2 : index
    %c0_38 = arith.constant 0 : index
    %c0_39 = arith.constant 0 : index
    %74 = vector.load %arg5[%c2_37, %c0_38, %c0_39] : memref<3x1x32xf32, #tpu.memory_space<vmem>>, vector<1x1x32xf32>
    %75 = vector.shape_cast %74 : vector<1x1x32xf32> to vector<1x32xf32>
    %76 = vector.broadcast %75 : vector<1x32xf32> to vector<16x32xf32>
    %77 = arith.mulf %73, %76 : vector<16x32xf32>
    %78 = arith.addf %71, %77 : vector<16x32xf32>
    %c2_40 = arith.constant 2 : index
    %c0_41 = arith.constant 0 : index
    %79 = vector.load %arg3[%c2_40, %c0_41] : memref<3x32xf32, #tpu.memory_space<vmem>>, vector<1x32xf32>
    %80 = vector.broadcast %79 : vector<1x32xf32> to vector<16x32xf32>
    %81 = arith.addf %78, %80 : vector<16x32xf32>
    %82 = arith.truncf %81 : vector<16x32xf32> to vector<16x32xbf16>
    %c0_42 = arith.constant 0 : index
    %c0_43 = arith.constant 0 : index
    %83 = vector.load %arg6[%c0_42, %c0_43] : memref<32x128xbf16, #tpu.memory_space<vmem>>, vector<32x128xbf16>
    %cst_44 = arith.constant dense<0.000000e+00> : vector<16x128xf32>
    %84 = tpu.matmul %82, %83, %cst_44 {dimension_numbers = #tpu.dot_dimension_numbers<[1], [0], [0], [1], [0, 0, 1, 1], [], []>} : vector<16x32xbf16>, vector<32x128xbf16>, vector<16x128xf32> -> vector<16x128xf32>
    %c0_45 = arith.constant 0 : index
    %c0_46 = arith.constant 0 : index
    %85 = vector.load %arg7[%c0_45, %c0_46] : memref<1x128xf32, #tpu.memory_space<vmem>>, vector<1x128xf32>
    %86 = vector.broadcast %85 : vector<1x128xf32> to vector<16x128xf32>
    %87 = arith.addf %84, %86 : vector<16x128xf32>
    %88 = arith.addf %87, %4 : vector<16x128xf32>
    %cst_47 = arith.constant 0.000000e+00 : f32
    %89 = vector.broadcast %cst_47 : f32 to vector<16x128xf32>
    %90 = arith.maximumf %88, %89 : vector<16x128xf32>
    %c0_48 = arith.constant 0 : index
    %c0_49 = arith.constant 0 : index
    %c0_50 = arith.constant 0 : index
    %91 = vector.load %arg8[%c0_48, %c0_49, %c0_50] : memref<1x16x128xf32, #tpu.memory_space<vmem>>, vector<1x16x128xf32>
    %92 = vector.shape_cast %91 : vector<1x16x128xf32> to vector<16x128xf32>
    %93 = vector.shape_cast %90 : vector<16x128xf32> to vector<1x16x128xf32>
    tpu.vector_store %arg8[%c0_48, %c0_49, %c0_50], %93 {strides = array<i32>} : memref<1x16x128xf32, #tpu.memory_space<vmem>>, vector<1x16x128xf32>,
    return
  }
  func.func @transform_0(%arg0: i32) -> (i32, i32, i32) {
    %c0_i32 = arith.constant 0 : i32
    %c0_i32_0 = arith.constant 0 : i32
    %c0_i32_1 = arith.constant 0 : i32
    return %arg0, %c0_i32, %c0_i32_0 : i32, i32, i32
  }
  func.func @transform_1(%arg0: i32) -> (i32, i32) {
    %c0_i32 = arith.constant 0 : i32
    %c0_i32_0 = arith.constant 0 : i32
    %c0_i32_1 = arith.constant 0 : i32
    return %c0_i32, %c0_i32_0 : i32, i32
  }
  func.func @transform_2(%arg0: i32) -> (i32, i32) {
    %c0_i32 = arith.constant 0 : i32
    %c0_i32_0 = arith.constant 0 : i32
    %c0_i32_1 = arith.constant 0 : i32
    return %c0_i32, %c0_i32_0 : i32, i32
  }
  func.func @transform_3(%arg0: i32) -> (i32, i32, i32) {
    %c0_i32 = arith.constant 0 : i32
    %c0_i32_0 = arith.constant 0 : i32
    %c0_i32_1 = arith.constant 0 : i32
    %c0_i32_2 = arith.constant 0 : i32
    return %c0_i32, %c0_i32_0, %c0_i32_1 : i32, i32, i32
  }
  func.func @transform_4(%arg0: i32) -> (i32, i32, i32) {
    %c0_i32 = arith.constant 0 : i32
    %c0_i32_0 = arith.constant 0 : i32
    %c0_i32_1 = arith.constant 0 : i32
    %c0_i32_2 = arith.constant 0 : i32
    return %c0_i32, %c0_i32_0, %c0_i32_1 : i32, i32, i32
  }
  func.func @transform_5(%arg0: i32) -> (i32, i32) {
    %c0_i32 = arith.constant 0 : i32
    %c0_i32_0 = arith.constant 0 : i32
    %c0_i32_1 = arith.constant 0 : i32
    return %c0_i32, %c0_i32_0 : i32, i32
  }
  func.func @transform_6(%arg0: i32) -> (i32, i32) {
    %c0_i32 = arith.constant 0 : i32
    %c0_i32_0 = arith.constant 0 : i32
    %c0_i32_1 = arith.constant 0 : i32
    return %c0_i32, %c0_i32_0 : i32, i32
  }
  func.func @transform_7(%arg0: i32) -> (i32, i32, i32) {
    %c0_i32 = arith.constant 0 : i32
    %c0_i32_0 = arith.constant 0 : i32
    %c0_i32_1 = arith.constant 0 : i32
    return %arg0, %c0_i32, %c0_i32_0 : i32, i32, i32
  }
}

module attributes {stable_mosaic.version = 11 : i64} {
  func.func @_sfrb_kernel(%arg0: i32, %arg1: memref<1x16x128xf32, #tpu.memory_space<vmem>>, %arg2: memref<128x32xbf16, #tpu.memory_space<vmem>>, %arg3: memref<3x32xf32, #tpu.memory_space<vmem>>, %arg4: memref<3x1x32xf32, #tpu.memory_space<vmem>>, %arg5: memref<3x1x32xf32, #tpu.memory_space<vmem>>, %arg6: memref<32x128xbf16, #tpu.memory_space<vmem>>, %arg7: memref<1x128xf32, #tpu.memory_space<vmem>>, %arg8: memref<1x16x128xf32, #tpu.memory_space<vmem>>, %arg9: memref<144x32xf32, #tpu.memory_space<vmem>>) attributes {dimension_semantics = [#tpu.dimension_semantics<parallel>], iteration_bounds = array<i64: 2>, scalar_prefetch = 0 : i64, scratch_operands = 1 : i64, tpu.core_type = #tpu.core_type<tc>, window_params = [{transform_indices = @transform_0, window_bounds = array<i64: 1, 16, 128>}, {pipeline_mode = #tpu.pipeline_mode<synchronous>, transform_indices = @transform_1, window_bounds = array<i64: 128, 32>}, {pipeline_mode = #tpu.pipeline_mode<synchronous>, transform_indices = @transform_2, window_bounds = array<i64: 3, 32>}, {pipeline_mode = #tpu.pipeline_mode<synchronous>, transform_indices = @transform_3, window_bounds = array<i64: 3, 1, 32>}, {pipeline_mode = #tpu.pipeline_mode<synchronous>, transform_indices = @transform_4, window_bounds = array<i64: 3, 1, 32>}, {pipeline_mode = #tpu.pipeline_mode<synchronous>, transform_indices = @transform_5, window_bounds = array<i64: 32, 128>}, {pipeline_mode = #tpu.pipeline_mode<synchronous>, transform_indices = @transform_6, window_bounds = array<i64: 1, 128>}, {transform_indices = @transform_7, window_bounds = array<i64: 1, 16, 128>}]} {
    %cst = arith.constant 0.000000e+00 : f32
    %0 = vector.broadcast %cst : f32 to vector<64x32xf32>
    %c0 = arith.constant 0 : index
    %c0_0 = arith.constant 0 : index
    %1 = vector.load %arg9[%c0, %c0_0] : memref<144x32xf32, #tpu.memory_space<vmem>>, vector<64x32xf32>
    tpu.vector_store %arg9[%c0, %c0_0], %0 {strides = array<i32>} : memref<144x32xf32, #tpu.memory_space<vmem>>, vector<64x32xf32>,
    %c80 = arith.constant 80 : index
    %c0_1 = arith.constant 0 : index
    %2 = vector.load %arg9[%c80, %c0_1] : memref<144x32xf32, #tpu.memory_space<vmem>>, vector<64x32xf32>
    tpu.vector_store %arg9[%c80, %c0_1], %0 {strides = array<i32>} : memref<144x32xf32, #tpu.memory_space<vmem>>, vector<64x32xf32>,
    %c0_2 = arith.constant 0 : index
    %c0_3 = arith.constant 0 : index
    %c0_4 = arith.constant 0 : index
    %3 = vector.load %arg1[%c0_2, %c0_3, %c0_4] : memref<1x16x128xf32, #tpu.memory_space<vmem>>, vector<1x16x128xf32>
    %4 = vector.shape_cast %3 : vector<1x16x128xf32> to vector<16x128xf32>
    %5 = arith.truncf %4 : vector<16x128xf32> to vector<16x128xbf16>
    %c0_5 = arith.constant 0 : index
    %c0_6 = arith.constant 0 : index
    %6 = vector.load %arg2[%c0_5, %c0_6] : memref<128x32xbf16, #tpu.memory_space<vmem>>, vector<128x32xbf16>
    %cst_7 = arith.constant dense<0.000000e+00> : vector<16x32xf32>
    %7 = tpu.matmul %5, %6, %cst_7 {dimension_numbers = #tpu.dot_dimension_numbers<[1], [0], [0], [1], [0, 0, 1, 1], [], []>} : vector<16x128xbf16>, vector<128x32xbf16>, vector<16x32xf32> -> vector<16x32xf32>
    %c0_8 = arith.constant 0 : index
    %c0_9 = arith.constant 0 : index
    %8 = vector.load %arg3[%c0_8, %c0_9] : memref<3x32xf32, #tpu.memory_space<vmem>>, vector<1x32xf32>
    %9 = vector.broadcast %8 : vector<1x32xf32> to vector<16x32xf32>
    %10 = arith.addf %7, %9 : vector<16x32xf32>
    %cst_10 = arith.constant 0.000000e+00 : f32
    %11 = vector.broadcast %cst_10 : f32 to vector<16x32xf32>
    %12 = arith.maximumf %10, %11 : vector<16x32xf32>
    %c64 = arith.constant 64 : index
    %c0_11 = arith.constant 0 : index
    %13 = vector.load %arg9[%c64, %c0_11] : memref<144x32xf32, #tpu.memory_space<vmem>>, vector<16x32xf32>
    tpu.vector_store %arg9[%c64, %c0_11], %12 {strides = array<i32>} : memref<144x32xf32, #tpu.memory_space<vmem>>, vector<16x32xf32>,
    %c0_12 = arith.constant 0 : index
    %c0_13 = arith.constant 0 : index
    %14 = vector.load %arg9[%c0_12, %c0_13] : memref<144x32xf32, #tpu.memory_space<vmem>>, vector<16x32xf32>
    %c128 = arith.constant 128 : index
    %c0_14 = arith.constant 0 : index
    %15 = vector.load %arg9[%c128, %c0_14] : memref<144x32xf32, #tpu.memory_space<vmem>>, vector<16x32xf32>
    %c0_15 = arith.constant 0 : index
    %c0_16 = arith.constant 0 : index
    %c0_17 = arith.constant 0 : index
    %16 = vector.load %arg4[%c0_15, %c0_16, %c0_17] : memref<3x1x32xf32, #tpu.memory_space<vmem>>, vector<1x1x32xf32>
    %17 = vector.shape_cast %16 : vector<1x1x32xf32> to vector<1x32xf32>
    %18 = vector.broadcast %17 : vector<1x32xf32> to vector<16x32xf32>
    %19 = arith.mulf %14, %18 : vector<16x32xf32>
    %c1 = arith.constant 1 : index
    %c0_18 = arith.constant 0 : index
    %c0_19 = arith.constant 0 : index
    %20 = vector.load %arg4[%c1, %c0_18, %c0_19] : memref<3x1x32xf32, #tpu.memory_space<vmem>>, vector<1x1x32xf32>
    %21 = vector.shape_cast %20 : vector<1x1x32xf32> to vector<1x32xf32>
    %22 = vector.broadcast %21 : vector<1x32xf32> to vector<16x32xf32>
    %23 = arith.mulf %12, %22 : vector<16x32xf32>
    %24 = arith.addf %19, %23 : vector<16x32xf32>
    %c2 = arith.constant 2 : index
    %c0_20 = arith.constant 0 : index
    %c0_21 = arith.constant 0 : index
    %25 = vector.load %arg4[%c2, %c0_20, %c0_21] : memref<3x1x32xf32, #tpu.memory_space<vmem>>, vector<1x1x32xf32>
    %26 = vector.shape_cast %25 : vector<1x1x32xf32> to vector<1x32xf32>
    %27 = vector.broadcast %26 : vector<1x32xf32> to vector<16x32xf32>
    %28 = arith.mulf %15, %27 : vector<16x32xf32>
    %29 = arith.addf %24, %28 : vector<16x32xf32>
    %c1_22 = arith.constant 1 : index
    %c0_23 = arith.constant 0 : index
    %30 = vector.load %arg3[%c1_22, %c0_23] : memref<3x32xf32, #tpu.memory_space<vmem>>, vector<1x32xf32>
    %31 = vector.broadcast %30 : vector<1x32xf32> to vector<16x32xf32>
    %32 = arith.addf %29, %31 : vector<16x32xf32>
    %c64_24 = arith.constant 64 : index
    %c0_25 = arith.constant 0 : index
    %33 = vector.load %arg9[%c64_24, %c0_25] : memref<144x32xf32, #tpu.memory_space<vmem>>, vector<16x32xf32>
    tpu.vector_store %arg9[%c64_24, %c0_25], %32 {strides = array<i32>} : memref<144x32xf32, #tpu.memory_space<vmem>>, vector<16x32xf32>,
    %c48 = arith.constant 48 : index
    %c0_26 = arith.constant 0 : index
    %34 = vector.load %arg9[%c48, %c0_26] : memref<144x32xf32, #tpu.memory_space<vmem>>, vector<16x32xf32>
    %c80_27 = arith.constant 80 : index
    %c0_28 = arith.constant 0 : index
    %35 = vector.load %arg9[%c80_27, %c0_28] : memref<144x32xf32, #tpu.memory_space<vmem>>, vector<16x32xf32>
    %36 = tpu.iota {dimensions = array<i32: 0>} : vector<16x1xi32>
    %c4_i32 = arith.constant 4 : i32
    %c0_i32 = arith.constant 0 : i32
    %37 = arith.cmpi eq, %c4_i32, %c0_i32 : i32
    %c1_i32 = arith.constant 1 : i32
    %38 = arith.select %37, %c1_i32, %c4_i32 : i32
    %39 = vector.broadcast %38 : i32 to vector<16x1xi32>
    %40 = arith.remsi %36, %39 : vector<16x1xi32>
    %c0_i32_29 = arith.constant 0 : i32
    %41 = vector.broadcast %c0_i32_29 : i32 to vector<16x1xi32>
    %42 = arith.cmpi ne, %40, %41 : vector<16x1xi32>
    %c0_i32_30 = arith.constant 0 : i32
    %43 = vector.broadcast %c0_i32_30 : i32 to vector<16x1xi32>
    %44 = arith.cmpi slt, %40, %43 : vector<16x1xi32>
    %c0_i32_31 = arith.constant 0 : i32
    %45 = arith.cmpi slt, %38, %c0_i32_31 : i32
    %46 = vector.broadcast %45 : i1 to vector<16x1xi1>
    %47 = vector.broadcast %46 : vector<16x1xi1> to vector<16x1xi1>
    %48 = arith.xori %44, %47 : vector<16x1xi1>
    %49 = arith.andi %48, %42 : vector<16x1xi1>
    %50 = vector.broadcast %38 : i32 to vector<16x1xi32>
    %51 = arith.addi %40, %50 : vector<16x1xi32>
    %52 = arith.select %49, %51, %40 : vector<16x1xi1>, vector<16x1xi32>
    %c16_i32 = arith.constant 16 : i32
    %53 = vector.broadcast %c16_i32 : i32 to vector<16x1xi32>
    %54 = arith.cmpi sge, %52, %53 : vector<16x1xi32>
    %55 = arith.extui %54 : vector<16x1xi1> to vector<16x1xi32>
    %56 = arith.sitofp %55 : vector<16x1xi32> to vector<16x1xf32>
    %c-12_i32 = arith.constant -12 : i32
    %57 = vector.broadcast %c-12_i32 : i32 to vector<16x1xi32>
    %58 = arith.cmpi slt, %52, %57 : vector<16x1xi32>
    %59 = arith.extui %58 : vector<16x1xi1> to vector<16x1xi32>
    %60 = arith.sitofp %59 : vector<16x1xi32> to vector<16x1xf32>
    %61 = vector.broadcast %56 : vector<16x1xf32> to vector<16x32xf32>
    %62 = arith.mulf %34, %61 : vector<16x32xf32>
    %c0_32 = arith.constant 0 : index
    %c0_33 = arith.constant 0 : index
    %c0_34 = arith.constant 0 : index
    %63 = vector.load %arg5[%c0_32, %c0_33, %c0_34] : memref<3x1x32xf32, #tpu.memory_space<vmem>>, vector<1x1x32xf32>
    %64 = vector.shape_cast %63 : vector<1x1x32xf32> to vector<1x32xf32>
    %65 = vector.broadcast %64 : vector<1x32xf32> to vector<16x32xf32>
    %66 = arith.mulf %62, %65 : vector<16x32xf32>
    %c1_35 = arith.constant 1 : index
    %c0_36 = arith.constant 0 : index
    %c0_37 = arith.constant 0 : index
    %67 = vector.load %arg5[%c1_35, %c0_36, %c0_37] : memref<3x1x32xf32, #tpu.memory_space<vmem>>, vector<1x1x32xf32>
    %68 = vector.shape_cast %67 : vector<1x1x32xf32> to vector<1x32xf32>
    %69 = vector.broadcast %68 : vector<1x32xf32> to vector<16x32xf32>
    %70 = arith.mulf %32, %69 : vector<16x32xf32>
    %71 = arith.addf %66, %70 : vector<16x32xf32>
    %72 = vector.broadcast %60 : vector<16x1xf32> to vector<16x32xf32>
    %73 = arith.mulf %35, %72 : vector<16x32xf32>
    %c2_38 = arith.constant 2 : index
    %c0_39 = arith.constant 0 : index
    %c0_40 = arith.constant 0 : index
    %74 = vector.load %arg5[%c2_38, %c0_39, %c0_40] : memref<3x1x32xf32, #tpu.memory_space<vmem>>, vector<1x1x32xf32>
    %75 = vector.shape_cast %74 : vector<1x1x32xf32> to vector<1x32xf32>
    %76 = vector.broadcast %75 : vector<1x32xf32> to vector<16x32xf32>
    %77 = arith.mulf %73, %76 : vector<16x32xf32>
    %78 = arith.addf %71, %77 : vector<16x32xf32>
    %c2_41 = arith.constant 2 : index
    %c0_42 = arith.constant 0 : index
    %79 = vector.load %arg3[%c2_41, %c0_42] : memref<3x32xf32, #tpu.memory_space<vmem>>, vector<1x32xf32>
    %80 = vector.broadcast %79 : vector<1x32xf32> to vector<16x32xf32>
    %81 = arith.addf %78, %80 : vector<16x32xf32>
    %82 = arith.truncf %81 : vector<16x32xf32> to vector<16x32xbf16>
    %c0_43 = arith.constant 0 : index
    %c0_44 = arith.constant 0 : index
    %83 = vector.load %arg6[%c0_43, %c0_44] : memref<32x128xbf16, #tpu.memory_space<vmem>>, vector<32x128xbf16>
    %cst_45 = arith.constant dense<0.000000e+00> : vector<16x128xf32>
    %84 = tpu.matmul %82, %83, %cst_45 {dimension_numbers = #tpu.dot_dimension_numbers<[1], [0], [0], [1], [0, 0, 1, 1], [], []>} : vector<16x32xbf16>, vector<32x128xbf16>, vector<16x128xf32> -> vector<16x128xf32>
    %c0_46 = arith.constant 0 : index
    %c0_47 = arith.constant 0 : index
    %85 = vector.load %arg7[%c0_46, %c0_47] : memref<1x128xf32, #tpu.memory_space<vmem>>, vector<1x128xf32>
    %86 = vector.broadcast %85 : vector<1x128xf32> to vector<16x128xf32>
    %87 = arith.addf %84, %86 : vector<16x128xf32>
    %88 = arith.addf %87, %4 : vector<16x128xf32>
    %cst_48 = arith.constant 0.000000e+00 : f32
    %89 = vector.broadcast %cst_48 : f32 to vector<16x128xf32>
    %90 = arith.maximumf %88, %89 : vector<16x128xf32>
    %c0_49 = arith.constant 0 : index
    %c0_50 = arith.constant 0 : index
    %c0_51 = arith.constant 0 : index
    %91 = vector.load %arg8[%c0_49, %c0_50, %c0_51] : memref<1x16x128xf32, #tpu.memory_space<vmem>>, vector<1x16x128xf32>
    %92 = vector.shape_cast %91 : vector<1x16x128xf32> to vector<16x128xf32>
    %93 = vector.shape_cast %90 : vector<16x128xf32> to vector<1x16x128xf32>
    tpu.vector_store %arg8[%c0_49, %c0_50, %c0_51], %93 {strides = array<i32>} : memref<1x16x128xf32, #tpu.memory_space<vmem>>, vector<1x16x128xf32>,
    return
  }
  func.func @transform_0(%arg0: i32) -> (i32, i32, i32) {
    %c0_i32 = arith.constant 0 : i32
    %c0_i32_0 = arith.constant 0 : i32
    %c0_i32_1 = arith.constant 0 : i32
    return %arg0, %c0_i32, %c0_i32_0 : i32, i32, i32
  }
  func.func @transform_1(%arg0: i32) -> (i32, i32) {
    %c0_i32 = arith.constant 0 : i32
    %c0_i32_0 = arith.constant 0 : i32
    %c0_i32_1 = arith.constant 0 : i32
    return %c0_i32, %c0_i32_0 : i32, i32
  }
  func.func @transform_2(%arg0: i32) -> (i32, i32) {
    %c0_i32 = arith.constant 0 : i32
    %c0_i32_0 = arith.constant 0 : i32
    %c0_i32_1 = arith.constant 0 : i32
    return %c0_i32, %c0_i32_0 : i32, i32
  }
  func.func @transform_3(%arg0: i32) -> (i32, i32, i32) {
    %c0_i32 = arith.constant 0 : i32
    %c0_i32_0 = arith.constant 0 : i32
    %c0_i32_1 = arith.constant 0 : i32
    %c0_i32_2 = arith.constant 0 : i32
    return %c0_i32, %c0_i32_0, %c0_i32_1 : i32, i32, i32
  }
  func.func @transform_4(%arg0: i32) -> (i32, i32, i32) {
    %c0_i32 = arith.constant 0 : i32
    %c0_i32_0 = arith.constant 0 : i32
    %c0_i32_1 = arith.constant 0 : i32
    %c0_i32_2 = arith.constant 0 : i32
    return %c0_i32, %c0_i32_0, %c0_i32_1 : i32, i32, i32
  }
  func.func @transform_5(%arg0: i32) -> (i32, i32) {
    %c0_i32 = arith.constant 0 : i32
    %c0_i32_0 = arith.constant 0 : i32
    %c0_i32_1 = arith.constant 0 : i32
    return %c0_i32, %c0_i32_0 : i32, i32
  }
  func.func @transform_6(%arg0: i32) -> (i32, i32) {
    %c0_i32 = arith.constant 0 : i32
    %c0_i32_0 = arith.constant 0 : i32
    %c0_i32_1 = arith.constant 0 : i32
    return %c0_i32, %c0_i32_0 : i32, i32
  }
  func.func @transform_7(%arg0: i32) -> (i32, i32, i32) {
    %c0_i32 = arith.constant 0 : i32
    %c0_i32_0 = arith.constant 0 : i32
    %c0_i32_1 = arith.constant 0 : i32
    return %arg0, %c0_i32, %c0_i32_0 : i32, i32, i32
  }
}

module attributes {stable_mosaic.version = 11 : i64} {
  func.func @_head_kernel(%arg0: i32, %arg1: memref<1x128x16xf32, #tpu.memory_space<vmem>>, %arg2: memref<2x128xbf16, #tpu.memory_space<vmem>>, %arg3: memref<16x1024xbf16, #tpu.memory_space<vmem>>, %arg4: memref<1x2x1024xf32, #tpu.memory_space<vmem>>) attributes {dimension_semantics = [#tpu.dimension_semantics<parallel>], iteration_bounds = array<i64: 2>, scalar_prefetch = 0 : i64, scratch_operands = 0 : i64, tpu.core_type = #tpu.core_type<tc>, window_params = [{transform_indices = @transform_0, window_bounds = array<i64: 1, 128, 16>}, {pipeline_mode = #tpu.pipeline_mode<synchronous>, transform_indices = @transform_1, window_bounds = array<i64: 2, 128>}, {pipeline_mode = #tpu.pipeline_mode<synchronous>, transform_indices = @transform_2, window_bounds = array<i64: 16, 1024>}, {transform_indices = @transform_3, window_bounds = array<i64: 1, 2, 1024>}]} {
    %c0 = arith.constant 0 : index
    %c0_0 = arith.constant 0 : index
    %c0_1 = arith.constant 0 : index
    %0 = vector.load %arg1[%c0, %c0_0, %c0_1] : memref<1x128x16xf32, #tpu.memory_space<vmem>>, vector<1x128x16xf32>
    %1 = vector.shape_cast %0 : vector<1x128x16xf32> to vector<128x16xf32>
    %c0_2 = arith.constant 0 : index
    %c0_3 = arith.constant 0 : index
    %2 = vector.load %arg2[%c0_2, %c0_3] : memref<2x128xbf16, #tpu.memory_space<vmem>>, vector<2x128xbf16>
    %3 = arith.truncf %1 : vector<128x16xf32> to vector<128x16xbf16>
    %cst = arith.constant dense<0.000000e+00> : vector<2x16xf32>
    %4 = tpu.matmul %2, %3, %cst {dimension_numbers = #tpu.dot_dimension_numbers<[1], [0], [0], [1], [0, 0, 1, 1], [], []>} : vector<2x128xbf16>, vector<128x16xbf16>, vector<2x16xf32> -> vector<2x16xf32>
    %5 = arith.truncf %4 : vector<2x16xf32> to vector<2x16xbf16>
    %c0_4 = arith.constant 0 : index
    %c0_5 = arith.constant 0 : index
    %6 = vector.load %arg3[%c0_4, %c0_5] : memref<16x1024xbf16, #tpu.memory_space<vmem>>, vector<16x1024xbf16>
    %cst_6 = arith.constant dense<0.000000e+00> : vector<2x1024xf32>
    %7 = tpu.matmul %5, %6, %cst_6 {dimension_numbers = #tpu.dot_dimension_numbers<[1], [0], [0], [1], [0, 0, 1, 1], [], []>} : vector<2x16xbf16>, vector<16x1024xbf16>, vector<2x1024xf32> -> vector<2x1024xf32>
    %c0_7 = arith.constant 0 : index
    %c0_8 = arith.constant 0 : index
    %c0_9 = arith.constant 0 : index
    %8 = vector.load %arg4[%c0_7, %c0_8, %c0_9] : memref<1x2x1024xf32, #tpu.memory_space<vmem>>, vector<1x2x1024xf32>
    %9 = vector.shape_cast %8 : vector<1x2x1024xf32> to vector<2x1024xf32>
    %10 = vector.shape_cast %7 : vector<2x1024xf32> to vector<1x2x1024xf32>
    tpu.vector_store %arg4[%c0_7, %c0_8, %c0_9], %10 {strides = array<i32>} : memref<1x2x1024xf32, #tpu.memory_space<vmem>>, vector<1x2x1024xf32>,
    return
  }
  func.func @transform_0(%arg0: i32) -> (i32, i32, i32) {
    %c0_i32 = arith.constant 0 : i32
    %c0_i32_0 = arith.constant 0 : i32
    %c0_i32_1 = arith.constant 0 : i32
    return %arg0, %c0_i32, %c0_i32_0 : i32, i32, i32
  }
  func.func @transform_1(%arg0: i32) -> (i32, i32) {
    %c0_i32 = arith.constant 0 : i32
    %c0_i32_0 = arith.constant 0 : i32
    %c0_i32_1 = arith.constant 0 : i32
    return %c0_i32, %c0_i32_0 : i32, i32
  }
  func.func @transform_2(%arg0: i32) -> (i32, i32) {
    %c0_i32 = arith.constant 0 : i32
    %c0_i32_0 = arith.constant 0 : i32
    %c0_i32_1 = arith.constant 0 : i32
    return %c0_i32, %c0_i32_0 : i32, i32
  }
  func.func @transform_3(%arg0: i32) -> (i32, i32, i32) {
    %c0_i32 = arith.constant 0 : i32
    %c0_i32_0 = arith.constant 0 : i32
    %c0_i32_1 = arith.constant 0 : i32
    return %arg0, %c0_i32, %c0_i32_0 : i32, i32, i32
  }
}

</mosaic_0001>

<bundles_post_ra>
// kernel: esfnet_forward.11
= control target key start
LH: loop header
LB: loop body
LE: loop exit
PB: predicated region body
PF: predicated region fallthrough
CT: control target
= control target key end

     0   :  { %s799_s12 = smov 0   ;;  %s963_s0 = inlined_call_operand.vmem [shape: bf16[512,32], index: 0, kind: input, shape index: {}]   ;;  %s964_s1 = inlined_call_operand.vmem [shape: bf16[32,16], index: 1, kind: input, shape index: {}]   ;;  %s965_s2 = inlined_call_operand.vmem [shape: f32[1,16], index: 2, kind: input, shape index: {}]   ;;  %s966_s3 = inlined_call_operand.vmem [shape: f32[512,16], index: 3, kind: output, shape index: {}]  }
   0x1 LB: > { %s641_s13 = sadd.s32 4294967295, %s777_s12   ;;  %p645_p0 = scmp.ge.s32.totalorder %s777_s12, 1  ;;  %s777_s12 = sphi %s799_s12, %s13_s12  }
   0x2   : > { %p138_p1 = scmp.lt.s32.totalorder %s777_s12, 3 }
   0x4   : > { %p139_p2 = pnand %p645_p0, %p138_p1 }
   0x5   : > { %s646_s16 = sshll.u32 (!%p139_p2), %s641_s13, 5 }
   0x6   : > { %142 = sbr.rel (%p139_p2) target bundleno = 248 (0xf8), region = 32  ;;  %p163_p3 = scmp.lt.s32.totalorder (!%p139_p2), %s646_s16, 63 }
   0xb   : > { %v753_v0 = vld [vmem:[%s964_s1 + $0x8] sm:$0xff]   ;;  %v754_v1 = vld [vmem:[%s964_s1] sm:$0xff]   ;;  %s968_s16 = smov (!%p163_p3, %s646_s16), 63  ;;  %vm310_vm0 = vcmask 261120   ;;  %vm552_vm1 = vcmask 130048  }
   0xc   : > { %705 = vmatprep.subr.bf16.mxu0 %v753_v0  ;;  %741 = vmatprep.subr.bf16.mxu1 %v753_v0  ;;  %s647_s19 = sshll.u32 %s968_s16, 2  ;;  %v856_v18 = vld [vmem:[%s965_s2] ss:$0 sm:$0xff]  ;;  %s649_s25 = sshll.u32 %s968_s16, 3 }
   0xd   : > { %706 = vmatpush3.bf16.msra.mxu0 %v753_v0  ;;  %743 = vmatpush3.bf16.msra.mxu1 %v753_v0  ;;  %s819_s22 = scalar_lea.vmem %s963_s0, %s647_s19  ;;  %s863_s28 = scalar_lea.vmem %s966_s3, %s649_s25 }
   0xe   : > { %707 = vmatprep.subr.bf16.mxu0 %v754_v1  ;;  %742 = vmatprep.subr.bf16.mxu1 %v754_v1  ;;  %v755_v2 = vld [vmem:[%s819_s22] sm:$0xff]   ;;  %v757_v4 = vld [vmem:[%s819_s22 + $0x8] sm:$0xff]   ;;  %v759_v6 = vld [vmem:[%s819_s22 + $0x10] sm:$0xff]  }
   0xf   : > { %v756_v3 = vld [vmem:[%s819_s22 + $0x40] sm:$0xff]   ;;  %709 = vmatprep.mubr.msk.bf16.mxu0 %vm310_vm0, %v755_v2  ;;  %v758_v5 = vld [vmem:[%s819_s22 + $0x48] sm:$0xff]   ;;  %v760_v7 = vld [vmem:[%s819_s22 + $0x50] sm:$0xff]  }
  0x10   : > { %725 = vmatprep.mubr.msk.bf16.mxu1 %vm310_vm0, %v756_v3  ;;  %v761_v8 = vld [vmem:[%s819_s22 + $0x18] sm:$0xff]   ;;  %v763_v10 = vld [vmem:[%s819_s22 + $0x20] sm:$0xff]   ;;  %v765_v12 = vld [vmem:[%s819_s22 + $0x28] sm:$0xff]  }
  0x11   : > { %708 = vmatpush3.bf16.msra.mxu0 %v754_v1  ;;  %744 = vmatpush3.bf16.msra.mxu1 %v754_v1  ;;  %v762_v9 = vld [vmem:[%s819_s22 + $0x58] sm:$0xff]   ;;  %v764_v11 = vld [vmem:[%s819_s22 + $0x60] sm:$0xff]   ;;  %v766_v13 = vld [vmem:[%s819_s22 + $0x68] sm:$0xff]  }
  0x12   : > { %v767_v14 = vld [vmem:[%s819_s22 + $0x30] sm:$0xff]   ;;  %v769_v16 = vld [vmem:[%s819_s22 + $0x38] sm:$0xff]  }
  0x13   : > { %v768_v15 = vld [vmem:[%s819_s22 + $0x70] sm:$0xff]   ;;  %v770_v17 = vld [vmem:[%s819_s22 + $0x78] sm:$0xff]  }
  0x14   : > { %710 = vmatmul.mubr.msk.bf16.vlgmr.msra.gmra.mxu0 %vm310_vm0, %v757_v4  ;;  %726 = vmatmul.mubr.msk.bf16.vlgmr.msra.gmra.mxu1 %vm310_vm0, %v758_v5 }
  0x15   : > { %713 = vmatprep.mubr.msk.bf16.mxu0 %vm310_vm0, %v759_v6  ;;  %729 = vmatprep.mubr.msk.bf16.mxu1 %vm310_vm0, %v760_v7 }
  0x1c   : > { %714 = vmatmul.mubr.msk.bf16.gmra.mxu0 %vm310_vm0, %v761_v8  ;;  %730 = vmatmul.mubr.msk.bf16.gmra.mxu1 %vm310_vm0, %v762_v9 }
  0x1d   : > { %717 = vmatprep.mubr.msk.bf16.mxu0 %vm310_vm0, %v763_v10  ;;  %733 = vmatprep.mubr.msk.bf16.mxu1 %vm310_vm0, %v764_v11 }
  0x24   : > { %718 = vmatmul.mubr.msk.bf16.gmra.mxu0 %vm310_vm0, %v765_v12  ;;  %734 = vmatmul.mubr.msk.bf16.gmra.mxu1 %vm310_vm0, %v766_v13 }
  0x25   : > { %721 = vmatprep.mubr.msk.bf16.mxu0 %vm310_vm0, %v767_v14  ;;  %737 = vmatprep.mubr.msk.bf16.mxu1 %vm310_vm0, %v768_v15 }
  0x2c   : > { %722 = vmatmul.mubr.msk.bf16.gmra.mxu0 %vm310_vm0, %v769_v16  ;;  %738 = vmatmul.mubr.msk.bf16.gmra.mxu1 %vm310_vm0, %v770_v17 }
  0xd4   : > { %v711_v19 = vpop.f32.mrf.mxu0  ;;  %v727_v21 = vpop.f32.mrf.mxu1 }
  0xd5   : > { %v402_v20 = vadd.f32 %v711_v19, %v856_v18  ;;  %v466_v22 = vadd.f32 %v727_v21, %v856_v18 }
  0xd6   : > { %v393_v23 = vpop.f32.mrf.mxu0  ;;  %v457_v26 = vpop.f32.mrf.mxu1 }
  0xd7   : > { %v522_v24 = vmax.f32 %v402_v20, 0.0  ;;  %v394_v25 = vadd.f32 %v856_v18, %v393_v23  ;;  %v538_v27 = vmax.f32 %v466_v22, 0.0  ;;  %v458_v28 = vadd.f32 %v856_v18, %v457_v26 }
  0xd8   : > { %v712_v29 = vpop.f32.mrf.mxu0  ;;  %v728_v32 = vpop.f32.mrf.mxu1 }
  0xd9   : > { %555 = vst.msk [vmem:[%s863_s28 + $0x10] sm:$0xff] %vm552_vm1, %v522_v24  ;;  %v520_v30 = vmax.f32 %v394_v25, 0.0  ;;  %v405_v31 = vadd.f32 %v712_v29, %v856_v18  ;;  %571 = vst.msk [vmem:[%s863_s28 + $0x90] sm:$0xff] %vm552_vm1, %v538_v27  ;;  %v536_v33 = vmax.f32 %v458_v28, 0.0  ;;  %v469_v34 = vadd.f32 %v728_v32, %v856_v18 }
  0xda   : > { %v396_v35 = vpop.f32.mrf.mxu0  ;;  %v460_v38 = vpop.f32.mrf.mxu1 }
  0xdb   : > { %553 = vst.msk [vmem:[%s863_s28] sm:$0xff] %vm552_vm1, %v520_v30  ;;  %v523_v36 = vmax.f32 %v405_v31, 0.0  ;;  %v397_v37 = vadd.f32 %v856_v18, %v396_v35  ;;  %569 = vst.msk [vmem:[%s863_s28 + $0x80] sm:$0xff] %vm552_vm1, %v536_v33  ;;  %v539_v39 = vmax.f32 %v469_v34, 0.0  ;;  %v461_v40 = vadd.f32 %v856_v18, %v460_v38 }
  0xdc   : > { %v715_v41 = vpop.f32.mrf.mxu0  ;;  %v731_v44 = vpop.f32.mrf.mxu1 }
  0xdd   : > { %556 = vst.msk [vmem:[%s863_s28 + $0x18] sm:$0xff] %vm552_vm1, %v523_v36  ;;  %v521_v42 = vmax.f32 %v397_v37, 0.0  ;;  %v418_v43 = vadd.f32 %v715_v41, %v856_v18  ;;  %572 = vst.msk [vmem:[%s863_s28 + $0x98] sm:$0xff] %vm552_vm1, %v539_v39  ;;  %v537_v45 = vmax.f32 %v461_v40, 0.0  ;;  %v482_v46 = vadd.f32 %v731_v44, %v856_v18 }
  0xde   : > { %v409_v47 = vpop.f32.mrf.mxu0  ;;  %v473_v50 = vpop.f32.mrf.mxu1 }
  0xdf   : > { %554 = vst.msk [vmem:[%s863_s28 + $0x8] sm:$0xff] %vm552_vm1, %v521_v42  ;;  %v526_v48 = vmax.f32 %v418_v43, 0.0  ;;  %v410_v49 = vadd.f32 %v856_v18, %v409_v47  ;;  %570 = vst.msk [vmem:[%s863_s28 + $0x88] sm:$0xff] %vm552_vm1, %v537_v45  ;;  %v542_v51 = vmax.f32 %v482_v46, 0.0  ;;  %v474_v52 = vadd.f32 %v856_v18, %v473_v50 }
  0xe0   : > { %v716_v53 = vpop.f32.mrf.mxu0  ;;  %v732_v56 = vpop.f32.mrf.mxu1 }
  0xe1   : > { %559 = vst.msk [vmem:[%s863_s28 + $0x30] sm:$0xff] %vm552_vm1, %v526_v48  ;;  %v524_v54 = vmax.f32 %v410_v49, 0.0  ;;  %v421_v55 = vadd.f32 %v716_v53, %v856_v18  ;;  %575 = vst.msk [vmem:[%s863_s28 + $0xb0] sm:$0xff] %vm552_vm1, %v542_v51  ;;  %v540_v57 = vmax.f32 %v474_v52, 0.0  ;;  %v485_v58 = vadd.f32 %v732_v56, %v856_v18 }
  0xe2   : > { %v412_v59 = vpop.f32.mrf.mxu0  ;;  %v476_v62 = vpop.f32.mrf.mxu1 }
  0xe3   : > { %557 = vst.msk [vmem:[%s863_s28 + $0x20] sm:$0xff] %vm552_vm1, %v524_v54  ;;  %v527_v60 = vmax.f32 %v421_v55, 0.0  ;;  %v413_v61 = vadd.f32 %v856_v18, %v412_v59  ;;  %573 = vst.msk [vmem:[%s863_s28 + $0xa0] sm:$0xff] %vm552_vm1, %v540_v57  ;;  %v543_v63 = vmax.f32 %v485_v58, 0.0  ;;  %v477_v0 = vadd.f32 %v856_v18, %v476_v62 }
  0xe4   : > { %v719_v1 = vpop.f32.mrf.mxu0  ;;  %v735_v4 = vpop.f32.mrf.mxu1 }
  0xe5   : > { %560 = vst.msk [vmem:[%s863_s28 + $0x38] sm:$0xff] %vm552_vm1, %v527_v60  ;;  %v525_v2 = vmax.f32 %v413_v61, 0.0  ;;  %v434_v3 = vadd.f32 %v719_v1, %v856_v18  ;;  %576 = vst.msk [vmem:[%s863_s28 + $0xb8] sm:$0xff] %vm552_vm1, %v543_v63  ;;  %v541_v5 = vmax.f32 %v477_v0, 0.0  ;;  %v498_v6 = vadd.f32 %v735_v4, %v856_v18 }
  0xe6   : > { %v425_v7 = vpop.f32.mrf.mxu0  ;;  %v489_v10 = vpop.f32.mrf.mxu1 }
  0xe7   : > { %558 = vst.msk [vmem:[%s863_s28 + $0x28] sm:$0xff] %vm552_vm1, %v525_v2  ;;  %v530_v8 = vmax.f32 %v434_v3, 0.0  ;;  %v426_v9 = vadd.f32 %v856_v18, %v425_v7  ;;  %574 = vst.msk [vmem:[%s863_s28 + $0xa8] sm:$0xff] %vm552_vm1, %v541_v5  ;;  %v546_v11 = vmax.f32 %v498_v6, 0.0  ;;  %v490_v12 = vadd.f32 %v856_v18, %v489_v10 }
  0xe8   : > { %v720_v13 = vpop.f32.mrf.mxu0  ;;  %v736_v16 = vpop.f32.mrf.mxu1 }
  0xe9   : > { %563 = vst.msk [vmem:[%s863_s28 + $0x50] sm:$0xff] %vm552_vm1, %v530_v8  ;;  %v528_v14 = vmax.f32 %v426_v9, 0.0  ;;  %v437_v15 = vadd.f32 %v720_v13, %v856_v18  ;;  %579 = vst.msk [vmem:[%s863_s28 + $0xd0] sm:$0xff] %vm552_vm1, %v546_v11  ;;  %v544_v17 = vmax.f32 %v490_v12, 0.0  ;;  %v501_v19 = vadd.f32 %v736_v16, %v856_v18 }
  0xea   : > { %v428_v20 = vpop.f32.mrf.mxu0  ;;  %v492_v23 = vpop.f32.mrf.mxu1 }
  0xeb   : > { %561 = vst.msk [vmem:[%s863_s28 + $0x40] sm:$0xff] %vm552_vm1, %v528_v14  ;;  %v531_v21 = vmax.f32 %v437_v15, 0.0  ;;  %v429_v22 = vadd.f32 %v856_v18, %v428_v20  ;;  %577 = vst.msk [vmem:[%s863_s28 + $0xc0] sm:$0xff] %vm552_vm1, %v544_v17  ;;  %v547_v24 = vmax.f32 %v501_v19, 0.0  ;;  %v493_v25 = vadd.f32 %v856_v18, %v492_v23 }
  0xec   : > { %v723_v26 = vpop.f32.mrf.mxu0  ;;  %v739_v29 = vpop.f32.mrf.mxu1 }
  0xed   : > { %564 = vst.msk [vmem:[%s863_s28 + $0x58] sm:$0xff] %vm552_vm1, %v531_v21  ;;  %v529_v27 = vmax.f32 %v429_v22, 0.0  ;;  %v450_v28 = vadd.f32 %v723_v26, %v856_v18  ;;  %580 = vst.msk [vmem:[%s863_s28 + $0xd8] sm:$0xff] %vm552_vm1, %v547_v24  ;;  %v545_v30 = vmax.f32 %v493_v25, 0.0  ;;  %v514_v31 = vadd.f32 %v739_v29, %v856_v18 }
  0xee   : > { %v441_v32 = vpop.f32.mrf.mxu0  ;;  %v505_v35 = vpop.f32.mrf.mxu1 }
  0xef   : > { %562 = vst.msk [vmem:[%s863_s28 + $0x48] sm:$0xff] %vm552_vm1, %v529_v27  ;;  %v534_v33 = vmax.f32 %v450_v28, 0.0  ;;  %v442_v34 = vadd.f32 %v856_v18, %v441_v32  ;;  %578 = vst.msk [vmem:[%s863_s28 + $0xc8] sm:$0xff] %vm552_vm1, %v545_v30  ;;  %v550_v36 = vmax.f32 %v514_v31, 0.0  ;;  %v506_v37 = vadd.f32 %v856_v18, %v505_v35 }
  0xf0   : > { %v724_v38 = vpop.f32.mrf.mxu0  ;;  %v740_v41 = vpop.f32.mrf.mxu1 }
  0xf1   : > { %567 = vst.msk [vmem:[%s863_s28 + $0x70] sm:$0xff] %vm552_vm1, %v534_v33  ;;  %v532_v39 = vmax.f32 %v442_v34, 0.0  ;;  %v453_v40 = vadd.f32 %v724_v38, %v856_v18  ;;  %583 = vst.msk [vmem:[%s863_s28 + $0xf0] sm:$0xff] %vm552_vm1, %v550_v36  ;;  %v548_v42 = vmax.f32 %v506_v37, 0.0  ;;  %v517_v43 = vadd.f32 %v740_v41, %v856_v18 }
  0xf2   : > { %v444_v44 = vpop.f32.mrf.mxu0  ;;  %v508_v47 = vpop.f32.mrf.mxu1 }
  0xf3   : > { %565 = vst.msk [vmem:[%s863_s28 + $0x60] sm:$0xff] %vm552_vm1, %v532_v39  ;;  %v535_v45 = vmax.f32 %v453_v40, 0.0  ;;  %v445_v46 = vadd.f32 %v856_v18, %v444_v44  ;;  %581 = vst.msk [vmem:[%s863_s28 + $0xe0] sm:$0xff] %vm552_vm1, %v548_v42  ;;  %v551_v48 = vmax.f32 %v517_v43, 0.0  ;;  %v509_v49 = vadd.f32 %v856_v18, %v508_v47 }
  0xf5   : > { %568 = vst.msk [vmem:[%s863_s28 + $0x78] sm:$0xff] %vm552_vm1, %v535_v45  ;;  %v533_v50 = vmax.f32 %v445_v46, 0.0  ;;  %584 = vst.msk [vmem:[%s863_s28 + $0xf8] sm:$0xff] %vm552_vm1, %v551_v48  ;;  %v549_v51 = vmax.f32 %v509_v49, 0.0 }
  0xf7   : > { %566 = vst.msk [vmem:[%s863_s28 + $0x68] sm:$0xff] %vm552_vm1, %v533_v50  ;;  %582 = vst.msk [vmem:[%s863_s28 + $0xe8] sm:$0xff] %vm552_vm1, %v549_v51 }
  0xf8 PF: > { %s13_s12 = sadd.s32 1, %s777_s12  }
  0xf9   : > { %p10_p4 = scmp.ge.s32.totalorder %s13_s12, 4  }
  0xfb   :  { %12 = sbr.rel (!%p10_p4) target bundleno = 1 (0x1), region = 62 }

// kernel: esfnet_forward.12
= control target key start
LH: loop header
LB: loop body
LE: loop exit
PB: predicated region body
PF: predicated region fallthrough
CT: control target
= control target key end

     0   :  { %s1084_s21 = smov 0   ;;  %s1399_s0 = inlined_call_operand.vmem [shape: bf16[128,144], index: 0, kind: input, shape index: {}]   ;;  %s1400_s1 = inlined_call_operand.vmem [shape: bf16[144,64], index: 1, kind: input, shape index: {}]   ;;  %s1401_s2 = inlined_call_operand.vmem [shape: f32[1,64], index: 2, kind: input, shape index: {}]   ;;  %s1402_s3 = inlined_call_operand.vmem [shape: f32[1,16], index: 3, kind: input, shape index: {}]   ;;  %s1403_s4 = inlined_call_operand.vmem [shape: f32[1,16], index: 4, kind: input, shape index: {}]   ;;  %s1404_s5 = inlined_call_operand.vmem [shape: bf16[16,64], index: 5, kind: input, shape index: {}]   ;;  %s1405_s6 = inlined_call_operand.vmem [shape: f32[128,64], index: 6, kind: output, shape index: {}]  }
   0x1 LB: > { %s924_s22 = sadd.s32 4294967295, %s1039_s21   ;;  %p928_p0 = scmp.ge.s32.totalorder %s1039_s21, 1  ;;  %s1039_s21 = sphi %s1084_s21, %s16_s21  }
   0x2   : > { %p214_p1 = scmp.lt.s32.totalorder %s1039_s21, 3 }
   0x4   : > { %p215_p2 = pnand %p928_p0, %p214_p1 }
   0x5   : > { %s929_s23 = sshll.u32 (!%p215_p2), %s924_s22, 3  ;;  %s1041_s28 = smov (!%p215_p2), 112  }
   0x6   : > { %218 = sbr.rel (%p215_p2) target bundleno = 454 (0x1c6), region = 44  ;;  %p246_p3 = scmp.lt.s32.totalorder (!%p215_p2), %s929_s23, 15 }
   0x7   : > { %s1042_s29 = smov (!%p215_p2), 96   ;;  %s1043_s30 = smov (!%p215_p2), 80  }
   0x8   : > { %s1044_s7 = smov (!%p215_p2), 64   ;;  %s1046_s14 = smov (!%p215_p2), 48  }
   0x9   : > { %s1047_s26 = smov (!%p215_p2), 32  }
   0xb   : > { %s1407_s23 = smov (!%p246_p3, %s929_s23), 15  ;;  %v1015_v4 = vld [vmem:[%s1400_s1 + $0x38] sm:$0xff]   ;;  %v1045_v7 = vmov 0   ;;  %v1016_v8 = vld [vmem:[%s1400_s1 + $0x30] sm:$0xff]   ;;  %v1017_v9 = vld [vmem:[%s1400_s1 + $0x28] sm:$0xff]   ;;  %vm382_vm0 = vcmask 130048  }
   0xc   : > { %s965_s24 = sshll.u32 %s1407_s23, 3  ;;  %395 = vmatprep.subr.bf16.mxu0 %v1045_v7  ;;  %981 = vmatprep.subr.bf16.mxu1 %v1045_v7  ;;  %v1018_v12 = vld [vmem:[%s1400_s1 + $0x20] sm:$0xff]   ;;  %v1019_v13 = vld [vmem:[%s1400_s1 + $0x18] sm:$0xff]   ;;  %v1020_v14 = vld [vmem:[%s1400_s1 + $0x10] sm:$0xff]   ;;  %vm859_vm1 = vcmask 523264  }
   0xd   : > { %s1100_s27 = scalar_lea.vmem %s1399_s0, %s965_s24  ;;  %396 = vmatpush1.bf16.msra.mxu0 %v1015_v4  ;;  %990 = vmatpush1.bf16.msra.mxu1 %v1015_v4  ;;  %v1021_v15 = vld [vmem:[%s1400_s1 + $0x8] sm:$0xff]   ;;  %v1022_v16 = vld [vmem:[%s1400_s1] sm:$0xff]   ;;  %s1378_s18 = scalar_lea.vmem %s1405_s6, %s965_s24 }
   0xe   : > { %v1103_v0 = vld [vmem:[%s1100_s27 + $0x10] sm:$0xff]  ;;  %v1106_v1 = vld [vmem:[%s1100_s27] sm:$0xff]  ;;  %v1113_v2 = vld [vmem:[%s1100_s27 + $0x18] sm:$0xff]  ;;  %397 = vmatprep.subr.bf16.mxu0 %v1045_v7  ;;  %982 = vmatprep.subr.bf16.mxu1 %v1045_v7 }
   0xf   : > { %472 = vrot.lane.b32.xlu1 %v1103_v0, %s1041_s28  ;;  %468 = vrot.lane.b32.xlu0 %v1106_v1, %s1041_s28  ;;  %v1116_v3 = vld [vmem:[%s1100_s27 + $0x8] sm:$0xff]  ;;  %v1153_v6 = vld [vmem:[%s1100_s27 + $0x20] sm:$0xff]  ;;  %v938_v22 = vcombine.high %v1103_v0, %v1113_v2  ;;  %v937_v23 = vcombine.low %v1103_v0, %v1113_v2 }
  0x10   : > { %v1150_v5 = vld [vmem:[%s1100_s27 + $0x28] sm:$0xff]  ;;  %v1170_v10 = vld [vmem:[%s1100_s27 + $0x38] sm:$0xff]  ;;  %v1173_v11 = vld [vmem:[%s1100_s27 + $0x30] sm:$0xff]  ;;  %v936_v18 = vcombine.high %v1106_v1, %v1116_v3  ;;  %v935_v19 = vcombine.low %v1106_v1, %v1116_v3 }
  0x11   : > { %398 = vmatpush1.bf16.msra.mxu0 %v1016_v8  ;;  %991 = vmatpush1.bf16.msra.mxu1 %v1016_v8  ;;  %v1023_v17 = vld [vmem:[%s1400_s1 + $0x40] sm:$0xff]   ;;  %v942_v20 = vcombine.high %v1173_v11, %v1170_v10  ;;  %v941_v21 = vcombine.low %v1173_v11, %v1170_v10  ;;  %v940_v25 = vcombine.high %v1153_v6, %v1150_v5 }
  0x12   : > { %399 = vmatprep.subr.bf16.mxu0 %v1045_v7  ;;  %983 = vmatprep.subr.bf16.mxu1 %v1045_v7  ;;  %v1030_v24 = vld [vmem:[%s1404_s5] sm:$0xff]   ;;  %v939_v26 = vcombine.low %v1153_v6, %v1150_v5 }
  0x13   : > { %474 = vrot.lane.b32.xlu1 %v1113_v2, %s1041_s28  ;;  %470 = vrot.lane.b32.xlu0 %v1116_v3, %s1041_s28 }
  0x14   : > { %952 = vmatprep.mubr.msk.bf16.mxu0 %vm382_vm0, %v936_v18  ;;  %955 = vmatprep.mubr.msk.bf16.mxu1 %vm382_vm0, %v942_v20  ;;  %v692_v18 = vrot.slane %v1106_v1, 4 }
  0x15   : > { %400 = vmatpush1.bf16.msra.mxu0 %v1017_v9  ;;  %992 = vmatpush1.bf16.msra.mxu1 %v1017_v9 }
  0x16   : > { %401 = vmatprep.subr.bf16.mxu0 %v1045_v7  ;;  %984 = vmatprep.subr.bf16.mxu1 %v1045_v7 }
  0x17   : > { %502 = vrot.lane.b32.xlu1 %v1116_v3, %s1042_s29  ;;  %500 = vrot.lane.b32.xlu0 %v1106_v1, %s1042_s29 }
  0x19   : > { %402 = vmatpush1.bf16.msra.mxu0 %v1018_v12  ;;  %993 = vmatpush1.bf16.msra.mxu1 %v1018_v12 }
  0x1a   : > { %403 = vmatprep.subr.bf16.mxu0 %v1045_v7  ;;  %985 = vmatprep.subr.bf16.mxu1 %v1045_v7 }
  0x1b   : > { %506 = vrot.lane.b32.xlu1 %v1113_v2, %s1042_s29  ;;  %504 = vrot.lane.b32.xlu0 %v1103_v0, %s1042_s29 }
  0x1d   : > { %404 = vmatpush1.bf16.msra.mxu0 %v1019_v13  ;;  %994 = vmatpush1.bf16.msra.mxu1 %v1019_v13 }
  0x1e   : > { %405 = vmatprep.subr.bf16.mxu0 %v1045_v7  ;;  %986 = vmatprep.subr.bf16.mxu1 %v1045_v7 }
  0x1f   : > { %534 = vrot.lane.b32.xlu1 %v1116_v3, %s1043_s30  ;;  %532 = vrot.lane.b32.xlu0 %v1106_v1, %s1043_s30 }
  0x21   : > { %406 = vmatpush1.bf16.msra.mxu0 %v1020_v14  ;;  %995 = vmatpush1.bf16.msra.mxu1 %v1020_v14 }
  0x22   : > { %407 = vmatprep.subr.bf16.mxu0 %v1045_v7  ;;  %987 = vmatprep.subr.bf16.mxu1 %v1045_v7 }
  0x23   : > { %538 = vrot.lane.b32.xlu1 %v1113_v2, %s1043_s30  ;;  %536 = vrot.lane.b32.xlu0 %v1103_v0, %s1043_s30 }
  0x25   : > { %408 = vmatpush1.bf16.msra.mxu0 %v1021_v15  ;;  %996 = vmatpush1.bf16.msra.mxu1 %v1021_v15 }
  0x26   : > { %409 = vmatprep.subr.bf16.mxu0 %v1045_v7  ;;  %988 = vmatprep.subr.bf16.mxu1 %v1045_v7 }
  0x27   : > { %566 = vrot.lane.b32.xlu1 %v1116_v3, %s1044_s7  ;;  %564 = vrot.lane.b32.xlu0 %v1106_v1, %s1044_s7 }
  0x29   : > { %410 = vmatpush1.bf16.msra.mxu0 %v1022_v16  ;;  %997 = vmatpush1.bf16.msra.mxu1 %v1022_v16 }
  0x2a   : > { %425 = vmatprep.subr.bf16.mxu0 %v1045_v7  ;;  %989 = vmatprep.subr.bf16.mxu1 %v1045_v7 }
  0x2b   : > { %570 = vrot.lane.b32.xlu1 %v1113_v2, %s1044_s7  ;;  %568 = vrot.lane.b32.xlu0 %v1103_v0, %s1044_s7 }
  0x2d   : > { %426 = vmatpush2.bf16.msra.mxu0 %v1023_v17  ;;  %998 = vmatpush2.bf16.msra.mxu1 %v1023_v17  ;;  %v693_v17 = vrot.slane %v1116_v3, 4 }
  0x2e   : > { %971 = vmatprep.subr.bf16.mxu1 %v1030_v24 }
  0x2f   : > { %478 = vrot.lane.b32.xlu1 %v1150_v5, %s1041_s28  ;;  %476 = vrot.lane.b32.xlu0 %v1153_v6, %s1041_s28 }
  0x30   : > { %428 = vmatmul.mubr.bf16.vlgmr.msra.gmra.mxu0 %v935_v19  ;;  %452 = vmatmul.mubr.bf16.vlgmr.msra.gmra.mxu1 %v941_v21 }
  0x31   : > { %953 = vmatprep.mubr.msk.bf16.mxu0 %vm382_vm0, %v938_v22  ;;  %972 = vmatpush3.bf16.msra.mxu1 %v1030_v24 }
  0x33   : > { %598 = vrot.lane.b32.xlu1 %v1116_v3, %s1046_s14  ;;  %596 = vrot.lane.b32.xlu0 %v1106_v1, %s1046_s14 }
  0x37   : > { %482 = vrot.lane.b32.xlu1 %v1170_v10, %s1041_s28  ;;  %480 = vrot.lane.b32.xlu0 %v1173_v11, %s1041_s28 }
  0x38   : > { %436 = vmatmul.mubr.bf16.gmra.mxu0 %v937_v23 }
  0x39   : > { %954 = vmatprep.mubr.msk.bf16.mxu0 %vm382_vm0, %v940_v25 }
  0x3b   : > { %602 = vrot.lane.b32.xlu1 %v1113_v2, %s1046_s14  ;;  %600 = vrot.lane.b32.xlu0 %v1103_v0, %s1046_s14 }
  0x3f   : > { %510 = vrot.lane.b32.xlu1 %v1150_v5, %s1042_s29  ;;  %508 = vrot.lane.b32.xlu0 %v1153_v6, %s1042_s29 }
  0x40   : > { %444 = vmatmul.mubr.bf16.gmra.mxu0 %v939_v26 }
  0x43   : > { %630 = vrot.lane.b32.xlu1 %v1116_v3, %s1047_s26  ;;  %628 = vrot.lane.b32.xlu0 %v1106_v1, %s1047_s26 }
  0x47   : > { %514 = vrot.lane.b32.xlu1 %v1170_v10, %s1042_s29  ;;  %512 = vrot.lane.b32.xlu0 %v1173_v11, %s1042_s29  ;;  %s1048_s29 = smov 16  }
  0x4b   : > { %634 = vrot.lane.b32.xlu1 %v1113_v2, %s1047_s26  ;;  %632 = vrot.lane.b32.xlu0 %v1103_v0, %s1047_s26 }
  0x4f   : > { %542 = vrot.lane.b32.xlu1 %v1150_v5, %s1043_s30  ;;  %540 = vrot.lane.b32.xlu0 %v1153_v6, %s1043_s30 }
  0x53   : > { %662 = vrot.lane.b32.xlu1 %v1116_v3, %s1048_s29  ;;  %660 = vrot.lane.b32.xlu0 %v1106_v1, %s1048_s29 }
  0x57   : > { %546 = vrot.lane.b32.xlu1 %v1170_v10, %s1043_s30  ;;  %544 = vrot.lane.b32.xlu0 %v1173_v11, %s1043_s30 }
  0x5b   : > { %666 = vrot.lane.b32.xlu1 %v1113_v2, %s1048_s29  ;;  %664 = vrot.lane.b32.xlu0 %v1103_v0, %s1048_s29 }
  0x5f   : > { %574 = vrot.lane.b32.xlu1 %v1150_v5, %s1044_s7  ;;  %572 = vrot.lane.b32.xlu0 %v1153_v6, %s1044_s7 }
  0x63   : > { %578 = vrot.lane.b32.xlu1 %v1170_v10, %s1044_s7  ;;  %576 = vrot.lane.b32.xlu0 %v1173_v11, %s1044_s7 }
  0x67   : > { %606 = vrot.lane.b32.xlu1 %v1150_v5, %s1046_s14  ;;  %604 = vrot.lane.b32.xlu0 %v1153_v6, %s1046_s14 }
  0x6b   : > { %610 = vrot.lane.b32.xlu1 %v1170_v10, %s1046_s14  ;;  %608 = vrot.lane.b32.xlu0 %v1173_v11, %s1046_s14 }
  0x6f   : > { %638 = vrot.lane.b32.xlu1 %v1150_v5, %s1047_s26  ;;  %636 = vrot.lane.b32.xlu0 %v1153_v6, %s1047_s26 }
  0x73   : > { %642 = vrot.lane.b32.xlu1 %v1170_v10, %s1047_s26  ;;  %640 = vrot.lane.b32.xlu0 %v1173_v11, %s1047_s26 }
  0x77   : > { %670 = vrot.lane.b32.xlu1 %v1150_v5, %s1048_s29  ;;  %668 = vrot.lane.b32.xlu0 %v1153_v6, %s1048_s29 }
  0x7b   : > { %674 = vrot.lane.b32.xlu1 %v1170_v10, %s1048_s29  ;;  %672 = vrot.lane.b32.xlu0 %v1173_v11, %s1048_s29 }
  0x81   : > { %v473_v27 = vpop.permute.xlu1 %472  ;;  %v469_v28 = vpop.permute.xlu0 %468 }
  0x82   : > { %v492_v57 = vmax.bf16 %v469_v28, %v1106_v1  ;;  %v494_v13 = vmax.bf16 %v473_v27, %v1103_v0 }
  0x85   : > { %v475_v29 = vpop.permute.xlu1 %474  ;;  %v471_v30 = vpop.permute.xlu0 %470 }
  0x86   : > { %v493_v58 = vmax.bf16 %v471_v30, %v1116_v3  ;;  %v495_v14 = vmax.bf16 %v475_v29, %v1113_v2  ;;  %v1317_v3 = vld [vmem:[%s1402_s3] ss:$0 sm:$0xff] }
  0x89   : > { %v503_v31 = vpop.permute.xlu1 %502  ;;  %v501_v32 = vpop.permute.xlu0 %500 }
  0x8a   : > { %v525_v59 = vmax.bf16 %v503_v31, %v493_v58  ;;  %v524_v60 = vmax.bf16 %v501_v32, %v492_v57 }
  0x8d   : > { %v507_v33 = vpop.permute.xlu1 %506  ;;  %v505_v34 = vpop.permute.xlu0 %504 }
  0x8e   : > { %v527_v19 = vmax.bf16 %v507_v33, %v495_v14  ;;  %v526_v20 = vmax.bf16 %v505_v34, %v494_v13 }
  0x91   : > { %v535_v35 = vpop.permute.xlu1 %534  ;;  %v533_v36 = vpop.permute.xlu0 %532 }
  0x92   : > { %v557_v63 = vmax.bf16 %v535_v35, %v525_v59  ;;  %v556_v4 = vmax.bf16 %v533_v36, %v524_v60 }
  0x95   : > { %v539_v37 = vpop.permute.xlu1 %538  ;;  %v537_v38 = vpop.permute.xlu0 %536 }
  0x96   : > { %v559_v25 = vmax.bf16 %v539_v37, %v527_v19  ;;  %v558_v26 = vmax.bf16 %v537_v38, %v526_v20  ;;  %v1326_v38 = vld [vmem:[%s1403_s4] ss:$0 sm:$0xff] }
  0x99   : > { %v567_v39 = vpop.permute.xlu1 %566  ;;  %v565_v40 = vpop.permute.xlu0 %564 }
  0x9a   : > { %v589_v7 = vmax.bf16 %v567_v39, %v557_v63  ;;  %v588_v8 = vmax.bf16 %v565_v40, %v556_v4  ;;  %v695_v39 = vrot.slane %v1113_v2, 4  ;;  %v694_v40 = vrot.slane %v1103_v0, 4 }
  0x9d   : > { %v571_v41 = vpop.permute.xlu1 %570  ;;  %v569_v42 = vpop.permute.xlu0 %568 }
  0x9e   : > { %v591_v31 = vmax.bf16 %v571_v41, %v559_v25  ;;  %v590_v27 = vmax.bf16 %v569_v42, %v558_v26 }
  0xa1   : > { %v1288_v43 = vpop.permute.xlu1 %478  ;;  %v1290_v44 = vpop.permute.xlu0 %476 }
  0xa2   : > { %v497_v25 = vmax.bf16 %v1288_v43, %v1150_v5  ;;  %v496_v26 = vmax.bf16 %v1290_v44, %v1153_v6 }
  0xa5   : > { %v599_v45 = vpop.permute.xlu1 %598  ;;  %v597_v46 = vpop.permute.xlu0 %596 }
  0xa6   : > { %v621_v15 = vmax.bf16 %v599_v45, %v589_v7  ;;  %v620_v16 = vmax.bf16 %v597_v46, %v588_v8 }
  0xa9   : > { %v1292_v47 = vpop.permute.xlu1 %482  ;;  %v1294_v48 = vpop.permute.xlu0 %480 }
  0xad   : > { %v603_v49 = vpop.permute.xlu1 %602  ;;  %v601_v50 = vpop.permute.xlu0 %600 }
  0xae   : > { %v623_v34 = vmax.bf16 %v603_v49, %v591_v31  ;;  %v622_v35 = vmax.bf16 %v601_v50, %v590_v27 }
  0xb1   : > { %v1296_v51 = vpop.permute.xlu1 %510  ;;  %v1298_v52 = vpop.permute.xlu0 %508 }
  0xb5   : > { %v631_v53 = vpop.permute.xlu1 %630  ;;  %v629_v54 = vpop.permute.xlu0 %628 }
  0xb6   : > { %v653_v21 = vmax.bf16 %v631_v53, %v621_v15  ;;  %v652_v22 = vmax.bf16 %v629_v54, %v620_v16 }
  0xb9   : > { %v1300_v55 = vpop.permute.xlu1 %514  ;;  %v1302_v56 = vpop.permute.xlu0 %512 }
  0xbd   : > { %v635_v61 = vpop.permute.xlu1 %634  ;;  %v633_v62 = vpop.permute.xlu0 %632 }
  0xbe   : > { %v655_v41 = vmax.bf16 %v635_v61, %v623_v34  ;;  %v654_v42 = vmax.bf16 %v633_v62, %v622_v35 }
  0xc1   : > { %v1306_v9 = vpop.permute.xlu1 %542  ;;  %v1308_v12 = vpop.permute.xlu0 %540 }
  0xc5   : > { %v663_v23 = vpop.permute.xlu1 %662  ;;  %v661_v24 = vpop.permute.xlu0 %660 }
  0xc6   : > { %v685_v28 = vmax.bf16 %v663_v23, %v653_v21  ;;  %v684_v30 = vmax.bf16 %v661_v24, %v652_v22 }
  0xc8   : > { %v709_v32 = vmax.bf16 %v693_v17, %v685_v28  ;;  %v708_v29 = vmax.bf16 %v692_v18, %v684_v30  ;;  %v529_v28 = vmax.bf16 %v1296_v51, %v497_v25  ;;  %v528_v30 = vmax.bf16 %v1298_v52, %v496_v26 }
  0xc9   : > { %v1319_v1 = vpop.permute.xlu1 %546  ;;  %v1321_v33 = vpop.permute.xlu0 %544 }
  0xca   : > { %v717_v36 = vunpack.c.l.bf16 %v709_v32  ;;  %v716_v37 = vunpack.c.l.bf16 %v708_v29  ;;  %v499_v32 = vmax.bf16 %v1292_v47, %v1170_v10  ;;  %v498_v29 = vmax.bf16 %v1294_v48, %v1173_v11 }
  0xcb   : > { %v561_v34 = vmax.bf16 %v1306_v9, %v529_v28  ;;  %v560_v35 = vmax.bf16 %v1308_v12, %v528_v30  ;;  %v697_v48 = vrot.slane %v1150_v5, 4  ;;  %v696_v9 = vrot.slane %v1153_v6, 4 }
  0xcc   : > { %v732_v45 = vmul.f32 %v1317_v3, %v717_v36  ;;  %v731_v46 = vmul.f32 %v1317_v3, %v716_v37  ;;  %v531_v43 = vmax.bf16 %v1300_v55, %v499_v32  ;;  %v530_v44 = vmax.bf16 %v1302_v56, %v498_v29 }
  0xcd   : > { %v667_v53 = vpop.permute.xlu1 %666  ;;  %v665_v49 = vpop.permute.xlu0 %664 }
  0xce   : > { %v747_v50 = vadd.f32 %v1326_v38, %v732_v45  ;;  %v746_v54 = vadd.f32 %v1326_v38, %v731_v46  ;;  %v687_v57 = vmax.bf16 %v667_v53, %v655_v41  ;;  %v686_v58 = vmax.bf16 %v665_v49, %v654_v42 }
  0xd0   : > { %v755_v59 = vmax.f32 %v747_v50, 0.0  ;;  %v754_v60 = vmax.f32 %v746_v54, 0.0  ;;  %v711_v63 = vmax.bf16 %v695_v39, %v687_v57  ;;  %v710_v2 = vmax.bf16 %v694_v40, %v686_v58 }
  0xd1   : > { %v575_v4 = vpop.permute.xlu1 %574  ;;  %v573_v0 = vpop.permute.xlu0 %572  ;;  %v563_v39 = vmax.bf16 %v1319_v1, %v531_v43  ;;  %v562_v40 = vmax.bf16 %v1321_v33, %v530_v44  ;;  %v699_v1 = vrot.slane %v1170_v10, 4  ;;  %v698_v33 = vrot.slane %v1173_v11, 4 }
  0xd2   : > { %v719_v61 = vunpack.c.l.bf16 %v711_v63  ;;  %v718_v62 = vunpack.c.l.bf16 %v710_v2  ;;  %v762_v7 = vpack.c.bf16 %v755_v59, %v754_v60  ;;  %v593_v36 = vmax.bf16 %v575_v4, %v561_v34 }
  0xd3   : > { %v592_v51 = vmax.bf16 %v573_v0, %v560_v35 }
  0xd4   : > { %v734_v8 = vmul.f32 %v1317_v3, %v719_v61  ;;  %v733_v13 = vmul.f32 %v1317_v3, %v718_v62  ;;  %973 = vmatprep.mubr.msk.bf16.mxu1 %vm382_vm0, %v762_v7 }
  0xd5   : > { %v579_v14 = vpop.permute.xlu1 %578  ;;  %v577_v15 = vpop.permute.xlu0 %576 }
  0xd6   : > { %v749_v16 = vadd.f32 %v1326_v38, %v734_v8  ;;  %v748_v17 = vadd.f32 %v1326_v38, %v733_v13  ;;  %v595_v42 = vmax.bf16 %v579_v14, %v563_v39  ;;  %v594_v12 = vmax.bf16 %v577_v15, %v562_v40 }
  0xd8   : > { %v757_v18 = vmax.f32 %v749_v16, 0.0  ;;  %v756_v19 = vmax.f32 %v748_v17, 0.0 }
  0xd9   : > { %v607_v20 = vpop.permute.xlu1 %606  ;;  %v605_v21 = vpop.permute.xlu0 %604 }
  0xda   : > { %v763_v22 = vpack.c.bf16 %v757_v18, %v756_v19  ;;  %v625_v47 = vmax.bf16 %v607_v20, %v593_v36  ;;  %v624_v41 = vmax.bf16 %v605_v21, %v592_v51 }
  0xdc   : > { %974 = vmatmul.mubr.msk.bf16.vlgmr.msra.gmra.mxu1 %vm382_vm0, %v763_v22 }
  0xdd   : > { %v611_v23 = vpop.permute.xlu1 %610  ;;  %v609_v24 = vpop.permute.xlu0 %608 }
  0xde   : > { %v627_v53 = vmax.bf16 %v611_v23, %v595_v42  ;;  %v626_v49 = vmax.bf16 %v609_v24, %v594_v12 }
  0xe1   : > { %v639_v31 = vpop.permute.xlu1 %638  ;;  %v637_v27 = vpop.permute.xlu0 %636 }
  0xe2   : > { %v657_v45 = vmax.bf16 %v639_v31, %v625_v47  ;;  %v656_v55 = vmax.bf16 %v637_v27, %v624_v41 }
  0xe5   : > { %v643_v37 = vpop.permute.xlu1 %642  ;;  %v641_v52 = vpop.permute.xlu0 %640 }
  0xe6   : > { %v659_v57 = vmax.bf16 %v643_v37, %v627_v53  ;;  %v658_v58 = vmax.bf16 %v641_v52, %v626_v49  ;;  %v934_v37 = vld [vmem:[%s1401_s2] ss:$0 sm:$0xff] }
  0xe9   : > { %v671_v46 = vpop.permute.xlu1 %670  ;;  %v669_v56 = vpop.permute.xlu0 %668 }
  0xea   : > { %v689_v50 = vmax.bf16 %v671_v46, %v657_v45  ;;  %v688_v54 = vmax.bf16 %v669_v56, %v656_v55 }
  0xec   : > { %v713_v59 = vmax.bf16 %v697_v48, %v689_v50  ;;  %v712_v5 = vmax.bf16 %v696_v9, %v688_v54 }
  0xed   : > { %v675_v60 = vpop.permute.xlu1 %674  ;;  %v673_v6 = vpop.permute.xlu0 %672 }
  0xee   : > { %v721_v63 = vunpack.c.l.bf16 %v713_v59  ;;  %v720_v2 = vunpack.c.l.bf16 %v712_v5  ;;  %v691_v4 = vmax.bf16 %v675_v60, %v659_v57  ;;  %v690_v0 = vmax.bf16 %v673_v6, %v658_v58 }
  0xf0   : > { %v736_v61 = vmul.f32 %v1317_v3, %v721_v63  ;;  %v735_v62 = vmul.f32 %v1317_v3, %v720_v2  ;;  %v715_v7 = vmax.bf16 %v699_v1, %v691_v4  ;;  %v714_v8 = vmax.bf16 %v698_v33, %v690_v0  ;;  %v429_v25 = vpop.f32.mrf.mxu0  ;;  %v453_v28 = vpop.f32.mrf.mxu1 }
  0xf1   : > { %v430_v39 = vadd.f32 %v934_v37, %v429_v25  ;;  %v454_v54 = vadd.f32 %v934_v37, %v453_v28 }
  0xf2   : > { %v751_v10 = vadd.f32 %v1326_v38, %v736_v61  ;;  %v750_v11 = vadd.f32 %v1326_v38, %v735_v62  ;;  %v723_v13 = vunpack.c.l.bf16 %v715_v7  ;;  %v722_v14 = vunpack.c.l.bf16 %v714_v8  ;;  %v431_v26 = vpop.f32.mrf.mxu0  ;;  %v455_v31 = vpop.f32.mrf.mxu1 }
  0xf3   : > { %v460_v41 = vmax.f32 %v430_v39, 0.0  ;;  %v466_v33 = vmax.f32 %v454_v54, 0.0 }
  0xf4   : > { %v759_v15 = vmax.f32 %v751_v10, 0.0  ;;  %v758_v16 = vmax.f32 %v750_v11, 0.0  ;;  %v738_v17 = vmul.f32 %v1317_v3, %v723_v13  ;;  %v737_v18 = vmul.f32 %v1317_v3, %v722_v14  ;;  %v432_v30 = vpop.f32.mrf.mxu0  ;;  %v456_v32 = vpop.f32.mrf.mxu1 }
  0xf5   : > { %v433_v48 = vadd.f32 %v934_v37, %v432_v30  ;;  %v457_v57 = vadd.f32 %v934_v37, %v456_v32 }
  0xf6   : > { %v753_v19 = vadd.f32 %v1326_v38, %v738_v17  ;;  %v752_v20 = vadd.f32 %v1326_v38, %v737_v18  ;;  %v764_v21 = vpack.c.bf16 %v759_v15, %v758_v16  ;;  %v434_v27 = vpop.f32.mrf.mxu0  ;;  %v458_v29 = vpop.f32.mrf.mxu1 }
  0xf7   : > { %v461_v55 = vmax.f32 %v433_v48, 0.0  ;;  %v467_v63 = vmax.f32 %v457_v57, 0.0 }
  0xf8   : > { %v761_v22 = vmax.f32 %v753_v19, 0.0  ;;  %v760_v23 = vmax.f32 %v752_v20, 0.0  ;;  %977 = vmatprep.mubr.msk.bf16.mxu1 %vm382_vm0, %v764_v21  ;;  %v437_v3 = vpop.f32.mrf.mxu0 }
  0xf9   : > { %v438_v52 = vadd.f32 %v934_v37, %v437_v3 }
  0xfa   : > { %v765_v24 = vpack.c.bf16 %v761_v22, %v760_v23  ;;  %v439_v34 = vpop.f32.mrf.mxu0 }
  0xfb   : > { %v462_v40 = vmax.f32 %v438_v52, 0.0 }
  0xfc   : > { %978 = vmatmul.mubr.msk.bf16.gmra.mxu1 %vm382_vm0, %v765_v24  ;;  %v440_v38 = vpop.f32.mrf.mxu0 }
  0xfd   : > { %v441_v47 = vadd.f32 %v934_v37, %v440_v38 }
  0xfe   : > { %v442_v35 = vpop.f32.mrf.mxu0 }
  0xff   : > { %v463_v42 = vmax.f32 %v441_v47, 0.0 }
 0x100   : > { %v445_v43 = vpop.f32.mrf.mxu0 }
 0x101   : > { %v446_v1 = vadd.f32 %v934_v37, %v445_v43 }
 0x102   : > { %v447_v44 = vpop.f32.mrf.mxu0 }
 0x103   : > { %v464_v58 = vmax.f32 %v446_v1, 0.0 }
 0x104   : > { %v448_v36 = vpop.f32.mrf.mxu0 }
 0x105   : > { %v449_v5 = vadd.f32 %v934_v37, %v448_v36 }
 0x106   : > { %v450_v51 = vpop.f32.mrf.mxu0 }
 0x107   : > { %v465_v0 = vmax.f32 %v449_v5, 0.0 }
 0x19c   : > { %v975_v9 = vpop.f32.mrf.mxu1 }
 0x19d   : > { %v853_v12 = vadd.f32 %v975_v9, %v462_v40 }
 0x19e   : > { %v820_v45 = vpop.f32.mrf.mxu1 }
 0x19f   : > { %862 = vst.msk [vmem:[%s1378_s18 + $0x10] sm:$0xff] %vm859_vm1, %v853_v12  ;;  %v851_v46 = vadd.f32 %v820_v45, %v460_v41 }
 0x1a0   : > { %v976_v56 = vpop.f32.mrf.mxu1 }
 0x1a1   : > { %860 = vst.msk [vmem:[%s1378_s18] sm:$0xff] %vm859_vm1, %v851_v46  ;;  %v854_v53 = vadd.f32 %v976_v56, %v463_v42 }
 0x1a2   : > { %v823_v49 = vpop.f32.mrf.mxu1 }
 0x1a3   : > { %863 = vst.msk [vmem:[%s1378_s18 + $0x18] sm:$0xff] %vm859_vm1, %v854_v53  ;;  %v852_v50 = vadd.f32 %v823_v49, %v461_v55 }
 0x1a5   : > { %861 = vst.msk [vmem:[%s1378_s18 + $0x8] sm:$0xff] %vm859_vm1, %v852_v50 }
 0x1bc   : > { %v979_v59 = vpop.f32.mrf.mxu1 }
 0x1bd   : > { %v857_v60 = vadd.f32 %v979_v59, %v466_v33 }
 0x1be   : > { %v836_v6 = vpop.f32.mrf.mxu1 }
 0x1bf   : > { %866 = vst.msk [vmem:[%s1378_s18 + $0x30] sm:$0xff] %vm859_vm1, %v857_v60  ;;  %v855_v2 = vadd.f32 %v836_v6, %v464_v58 }
 0x1c0   : > { %v980_v4 = vpop.f32.mrf.mxu1 }
 0x1c1   : > { %864 = vst.msk [vmem:[%s1378_s18 + $0x20] sm:$0xff] %vm859_vm1, %v855_v2  ;;  %v858_v61 = vadd.f32 %v980_v4, %v467_v63 }
 0x1c2   : > { %v839_v62 = vpop.f32.mrf.mxu1 }
 0x1c3   : > { %867 = vst.msk [vmem:[%s1378_s18 + $0x38] sm:$0xff] %vm859_vm1, %v858_v61  ;;  %v856_v7 = vadd.f32 %v839_v62, %v465_v0 }
 0x1c5   : > { %865 = vst.msk [vmem:[%s1378_s18 + $0x28] sm:$0xff] %vm859_vm1, %v856_v7 }
 0x1c6 PF: > { %s16_s21 = sadd.s32 1, %s1039_s21  }
 0x1c7   : > { %p13_p4 = scmp.ge.s32.totalorder %s16_s21, 4  }
 0x1c9   :  { %15 = sbr.rel (!%p13_p4) target bundleno = 1 (0x1), region = 74 }

// kernel: esfnet_forward.13
= control target key start
LH: loop header
LB: loop body
LE: loop exit
PB: predicated region body
PF: predicated region fallthrough
CT: control target
= control target key end

     0   :  { %s1114_s24 = smov 0   ;;  %s1507_s0 = inlined_call_operand.vmem [shape: f32[2,64,64], index: 0, kind: input, shape index: {}]   ;;  %s1508_s1 = inlined_call_operand.vmem [shape: bf16[64,16], index: 1, kind: input, shape index: {}]   ;;  %s1509_s2 = inlined_call_operand.vmem [shape: f32[3,16], index: 2, kind: input, shape index: {}]   ;;  %s1510_s3 = inlined_call_operand.vmem [shape: f32[3,1,16], index: 3, kind: input, shape index: {}]   ;;  %s1511_s4 = inlined_call_operand.vmem [shape: f32[3,1,16], index: 4, kind: input, shape index: {}]   ;;  %s1512_s5 = inlined_call_operand.vmem [shape: bf16[16,64], index: 5, kind: input, shape index: {}]   ;;  %s1513_s6 = inlined_call_operand.vmem [shape: f32[1,64], index: 6, kind: input, shape index: {}]   ;;  %s1514_s7 = inlined_call_operand.vmem [shape: f32[2,64,64], index: 7, kind: output, shape index: {}]  }
   0x1 LB: > { %s956_s25 = sadd.s32 4294967295, %s1071_s24   ;;  %p960_p0 = scmp.ge.s32.totalorder %s1071_s24, 1  ;;  %s1071_s24 = sphi %s1114_s24, %s17_s24  }
   0x2   : > { %p237_p1 = scmp.lt.s32.totalorder %s1071_s24, 3 }
   0x4   : > { %p238_p2 = pnand %p960_p0, %p237_p1 }
   0x5   : > { %p269_p3 = scmp.lt.s32.totalorder (!%p238_p2), %s956_s25, 1 }
   0x6   : > { %241 = sbr.rel (%p238_p2) target bundleno = 485 (0x1e5), region = 48 }
   0xb   : > { %v1060_v0 = vld [vmem:[%s1508_s1 + $0x18] sm:$0xff]   ;;  %v1061_v1 = vld [vmem:[%s1508_s1 + $0x10] sm:$0xff]   ;;  %s1538_s25 = smov (!%p269_p3, %s956_s25), 1  ;;  %v1062_v2 = vld [vmem:[%s1508_s1 + $0x8] sm:$0xff]   ;;  %vm332_vm0 = vcmask 523264   ;;  %vm280_vm1 = vcmask 130048   ;;  %v536_v18 = vlaneseq }
   0xc   : > { %1025 = vmatprep.subr.bf16.mxu0 %v1060_v0  ;;  %s1010_s9 = sshll.u32 %s1538_s25, 6  ;;  %v1063_v6 = vld [vmem:[%s1508_s1] sm:$0xff]   ;;  %v1073_v16 = vmov 0.0  }
   0xd   : > { %1026 = vmatpush3.bf16.msra.mxu0 %v1060_v0  ;;  %s273_s12 = scalar_lea.vmem %s1507_s0, %s1010_s9  ;;  %281 = vst.msk [vmem:[#allocation2] sm:$0xff] %vm280_vm1, %v1073_v16  ;;  %282 = vst.msk [vmem:[#allocation2 + $0x48] sm:$0xff] %vm280_vm1, %v1073_v16  ;;  %v1064_v17 = vld [vmem:[%s1512_s5] sm:$0xff]   ;;  %v1180_v20 = vshrl.u32 %v536_v18, 7  ;;  %s1479_s19 = scalar_lea.vmem %s1514_s7, %s1010_s9 }
   0xe   : > { %1027 = vmatprep.subr.bf16.mxu0 %v1061_v1  ;;  %v1139_v3 = vld [vmem:[%s273_s12] sm:$0xff]  ;;  %v1141_v4 = vld [vmem:[%s273_s12 + $0x8] sm:$0xff]  ;;  %v1149_v7 = vld [vmem:[%s273_s12 + $0x10] sm:$0xff]  ;;  %1041 = vmatprep.subr.bf16.mxu1 %v1064_v17 }
   0xf   : > { %v291_v5 = vpack.c.bf16 %v1141_v4, %v1139_v3  ;;  %v1151_v8 = vld [vmem:[%s273_s12 + $0x18] sm:$0xff]  ;;  %v1153_v9 = vld [vmem:[%s273_s12 + $0x20] sm:$0xff]  ;;  %v1155_v10 = vld [vmem:[%s273_s12 + $0x28] sm:$0xff]  ;;  %1042 = vmatpush3.bf16.msra.mxu1 %v1064_v17  ;;  %v538_v24 = vadd.s32 8, %v1180_v20  ;;  %v549_v31 = vand.u32 7, %v1180_v20  ;;  %v1193_v33 = vadd.s32 16, %v1180_v20 }
  0x10   : > { %v292_v11 = vpack.c.bf16 %v1151_v8, %v1149_v7  ;;  %v293_v12 = vpack.c.bf16 %v1155_v10, %v1153_v9  ;;  %v1163_v13 = vld [vmem:[%s273_s12 + $0x30] sm:$0xff]  ;;  %v1165_v14 = vld [vmem:[%s273_s12 + $0x38] sm:$0xff]  ;;  %v965_v19 = vld [vmem:[%s1509_s2] ss:$0 sm:$0xff]  ;;  %v1198_v36 = vadd.s32 24, %v1180_v20  ;;  %v1248_v62 = vadd.s32 56, %v1180_v20 }
  0x11   : > { %1028 = vmatpush3.bf16.msra.mxu0 %v1061_v1  ;;  %1033 = vmatprep.mubr.msk.bf16.mxu0 %vm332_vm0, %v291_v5  ;;  %v294_v15 = vpack.c.bf16 %v1165_v14, %v1163_v13  ;;  %v556_v32 = vand.u32 7, %v538_v24  ;;  %v1203_v39 = vld [vmem:[%s1510_s3] ss:$0 sm:$0xff]  ;;  %vm641_vm2 = vcmp.ge.s32.totalorder %v549_v31, 1  ;;  %v563_v44 = vand.u32 7, %v1193_v33 }
  0x12   : > { %1029 = vmatprep.subr.bf16.mxu0 %v1062_v2  ;;  %v1215_v45 = vld [vmem:[%s1510_s3 + $0x2] ss:$0 sm:$0xff]  ;;  %vm665_vm4 = vcmp.lt.s32.totalorder %v549_v31, 7  ;;  %v570_v48 = vand.u32 7, %v1198_v36  ;;  %v1228_v52 = vld [vmem:[%s1510_s3 + $0x1] ss:$0 sm:$0xff] }
  0x13   : > { %vm642_vm3 = vcmp.ge.s32.totalorder %v556_v32, 1  ;;  %v1235_v54 = vsel %vm641_vm2, 1.0, %v1073_v16  ;;  %vm1240_vm5 = vcmp.lt.s32.totalorder %v556_v32, 7  ;;  %v1245_v61 = vsel %vm665_vm4, 1.0, %v1073_v16  ;;  %v1272_v24 = vld [vmem:[%s1509_s2 + $0x1] ss:$0 sm:$0xff] }
  0x14   : > { %v426_v38 = vld [vmem:[#allocation2] sm:$0xff]  ;;  %v435_v42 = vld [vmem:[#allocation2 + $0x48] sm:$0xff]  ;;  %v1238_v55 = vsel %vm642_vm3, 1.0, %v1073_v16  ;;  %vm643_vm6 = vcmp.ge.s32.totalorder %v563_v44, 1  ;;  %vm644_vm7 = vcmp.ge.s32.totalorder %v570_v48, 1  ;;  %vm1286_vm8 = vcmp.lt.s32.totalorder %v563_v44, 7 }
  0x15   : > { %1030 = vmatpush3.bf16.msra.mxu0 %v1062_v2  ;;  %v443_v49 = vmul.f32 %v1203_v39, %v426_v38  ;;  %v1223_v51 = vmul.f32 %v1215_v45, %v435_v42  ;;  %vm1341_vm11 = vcmp.lt.s32.totalorder %v570_v48, 7  ;;  %v990_v36 = vsel %vm1286_vm8, 1.0, %v1073_v16 }
  0x16   : > { %1031 = vmatprep.subr.bf16.mxu0 %v1063_v6 }
  0x19   : > { %1032 = vmatpush3.bf16.msra.mxu0 %v1063_v6  ;;  %v1257_v6 = vadd.s32 40, %v1180_v20 }
  0x1c   : > { %1034 = vmatmul.mubr.msk.bf16.vlgmr.msra.gmra.mxu0 %vm332_vm0, %v292_v11  ;;  %v1262_v11 = vsel %vm1240_vm5, 1.0, %v1073_v16 }
  0x1d   : > { %1037 = vmatprep.mubr.msk.bf16.mxu0 %vm332_vm0, %v293_v12 }
  0x24   : > { %1038 = vmatmul.mubr.msk.bf16.gmra.mxu0 %vm332_vm0, %v294_v15 }
  0xdc   : > { %v1035_v21 = vpop.f32.mrf.mxu0 }
  0xdd   : > { %v1182_v22 = vadd.f32 %v1035_v21, %v965_v19 }
  0xde   : > { %v379_v23 = vpop.f32.mrf.mxu0 }
  0xdf   : > { %v412_v25 = vmax.f32 %v1182_v22, 0.0  ;;  %v380_v26 = vadd.f32 %v965_v19, %v379_v23 }
  0xe0   : > { %v1036_v27 = vpop.f32.mrf.mxu0 }
  0xe1   : > { %420 = vst.msk [vmem:[#allocation2 + $0x18] sm:$0xff] %vm280_vm1, %v412_v25  ;;  %v410_v28 = vmax.f32 %v380_v26, 0.0  ;;  %v1189_v29 = vadd.f32 %v1036_v27, %v965_v19  ;;  %v1276_v26 = vsel %vm644_vm7, 1.0, %v1073_v16  ;;  %v541_v27 = vadd.s32 32, %v1180_v20 }
  0xe2   : > { %v382_v30 = vpop.f32.mrf.mxu0 }
  0xe3   : > { %418 = vst.msk [vmem:[#allocation2 + $0x8] sm:$0xff] %vm280_vm1, %v410_v28  ;;  %v413_v34 = vmax.f32 %v1189_v29, 0.0  ;;  %v383_v35 = vadd.f32 %v965_v19, %v382_v30  ;;  %v459_v2 = vmul.f32 %v1228_v52, %v410_v28  ;;  %v598_v28 = vand.u32 7, %v1248_v62 }
  0xe4   : > { %v1039_v37 = vpop.f32.mrf.mxu0  ;;  %v461_v30 = vmul.f32 %v1228_v52, %v412_v25  ;;  %v584_v25 = vand.u32 7, %v1257_v6  ;;  %v991_v62 = vsel %vm1341_vm11, 1.0, %v1073_v16 }
  0xe5   : > { %421 = vst.msk [vmem:[#allocation2 + $0x20] sm:$0xff] %vm280_vm1, %v413_v34  ;;  %v411_v40 = vmax.f32 %v383_v35, 0.0  ;;  %v1208_v41 = vadd.f32 %v1039_v37, %v965_v19  ;;  %v467_v37 = vadd.f32 %v459_v2, %v443_v49  ;;  %v462_v38 = vmul.f32 %v1228_v52, %v413_v34 }
  0xe6   : > { %v395_v43 = vpop.f32.mrf.mxu0  ;;  %v543_v2 = vadd.s32 48, %v1180_v20  ;;  %vm1323_vm9 = vcmp.lt.s32.totalorder %v598_v28, 7  ;;  %vm1335_vm10 = vcmp.ge.s32.totalorder %v584_v25, 1  ;;  %vm1361_vm14 = vcmp.lt.s32.totalorder %v584_v25, 7 }
  0xe7   : > { %419 = vst.msk [vmem:[#allocation2 + $0x10] sm:$0xff] %vm280_vm1, %v411_v40  ;;  %v416_v46 = vmax.f32 %v1208_v41, 0.0  ;;  %v1218_v47 = vadd.f32 %v965_v19, %v395_v43  ;;  %v460_v0 = vmul.f32 %v1228_v52, %v411_v40  ;;  %vm1374_vm15 = vcmp.ge.s32.totalorder %v598_v28, 1 }
  0xe8   : > { %v1040_v50 = vpop.f32.mrf.mxu0  ;;  %v429_v57 = vld [vmem:[#allocation2 + $0x18] sm:$0xff]  ;;  %v1381_v25 = vsel %vm1323_vm9, 1.0, %v1073_v16 }
  0xe9   : > { %424 = vst.msk [vmem:[#allocation2 + $0x38] sm:$0xff] %vm280_vm1, %v416_v46  ;;  %v414_v53 = vmax.f32 %v1218_v47, 0.0  ;;  %v407_v59 = vadd.f32 %v1040_v50, %v965_v19  ;;  %v484_v15 = vmul.f32 %v1215_v45, %v429_v57  ;;  %v446_v21 = vmul.f32 %v1203_v39, %v429_v57 }
  0xea   : > { %v427_v58 = vld [vmem:[#allocation2 + $0x8] sm:$0xff]  ;;  %v398_v60 = vpop.f32.mrf.mxu0 }
  0xeb   : > { %v444_v63 = vmul.f32 %v1203_v39, %v427_v58  ;;  %422 = vst.msk [vmem:[#allocation2 + $0x28] sm:$0xff] %vm280_vm1, %v414_v53  ;;  %v399_v1 = vadd.f32 %v965_v19, %v398_v60  ;;  %v417_v5 = vmax.f32 %v407_v59, 0.0  ;;  %v1266_v19 = vsel %vm643_vm6, 1.0, %v1073_v16 }
  0xec   : > { %v430_v17 = vld [vmem:[#allocation2 + $0x20] sm:$0xff]  ;;  %v470_v50 = vadd.f32 %v462_v38, %v446_v21 }
  0xed   : > { %v468_v12 = vadd.f32 %v460_v0, %v444_v63  ;;  %v415_v18 = vmax.f32 %v399_v1, 0.0  ;;  %425 = vst.msk [vmem:[#allocation2 + $0x40] sm:$0xff] %vm280_vm1, %v417_v5  ;;  %v485_v22 = vmul.f32 %v1215_v45, %v430_v17  ;;  %v466_v44 = vmul.f32 %v1228_v52, %v417_v5 }
  0xee   : > { %v428_v23 = vld [vmem:[#allocation2 + $0x10] sm:$0xff]  ;;  %v447_v49 = vmul.f32 %v1203_v39, %v430_v17  ;;  %v463_v63 = vmul.f32 %v1228_v52, %v414_v53  ;;  %v465_v17 = vmul.f32 %v1228_v52, %v416_v46 }
  0xef   : > { %v445_v31 = vmul.f32 %v1203_v39, %v428_v23  ;;  %v483_v32 = vmul.f32 %v1215_v45, %v428_v23  ;;  %v492_v33 = vadd.f32 %v484_v15, %v468_v12  ;;  %423 = vst.msk [vmem:[#allocation2 + $0x30] sm:$0xff] %vm280_vm1, %v415_v18  ;;  %v464_v29 = vmul.f32 %v1228_v52, %v415_v18 }
  0xf0   : > { %v433_v40 = vld [vmem:[#allocation2 + $0x38] sm:$0xff]  ;;  %v471_v18 = vadd.f32 %v463_v63, %v447_v49  ;;  %v577_v23 = vand.u32 7, %v541_v27 }
  0xf1   : > { %v469_v42 = vadd.f32 %v461_v30, %v445_v31  ;;  %v1296_v43 = vadd.f32 %v1272_v24, %v492_v33  ;;  %v450_v47 = vmul.f32 %v1203_v39, %v433_v40  ;;  %v491_v34 = vadd.f32 %v483_v32, %v467_v37 }
  0xf2   : > { %v431_v56 = vld [vmem:[#allocation2 + $0x28] sm:$0xff]  ;;  %v488_v0 = vmul.f32 %v1215_v45, %v433_v40  ;;  %v591_v32 = vand.u32 7, %v543_v2  ;;  %vm1353_vm12 = vcmp.ge.s32.totalorder %v577_v23, 1  ;;  %vm1357_vm13 = vcmp.lt.s32.totalorder %v577_v23, 7  ;;  %v1368_v40 = vld [vmem:[%s1511_s4 + $0x1] ss:$0 sm:$0xff] }
  0xf3   : > { %513 = vst.msk [vmem:[#allocation2 + $0x10] sm:$0xff] %vm280_vm1, %v1296_v43  ;;  %v493_v57 = vadd.f32 %v485_v22, %v469_v42  ;;  %v474_v58 = vadd.f32 %v466_v44, %v450_v47  ;;  %v448_v59 = vmul.f32 %v1203_v39, %v431_v56  ;;  %v486_v60 = vmul.f32 %v1215_v45, %v431_v56 }
  0xf4   : > { %v1309_v1 = vadd.f32 %v1272_v24, %v491_v34  ;;  %v434_v53 = vld [vmem:[#allocation2 + $0x40] sm:$0xff]  ;;  %v985_v44 = vsel %vm1335_vm10, 1.0, %v1073_v16  ;;  %vm1394_vm2 = vcmp.ge.s32.totalorder %v591_v32, 1  ;;  %vm1398_vm3 = vcmp.lt.s32.totalorder %v591_v32, 7 }
  0xf5   : > { %v1313_v5 = vadd.f32 %v1272_v24, %v493_v57  ;;  %v498_v6 = vadd.f32 %v1223_v51, %v474_v58  ;;  %v472_v12 = vadd.f32 %v464_v29, %v448_v59  ;;  %v494_v15 = vadd.f32 %v486_v60, %v470_v50  ;;  %v1389_v50 = vld [vmem:[%s1511_s4] ss:$0 sm:$0xff] }
  0xf6   : > { %v432_v21 = vld [vmem:[#allocation2 + $0x30] sm:$0xff]  ;;  %512 = vst.msk [vmem:[#allocation2 + $0x8] sm:$0xff] %vm280_vm1, %v1309_v1  ;;  %v489_v33 = vmul.f32 %v1215_v45, %v434_v53  ;;  %v984_v58 = vsel %vm1353_vm12, 1.0, %v1073_v16  ;;  %v992_v59 = vsel %vm1357_vm13, 1.0, %v1073_v16  ;;  %v993_v60 = vsel %vm1361_vm14, 1.0, %v1073_v16 }
  0xf7   : > { %514 = vst.msk [vmem:[#allocation2 + $0x18] sm:$0xff] %vm280_vm1, %v1313_v5  ;;  %v1330_v41 = vadd.f32 %v1272_v24, %v498_v6  ;;  %v449_v46 = vmul.f32 %v1203_v39, %v432_v21  ;;  %v487_v51 = vmul.f32 %v1215_v45, %v432_v21  ;;  %v496_v52 = vadd.f32 %v488_v0, %v472_v12  ;;  %v1419_v6 = vld [vmem:[%s1511_s4 + $0x2] ss:$0 sm:$0xff] }
  0xf8   : > { %v507_v30 = vadd.f32 %v1272_v24, %v494_v15  ;;  %v987_v15 = vsel %vm1374_vm15, 1.0, %v1073_v16  ;;  %v720_v21 = vmul.f32 %v1368_v40, %v1309_v1 }
  0xf9   : > { %519 = vst.msk [vmem:[#allocation2 + $0x40] sm:$0xff] %vm280_vm1, %v1330_v41  ;;  %v473_v39 = vadd.f32 %v465_v17, %v449_v46  ;;  %v495_v37 = vadd.f32 %v487_v51, %v471_v18  ;;  %v509_v38 = vadd.f32 %v1272_v24, %v496_v52 }
  0xfa   : > { %515 = vst.msk [vmem:[#allocation2 + $0x20] sm:$0xff] %vm280_vm1, %v507_v30 }
  0xfb   : > { %v497_v42 = vadd.f32 %v489_v33, %v473_v39  ;;  %v508_v35 = vadd.f32 %v1272_v24, %v495_v37  ;;  %517 = vst.msk [vmem:[#allocation2 + $0x30] sm:$0xff] %vm280_vm1, %v509_v38  ;;  %v725_v1 = vmul.f32 %v1368_v40, %v509_v38  ;;  %v723_v33 = vmul.f32 %v1368_v40, %v507_v30 }
  0xfd   : > { %v510_v56 = vadd.f32 %v1272_v24, %v497_v42  ;;  %516 = vst.msk [vmem:[#allocation2 + $0x28] sm:$0xff] %vm280_vm1, %v508_v35  ;;  %v520_v29 = vld [vmem:[#allocation2 + $0x7] sm:$0xff]  ;;  %v521_v34 = vld [vmem:[#allocation2 + $0xf] sm:$0xff]  ;;  %v724_v37 = vmul.f32 %v1368_v40, %v508_v35 }
  0xfe   : > { %v528_v57 = vld [vmem:[#allocation2 + $0x9] sm:$0xff]  ;;  %v529_v63 = vld [vmem:[#allocation2 + $0x11] sm:$0xff]  ;;  %v689_v24 = vmul.f32 %v1235_v54, %v520_v29  ;;  %v690_v0 = vmul.f32 %v1238_v55, %v521_v34  ;;  %v986_v55 = vsel %vm1394_vm2, 1.0, %v1073_v16 }
  0xff   : > { %v736_v2 = vmul.f32 %v1245_v61, %v528_v57  ;;  %v522_v12 = vld [vmem:[#allocation2 + $0x17] sm:$0xff]  ;;  %518 = vst.msk [vmem:[#allocation2 + $0x38] sm:$0xff] %vm280_vm1, %v510_v56  ;;  %v737_v17 = vmul.f32 %v1262_v11, %v529_v63  ;;  %v994_v61 = vsel %vm1398_vm3, 1.0, %v1073_v16  ;;  %v721_v11 = vmul.f32 %v1368_v40, %v1296_v43  ;;  %v1001_v43 = vld [vmem:[%s1509_s2 + $0x2] ss:$0 sm:$0xff] }
 0x100   : > { %v691_v54 = vmul.f32 %v1266_v19, %v522_v12  ;;  %v704_v18 = vmul.f32 %v1389_v50, %v689_v24  ;;  %v705_v53 = vmul.f32 %v1389_v50, %v690_v0  ;;  %v722_v16 = vmul.f32 %v1368_v40, %v1313_v5  ;;  %v535_v29 = vld [vmem:[#allocation2 + $0x41] sm:$0xff] }
 0x101   : > { %v752_v19 = vmul.f32 %v1419_v6, %v736_v2  ;;  %v753_v23 = vmul.f32 %v1419_v6, %v737_v17  ;;  %v523_v20 = vld [vmem:[#allocation2 + $0x1f] sm:$0xff]  ;;  %v726_v34 = vmul.f32 %v1368_v40, %v510_v56  ;;  %v743_v56 = vmul.f32 %v1381_v25, %v535_v29 }
 0x102   : > { %v530_v46 = vld [vmem:[#allocation2 + $0x19] sm:$0xff]  ;;  %v706_v51 = vmul.f32 %v1389_v50, %v691_v54  ;;  %v728_v52 = vadd.f32 %v720_v21, %v704_v18  ;;  %v729_v27 = vadd.f32 %v721_v11, %v705_v53  ;;  %v692_v31 = vmul.f32 %v1276_v26, %v523_v20 }
 0x103   : > { %v738_v32 = vmul.f32 %v990_v36, %v530_v46 }
 0x104   : > { %v730_v39 = vadd.f32 %v722_v16, %v706_v51  ;;  %v525_v48 = vld [vmem:[#allocation2 + $0x2f] sm:$0xff]  ;;  %v760_v22 = vadd.f32 %v752_v19, %v728_v52  ;;  %v761_v45 = vadd.f32 %v753_v23, %v729_v27  ;;  %v531_v5 = vld [vmem:[#allocation2 + $0x21] sm:$0xff]  ;;  %v707_v42 = vmul.f32 %v1389_v50, %v692_v31 }
 0x105   : > { %v754_v26 = vmul.f32 %v1419_v6, %v738_v32  ;;  %v524_v36 = vld [vmem:[#allocation2 + $0x27] sm:$0xff]  ;;  %v694_v47 = vmul.f32 %v985_v44, %v525_v48  ;;  %v739_v38 = vmul.f32 %v991_v62, %v531_v5  ;;  %v727_v16 = vmul.f32 %v1368_v40, %v1330_v41 }
 0x106   : > { %v532_v28 = vld [vmem:[#allocation2 + $0x29] sm:$0xff]  ;;  %v693_v49 = vmul.f32 %v984_v58, %v524_v36  ;;  %v773_v30 = vadd.f32 %v1001_v43, %v760_v22  ;;  %v774_v57 = vadd.f32 %v1001_v43, %v761_v45  ;;  %v731_v63 = vadd.f32 %v723_v33, %v707_v42  ;;  %v533_v24 = vld [vmem:[#allocation2 + $0x31] sm:$0xff]  ;;  %v527_v44 = vld [vmem:[#allocation2 + $0x3f] sm:$0xff] }
 0x107   : > { %v762_v35 = vadd.f32 %v754_v26, %v730_v39  ;;  %v526_v0 = vld [vmem:[#allocation2 + $0x37] sm:$0xff]  ;;  %v709_v2 = vmul.f32 %v1389_v50, %v694_v47  ;;  %v755_v12 = vmul.f32 %v1419_v6, %v739_v38  ;;  %v740_v54 = vmul.f32 %v992_v59, %v532_v28  ;;  %v1002_v45 = vld [vmem:[%s1513_s6] ss:$0 sm:$0xff] }
 0x108   : > { %v708_v17 = vmul.f32 %v1389_v50, %v693_v49  ;;  %v534_v62 = vld [vmem:[#allocation2 + $0x39] sm:$0xff]  ;;  %v781_v18 = vpack.c.bf16 %v774_v57, %v773_v30  ;;  %v741_v58 = vmul.f32 %v993_v60, %v533_v24  ;;  %v695_v53 = vmul.f32 %v986_v55, %v526_v0 }
 0x109   : > { %v733_v21 = vadd.f32 %v725_v1, %v709_v2  ;;  %v763_v11 = vadd.f32 %v755_v12, %v731_v63  ;;  %v756_v23 = vmul.f32 %v1419_v6, %v740_v54  ;;  %v696_v46 = vmul.f32 %v987_v15, %v527_v44 }
 0x10a   : > { %v732_v19 = vadd.f32 %v724_v37, %v708_v17  ;;  %1043 = vmatprep.mubr.msk.bf16.mxu1 %vm280_vm1, %v781_v18  ;;  %v757_v20 = vmul.f32 %v1419_v6, %v741_v58  ;;  %v710_v51 = vmul.f32 %v1389_v50, %v695_v53  ;;  %v742_v59 = vmul.f32 %v994_v61, %v534_v62 }
 0x10b   : > { %v775_v60 = vadd.f32 %v1001_v43, %v762_v35  ;;  %v776_v55 = vadd.f32 %v1001_v43, %v763_v11  ;;  %v711_v27 = vmul.f32 %v1389_v50, %v696_v46  ;;  %v759_v15 = vmul.f32 %v1419_v6, %v743_v56 }
 0x10c   : > { %v764_v52 = vadd.f32 %v756_v23, %v732_v19  ;;  %v765_v25 = vadd.f32 %v757_v20, %v733_v21  ;;  %v734_v31 = vadd.f32 %v726_v34, %v710_v51  ;;  %v758_v32 = vmul.f32 %v1419_v6, %v742_v59 }
 0x10d   : > { %v782_v1 = vpack.c.bf16 %v776_v55, %v775_v60  ;;  %v735_v37 = vadd.f32 %v727_v16, %v711_v27 }
 0x10e   : > { %v777_v33 = vadd.f32 %v1001_v43, %v764_v52  ;;  %v778_v39 = vadd.f32 %v1001_v43, %v765_v25  ;;  %v766_v61 = vadd.f32 %v758_v32, %v734_v31 }
 0x10f   : > { %1044 = vmatmul.mubr.msk.bf16.vlgmr.msra.gmra.mxu1 %vm280_vm1, %v782_v1  ;;  %v767_v40 = vadd.f32 %v759_v15, %v735_v37 }
 0x110   : > { %v783_v41 = vpack.c.bf16 %v778_v39, %v777_v33  ;;  %v779_v48 = vadd.f32 %v1001_v43, %v766_v61 }
 0x111   : > { %v780_v22 = vadd.f32 %v1001_v43, %v767_v40 }
 0x112   : > { %1047 = vmatprep.mubr.msk.bf16.mxu1 %vm280_vm1, %v783_v41 }
 0x113   : > { %v784_v50 = vpack.c.bf16 %v780_v22, %v779_v48 }
 0x117   : > { %1048 = vmatmul.mubr.msk.bf16.gmra.mxu1 %vm280_vm1, %v784_v50 }
 0x1cf   : > { %v1045_v5 = vpop.f32.mrf.mxu1 }
 0x1d0   : > { %v855_v42 = vadd.f32 %v1045_v5, %v1002_v45 }
 0x1d1   : > { %v846_v6 = vpop.f32.mrf.mxu1 }
 0x1d2   : > { %v879_v26 = vadd.f32 %v855_v42, %v1149_v7  ;;  %v847_v36 = vadd.f32 %v1002_v45, %v846_v6 }
 0x1d3   : > { %v1046_v43 = vpop.f32.mrf.mxu1 }
 0x1d4   : > { %v887_v47 = vmax.f32 %v879_v26, 0.0  ;;  %v877_v38 = vadd.f32 %v847_v36, %v1139_v3  ;;  %v858_v28 = vadd.f32 %v1046_v43, %v1002_v45 }
 0x1d5   : > { %v849_v49 = vpop.f32.mrf.mxu1 }
 0x1d6   : > { %895 = vst.msk [vmem:[%s1479_s19 + $0x10] sm:$0xff] %vm332_vm0, %v887_v47  ;;  %v885_v7 = vmax.f32 %v877_v38, 0.0  ;;  %v880_v29 = vadd.f32 %v858_v28, %v1151_v8  ;;  %v850_v34 = vadd.f32 %v1002_v45, %v849_v49 }
 0x1d7   : > { %v1049_v30 = vpop.f32.mrf.mxu1 }
 0x1d8   : > { %893 = vst.msk [vmem:[%s1479_s19] sm:$0xff] %vm332_vm0, %v885_v7  ;;  %v888_v57 = vmax.f32 %v880_v29, 0.0  ;;  %v878_v63 = vadd.f32 %v850_v34, %v1141_v4  ;;  %v871_v35 = vadd.f32 %v1049_v30, %v1002_v45 }
 0x1d9   : > { %v862_v24 = vpop.f32.mrf.mxu1 }
 0x1da   : > { %896 = vst.msk [vmem:[%s1479_s19 + $0x18] sm:$0xff] %vm332_vm0, %v888_v57  ;;  %v886_v3 = vmax.f32 %v878_v63, 0.0  ;;  %v883_v0 = vadd.f32 %v871_v35, %v1163_v13  ;;  %v863_v2 = vadd.f32 %v1002_v45, %v862_v24 }
 0x1db   : > { %v1050_v8 = vpop.f32.mrf.mxu1 }
 0x1dc   : > { %894 = vst.msk [vmem:[%s1479_s19 + $0x8] sm:$0xff] %vm332_vm0, %v886_v3  ;;  %v891_v12 = vmax.f32 %v883_v0, 0.0  ;;  %v881_v17 = vadd.f32 %v863_v2, %v1153_v9  ;;  %v874_v54 = vadd.f32 %v1050_v8, %v1002_v45 }
 0x1dd   : > { %v865_v44 = vpop.f32.mrf.mxu1 }
 0x1de   : > { %899 = vst.msk [vmem:[%s1479_s19 + $0x30] sm:$0xff] %vm332_vm0, %v891_v12  ;;  %v889_v4 = vmax.f32 %v881_v17, 0.0  ;;  %v884_v62 = vadd.f32 %v874_v54, %v1165_v14  ;;  %v866_v18 = vadd.f32 %v1002_v45, %v865_v44 }
 0x1e0   : > { %897 = vst.msk [vmem:[%s1479_s19 + $0x20] sm:$0xff] %vm332_vm0, %v889_v4  ;;  %v892_v58 = vmax.f32 %v884_v62, 0.0  ;;  %v882_v13 = vadd.f32 %v866_v18, %v1155_v10 }
 0x1e2   : > { %900 = vst.msk [vmem:[%s1479_s19 + $0x38] sm:$0xff] %vm332_vm0, %v892_v58  ;;  %v890_v53 = vmax.f32 %v882_v13, 0.0 }
 0x1e4   : > { %898 = vst.msk [vmem:[%s1479_s19 + $0x28] sm:$0xff] %vm332_vm0, %v890_v53 }
 0x1e5 PF: > { %s17_s24 = sadd.s32 1, %s1071_s24  }
 0x1e6   : > { %p14_p4 = scmp.ge.s32.totalorder %s17_s24, 4  }
 0x1e8   :  { %16 = sbr.rel (!%p14_p4) target bundleno = 1 (0x1), region = 82 }

// kernel: esfnet_forward.18
= control target key start
LH: loop header
LB: loop body
LE: loop exit
PB: predicated region body
PF: predicated region fallthrough
CT: control target
= control target key end

     0   :  { %s811_s24 = smov 0   ;;  %s916_s0 = inlined_call_operand.vmem [shape: f32[2,16,128], index: 0, kind: input, shape index: {}]   ;;  %s917_s1 = inlined_call_operand.vmem [shape: bf16[128,32], index: 1, kind: input, shape index: {}]   ;;  %s918_s2 = inlined_call_operand.vmem [shape: f32[3,32], index: 2, kind: input, shape index: {}]   ;;  %s919_s3 = inlined_call_operand.vmem [shape: f32[3,1,32], index: 3, kind: input, shape index: {}]   ;;  %s920_s4 = inlined_call_operand.vmem [shape: f32[3,1,32], index: 4, kind: input, shape index: {}]   ;;  %s921_s5 = inlined_call_operand.vmem [shape: bf16[32,128], index: 5, kind: input, shape index: {}]   ;;  %s922_s6 = inlined_call_operand.vmem [shape: f32[1,128], index: 6, kind: input, shape index: {}]   ;;  %s923_s7 = inlined_call_operand.vmem [shape: f32[2,16,128], index: 7, kind: output, shape index: {}]  }
   0x1 LB: > { %s663_s25 = sadd.s32 4294967295, %s767_s24   ;;  %p667_p0 = scmp.ge.s32.totalorder %s767_s24, 1  ;;  %s767_s24 = sphi %s811_s24, %s17_s24  }
   0x2   : > { %p237_p1 = scmp.lt.s32.totalorder %s767_s24, 3 }
   0x4   : > { %p238_p2 = pnand %p667_p0, %p237_p1 }
   0x5   : > { %p269_p3 = scmp.lt.s32.totalorder (!%p238_p2), %s663_s25, 1 }
   0x6   : > { %241 = sbr.rel (%p238_p2) target bundleno = 477 (0x1dd), region = 48 }
   0xb   : > { %v751_v0 = vld [vmem:[%s917_s1 + $0x38] sm:$0xff]   ;;  %v769_v1 = vmov 0.0   ;;  %v752_v2 = vld [vmem:[%s917_s1 + $0x30] sm:$0xff]   ;;  %vm770_vm0 = vmmov 0   ;;  %vm280_vm1 = vcmask 261120   ;;  %v753_v3 = vld [vmem:[%s917_s1 + $0x28] sm:$0xff]  }
   0xc   : > { %713 = vmatprep.subr.bf16.mxu0 %v769_v1  ;;  %733 = vmatprep.subr.bf16.mxu1 %v769_v1  ;;  %281 = vst.msk [vmem:[#allocation2] sm:$0xff] %vm280_vm1, %v769_v1  ;;  %282 = vst.msk [vmem:[#allocation2 + $0x8] sm:$0xff] %vm280_vm1, %v769_v1  ;;  %v754_v4 = vld [vmem:[%s917_s1 + $0x20] sm:$0xff]   ;;  %v755_v5 = vld [vmem:[%s917_s1 + $0x18] sm:$0xff]   ;;  %s925_s25 = smov (!%p269_p3, %s663_s25), 1 }
   0xd   : > { %714 = vmatpush3.bf16.msra.mxu0 %v751_v0  ;;  %729 = vmatprep.mubr.msk.bf16.mxu0 %vm770_vm0, %v769_v1  ;;  %283 = vst.msk [vmem:[#allocation2 + $0x20] sm:$0xff] %vm280_vm1, %v769_v1  ;;  %284 = vst.msk [vmem:[#allocation2 + $0x28] sm:$0xff] %vm280_vm1, %v769_v1  ;;  %v756_v6 = vld [vmem:[%s917_s1 + $0x10] sm:$0xff]   ;;  %s699_s15 = sshll.u32 %s925_s25, 4  ;;  %v757_v7 = vld [vmem:[%s917_s1 + $0x8] sm:$0xff]  }
   0xe   : > { %715 = vmatprep.subr.bf16.mxu0 %v769_v1  ;;  %737 = vmatprep.mubr.msk.bf16.mxu1 %vm770_vm0, %v769_v1  ;;  %s273_s20 = scalar_lea.vmem %s916_s0, %s699_s15  ;;  %v758_v8 = vld [vmem:[%s917_s1] sm:$0xff]   ;;  %v759_v12 = vld [vmem:[%s921_s5 + $0x8] sm:$0xff]   ;;  %s278_s8 = scalar_lea.vmem %s923_s7, %s699_s15 }
   0xf   : > { %v859_v9 = vld [vmem:[%s273_s20] sm:$0xff]  ;;  %v861_v10 = vld [vmem:[%s273_s20 + $0x8] sm:$0xff]  ;;  %734 = vmatpush3.bf16.msra.mxu1 %v759_v12 }
  0x10   : > { %v287_v11 = vpack.c.bf16 %v861_v10, %v859_v9  ;;  %v760_v13 = vld [vmem:[%s921_s5] sm:$0xff]   ;;  %735 = vmatprep.subr.bf16.mxu1 %v769_v1 }
  0x11   : > { %716 = vmatpush3.bf16.msra.mxu0 %v752_v2  ;;  %v672_v14 = vld [vmem:[%s918_s2] ss:$0 sm:$0xff]  ;;  %v683_v20 = vld [vmem:[%s919_s3 + $0x1] ss:$0 sm:$0xff]  ;;  %v685_v21 = vld [vmem:[%s919_s3 + $0x2] ss:$0 sm:$0xff] }
  0x12   : > { %717 = vmatprep.subr.bf16.mxu0 %v769_v1  ;;  %v681_v17 = vld [vmem:[%s919_s3] ss:$0 sm:$0xff]  ;;  %v686_v35 = vld [vmem:[%s918_s2 + $0x1] ss:$0 sm:$0xff]  ;;  %v691_v50 = vld [vmem:[%s920_s4 + $0x2] ss:$0 sm:$0xff] }
  0x13   : > { %736 = vmatpush3.bf16.msra.mxu1 %v760_v13  ;;  %v402_v16 = vld [vmem:[#allocation2] sm:$0xff]  ;;  %v403_v26 = vld [vmem:[#allocation2 + $0x8] sm:$0xff] }
  0x14   : > { %v404_v19 = vld [vmem:[#allocation2 + $0x20] sm:$0xff]  ;;  %v413_v24 = vmul.f32 %v681_v17, %v402_v16  ;;  %v405_v30 = vld [vmem:[#allocation2 + $0x28] sm:$0xff]  ;;  %v414_v34 = vmul.f32 %v681_v17, %v403_v26 }
  0x15   : > { %718 = vmatpush3.bf16.msra.mxu0 %v753_v3  ;;  %v435_v28 = vmul.f32 %v685_v21, %v404_v19  ;;  %v436_v38 = vmul.f32 %v685_v21, %v405_v30  ;;  %v687_v44 = vld [vmem:[%s920_s4] ss:$0 sm:$0xff]  ;;  %v689_v46 = vld [vmem:[%s920_s4 + $0x1] ss:$0 sm:$0xff]  ;;  %v692_v61 = vld [vmem:[%s918_s2 + $0x2] ss:$0 sm:$0xff] }
  0x16   : > { %719 = vmatprep.subr.bf16.mxu0 %v769_v1  ;;  %v693_v2 = vld [vmem:[%s922_s6] ss:$0 sm:$0xff] }
  0x19   : > { %720 = vmatpush3.bf16.msra.mxu0 %v754_v4 }
  0x1a   : > { %721 = vmatprep.subr.bf16.mxu0 %v769_v1 }
  0x1d   : > { %722 = vmatpush3.bf16.msra.mxu0 %v755_v5 }
  0x1e   : > { %723 = vmatprep.subr.bf16.mxu0 %v769_v1 }
  0x21   : > { %724 = vmatpush3.bf16.msra.mxu0 %v756_v6 }
  0x22   : > { %725 = vmatprep.subr.bf16.mxu0 %v769_v1 }
  0x25   : > { %726 = vmatpush3.bf16.msra.mxu0 %v757_v7 }
  0x26   : > { %727 = vmatprep.subr.bf16.mxu0 %v769_v1 }
  0x29   : > { %728 = vmatpush3.bf16.msra.mxu0 %v758_v8 }
  0x2c   : > { %730 = vmatmul.mubr.bf16.vlgmr.msra.gmra.mxu0 %v287_v11 }
  0xec   : > { %v391_v15 = vpop.f32.mrf.mxu0 }
  0xed   : > { %v392_v18 = vadd.f32 %v672_v14, %v391_v15 }
  0xee   : > { %v731_v22 = vpop.f32.mrf.mxu0 }
  0xef   : > { %v398_v23 = vmax.f32 %v392_v18, 0.0 }
  0xf0   : > { %v394_v25 = vpop.f32.mrf.mxu0 }
  0xf1   : > { %400 = vst.msk [vmem:[#allocation2 + $0x10] sm:$0xff] %vm280_vm1, %v398_v23  ;;  %v423_v27 = vmul.f32 %v683_v20, %v398_v23  ;;  %v395_v29 = vadd.f32 %v672_v14, %v394_v25 }
  0xf2   : > { %v732_v31 = vpop.f32.mrf.mxu0 }
  0xf3   : > { %v425_v32 = vadd.f32 %v423_v27, %v413_v24  ;;  %v399_v33 = vmax.f32 %v395_v29, 0.0 }
  0xf5   : > { %v437_v36 = vadd.f32 %v435_v28, %v425_v32  ;;  %401 = vst.msk [vmem:[#allocation2 + $0x18] sm:$0xff] %vm280_vm1, %v399_v33  ;;  %v424_v37 = vmul.f32 %v683_v20, %v399_v33 }
  0xf7   : > { %v444_v39 = vadd.f32 %v686_v35, %v437_v36  ;;  %v426_v40 = vadd.f32 %v424_v37, %v414_v34 }
  0xf9   : > { %446 = vst.msk [vmem:[#allocation2 + $0x10] sm:$0xff] %vm280_vm1, %v444_v39  ;;  %v438_v41 = vadd.f32 %v436_v38, %v426_v40  ;;  %v509_v51 = vmul.f32 %v689_v46, %v444_v39 }
  0xfb   : > { %v445_v42 = vadd.f32 %v686_v35, %v438_v41 }
  0xfd   : > { %447 = vst.msk [vmem:[#allocation2 + $0x18] sm:$0xff] %vm280_vm1, %v445_v42  ;;  %v510_v56 = vmul.f32 %v689_v46, %v445_v42 }
 0x100   : > { %v448_v43 = vld [vmem:[#allocation2 + $0xc] sm:$0xff] }
 0x101   : > { %v490_v45 = vmul.f32 0.0, %v448_v43 }
 0x103   : > { %v499_v47 = vmul.f32 %v687_v44, %v490_v45 }
 0x104   : > { %v449_v48 = vld [vmem:[#allocation2 + $0x14] sm:$0xff]  ;;  %v450_v49 = vld [vmem:[#allocation2 + $0x1c] sm:$0xff] }
 0x105   : > { %v491_v52 = vmul.f32 0.0, %v449_v48  ;;  %v514_v53 = vmul.f32 0.0, %v450_v49  ;;  %v511_v54 = vadd.f32 %v509_v51, %v499_v47 }
 0x107   : > { %v500_v55 = vmul.f32 %v687_v44, %v491_v52  ;;  %v523_v57 = vmul.f32 %v691_v50, %v491_v52  ;;  %v524_v59 = vmul.f32 %v691_v50, %v514_v53 }
 0x109   : > { %v512_v58 = vadd.f32 %v510_v56, %v500_v55  ;;  %v525_v60 = vadd.f32 %v523_v57, %v511_v54 }
 0x10b   : > { %v526_v62 = vadd.f32 %v524_v59, %v512_v58  ;;  %v532_v63 = vadd.f32 %v692_v61, %v525_v60 }
 0x10d   : > { %v533_v0 = vadd.f32 %v692_v61, %v526_v62 }
 0x10f   : > { %v534_v1 = vpack.c.bf16 %v533_v0, %v532_v63 }
 0x111   : > { %738 = vmatmul.mubr.msk.bf16.vlgmr.msra.gmra.mxu1 %vm280_vm1, %v534_v1 }
 0x1d1   : > { %v595_v3 = vpop.f32.mrf.mxu1 }
 0x1d2   : > { %v596_v4 = vadd.f32 %v693_v2, %v595_v3 }
 0x1d3   : > { %v739_v5 = vpop.f32.mrf.mxu1 }
 0x1d4   : > { %v602_v6 = vadd.f32 %v596_v4, %v859_v9 }
 0x1d5   : > { %v598_v7 = vpop.f32.mrf.mxu1 }
 0x1d6   : > { %v604_v8 = vmax.f32 %v602_v6, 0.0  ;;  %v599_v11 = vadd.f32 %v693_v2, %v598_v7 }
 0x1d7   : > { %v740_v12 = vpop.f32.mrf.mxu1 }
 0x1d8   : > { %606 = vst [vmem:[%s278_s8] sm:$0xff] %v604_v8  ;;  %v603_v13 = vadd.f32 %v599_v11, %v861_v10 }
 0x1da   : > { %v605_v14 = vmax.f32 %v603_v13, 0.0 }
 0x1dc   : > { %607 = vst [vmem:[%s278_s8 + $0x8] sm:$0xff] %v605_v14 }
 0x1dd PF: > { %s17_s24 = sadd.s32 1, %s767_s24  }
 0x1de   : > { %p14_p4 = scmp.ge.s32.totalorder %s17_s24, 4  }
 0x1e0   :  { %16 = sbr.rel (!%p14_p4) target bundleno = 1 (0x1), region = 82 }

// kernel: esfnet_forward.17
= control target key start
LH: loop header
LB: loop body
LE: loop exit
PB: predicated region body
PF: predicated region fallthrough
CT: control target
= control target key end

     0   :  { %s814_s24 = smov 0   ;;  %s931_s0 = inlined_call_operand.vmem [shape: f32[2,16,128], index: 0, kind: input, shape index: {}]   ;;  %s932_s1 = inlined_call_operand.vmem [shape: bf16[128,32], index: 1, kind: input, shape index: {}]   ;;  %s933_s2 = inlined_call_operand.vmem [shape: f32[3,32], index: 2, kind: input, shape index: {}]   ;;  %s934_s3 = inlined_call_operand.vmem [shape: f32[3,1,32], index: 3, kind: input, shape index: {}]   ;;  %s935_s4 = inlined_call_operand.vmem [shape: f32[3,1,32], index: 4, kind: input, shape index: {}]   ;;  %s936_s5 = inlined_call_operand.vmem [shape: bf16[32,128], index: 5, kind: input, shape index: {}]   ;;  %s937_s6 = inlined_call_operand.vmem [shape: f32[1,128], index: 6, kind: input, shape index: {}]   ;;  %s938_s7 = inlined_call_operand.vmem [shape: f32[2,16,128], index: 7, kind: output, shape index: {}]  }
   0x1 LB: > { %s662_s25 = sadd.s32 4294967295, %s770_s24   ;;  %p666_p0 = scmp.ge.s32.totalorder %s770_s24, 1  ;;  %s770_s24 = sphi %s814_s24, %s17_s24  }
   0x2   : > { %p237_p1 = scmp.lt.s32.totalorder %s770_s24, 3 }
   0x4   : > { %p238_p2 = pnand %p666_p0, %p237_p1 }
   0x5   : > { %p269_p3 = scmp.lt.s32.totalorder (!%p238_p2), %s662_s25, 1 }
   0x6   : > { %241 = sbr.rel (%p238_p2) target bundleno = 483 (0x1e3), region = 48 }
   0xb   : > { %v754_v0 = vld [vmem:[%s932_s1 + $0x38] sm:$0xff]   ;;  %v772_v1 = vmov 0.0   ;;  %v755_v2 = vld [vmem:[%s932_s1 + $0x30] sm:$0xff]   ;;  %vm773_vm0 = vmmov 0   ;;  %vm280_vm1 = vcmask 261120   ;;  %v756_v3 = vld [vmem:[%s932_s1 + $0x28] sm:$0xff]   ;;  %v450_v27 = vlaneseq }
   0xc   : > { %716 = vmatprep.subr.bf16.mxu0 %v772_v1  ;;  %736 = vmatprep.subr.bf16.mxu1 %v772_v1  ;;  %281 = vst.msk [vmem:[#allocation2] sm:$0xff] %vm280_vm1, %v772_v1  ;;  %282 = vst.msk [vmem:[#allocation2 + $0x18] sm:$0xff] %vm280_vm1, %v772_v1  ;;  %v757_v4 = vld [vmem:[%s932_s1 + $0x20] sm:$0xff]   ;;  %v758_v5 = vld [vmem:[%s932_s1 + $0x18] sm:$0xff]   ;;  %s940_s25 = smov (!%p269_p3, %s662_s25), 1 }
   0xd   : > { %717 = vmatpush3.bf16.msra.mxu0 %v754_v0  ;;  %732 = vmatprep.mubr.msk.bf16.mxu0 %vm773_vm0, %v772_v1  ;;  %v759_v6 = vld [vmem:[%s932_s1 + $0x10] sm:$0xff]   ;;  %s702_s15 = sshll.u32 %s940_s25, 4  ;;  %v760_v7 = vld [vmem:[%s932_s1 + $0x8] sm:$0xff]   ;;  %v761_v8 = vld [vmem:[%s932_s1] sm:$0xff]   ;;  %v451_v35 = vshrl.u32 %v450_v27, 7 }
   0xe   : > { %718 = vmatprep.subr.bf16.mxu0 %v772_v1  ;;  %740 = vmatprep.mubr.msk.bf16.mxu1 %vm773_vm0, %v772_v1  ;;  %s273_s20 = scalar_lea.vmem %s931_s0, %s702_s15  ;;  %v762_v12 = vld [vmem:[%s936_s5 + $0x8] sm:$0xff]   ;;  %v763_v13 = vld [vmem:[%s936_s5] sm:$0xff]   ;;  %s278_s8 = scalar_lea.vmem %s938_s7, %s702_s15 }
   0xf   : > { %v868_v9 = vld [vmem:[%s273_s20] sm:$0xff]  ;;  %v870_v10 = vld [vmem:[%s273_s20 + $0x8] sm:$0xff]  ;;  %737 = vmatpush3.bf16.msra.mxu1 %v762_v12  ;;  %v452_v42 = vadd.s32 8, %v451_v35  ;;  %v457_v47 = vand.u32 3, %v451_v35 }
  0x10   : > { %v285_v11 = vpack.c.bf16 %v870_v10, %v868_v9  ;;  %738 = vmatprep.subr.bf16.mxu1 %v772_v1  ;;  %v671_v14 = vld [vmem:[%s933_s2] ss:$0 sm:$0xff]  ;;  %v684_v26 = vld [vmem:[%s934_s3 + $0x2] ss:$0 sm:$0xff]  ;;  %v682_v28 = vld [vmem:[%s934_s3 + $0x1] ss:$0 sm:$0xff] }
  0x11   : > { %719 = vmatpush3.bf16.msra.mxu0 %v755_v2  ;;  %v680_v24 = vld [vmem:[%s934_s3] ss:$0 sm:$0xff]  ;;  %v685_v38 = vld [vmem:[%s933_s2 + $0x1] ss:$0 sm:$0xff]  ;;  %v464_v46 = vand.u32 3, %v452_v42  ;;  %vm477_vm3 = vcmp.ge.s32.totalorder %v457_v47, 2 }
  0x12   : > { %720 = vmatprep.subr.bf16.mxu0 %v772_v1  ;;  %vm483_vm4 = vcmp.lt.s32.totalorder %v457_v47, 2  ;;  %v686_v50 = vsel %vm477_vm3, 1.0, %v772_v1  ;;  %v690_v53 = vld [vmem:[%s935_s4] ss:$0 sm:$0xff]  ;;  %v692_v54 = vld [vmem:[%s935_s4 + $0x1] ss:$0 sm:$0xff] }
  0x13   : > { %739 = vmatpush3.bf16.msra.mxu1 %v763_v13  ;;  %v400_v23 = vld [vmem:[#allocation2] sm:$0xff]  ;;  %v403_v25 = vld [vmem:[#allocation2 + $0x18] sm:$0xff]  ;;  %vm478_vm2 = vcmp.ge.s32.totalorder %v464_v46, 2  ;;  %vm484_vm5 = vcmp.lt.s32.totalorder %v464_v46, 2  ;;  %v688_v51 = vsel %vm483_vm4, 1.0, %v772_v1 }
  0x14   : > { %v411_v29 = vmul.f32 %v680_v24, %v400_v23  ;;  %v434_v31 = vmul.f32 %v684_v26, %v403_v25  ;;  %v687_v48 = vsel %vm478_vm2, 1.0, %v772_v1  ;;  %v689_v52 = vsel %vm484_vm5, 1.0, %v772_v1  ;;  %v694_v62 = vld [vmem:[%s935_s4 + $0x2] ss:$0 sm:$0xff] }
  0x15   : > { %721 = vmatpush3.bf16.msra.mxu0 %v756_v3 }
  0x16   : > { %722 = vmatprep.subr.bf16.mxu0 %v772_v1 }
  0x19   : > { %723 = vmatpush3.bf16.msra.mxu0 %v757_v4 }
  0x1a   : > { %724 = vmatprep.subr.bf16.mxu0 %v772_v1 }
  0x1d   : > { %725 = vmatpush3.bf16.msra.mxu0 %v758_v5 }
  0x1e   : > { %726 = vmatprep.subr.bf16.mxu0 %v772_v1 }
  0x21   : > { %727 = vmatpush3.bf16.msra.mxu0 %v759_v6 }
  0x22   : > { %728 = vmatprep.subr.bf16.mxu0 %v772_v1 }
  0x25   : > { %729 = vmatpush3.bf16.msra.mxu0 %v760_v7  ;;  %v695_v7 = vld [vmem:[%s933_s2 + $0x2] ss:$0 sm:$0xff] }
  0x26   : > { %730 = vmatprep.subr.bf16.mxu0 %v772_v1 }
  0x29   : > { %731 = vmatpush3.bf16.msra.mxu0 %v761_v8 }
  0x2c   : > { %733 = vmatmul.mubr.bf16.vlgmr.msra.gmra.mxu0 %v285_v11 }
  0xec   : > { %v389_v15 = vpop.f32.mrf.mxu0 }
  0xed   : > { %v390_v16 = vadd.f32 %v671_v14, %v389_v15  ;;  %v696_v15 = vld [vmem:[%s937_s6] ss:$0 sm:$0xff] }
  0xee   : > { %v734_v17 = vpop.f32.mrf.mxu0 }
  0xef   : > { %v396_v18 = vmax.f32 %v390_v16, 0.0 }
  0xf0   : > { %v392_v19 = vpop.f32.mrf.mxu0 }
  0xf1   : > { %398 = vst.msk [vmem:[#allocation2 + $0x8] sm:$0xff] %vm280_vm1, %v396_v18  ;;  %v393_v20 = vadd.f32 %v671_v14, %v392_v19  ;;  %v421_v32 = vmul.f32 %v682_v28, %v396_v18 }
  0xf2   : > { %v735_v21 = vpop.f32.mrf.mxu0 }
  0xf3   : > { %v397_v22 = vmax.f32 %v393_v20, 0.0  ;;  %v423_v39 = vadd.f32 %v421_v32, %v411_v29 }
  0xf5   : > { %399 = vst.msk [vmem:[#allocation2 + $0x10] sm:$0xff] %vm280_vm1, %v397_v22  ;;  %v422_v34 = vmul.f32 %v682_v28, %v397_v22 }
  0xf8   : > { %v401_v30 = vld [vmem:[#allocation2 + $0x8] sm:$0xff] }
  0xf9   : > { %v412_v33 = vmul.f32 %v680_v24, %v401_v30 }
  0xfb   : > { %v424_v36 = vadd.f32 %v422_v34, %v412_v33 }
  0xfc   : > { %v402_v37 = vld [vmem:[#allocation2 + $0x10] sm:$0xff] }
  0xfd   : > { %v433_v40 = vmul.f32 %v684_v26, %v402_v37  ;;  %v436_v41 = vadd.f32 %v434_v31, %v424_v36 }
  0xff   : > { %v435_v43 = vadd.f32 %v433_v40, %v423_v39  ;;  %v443_v44 = vadd.f32 %v685_v38, %v436_v41 }
 0x101   : > { %v442_v45 = vadd.f32 %v685_v38, %v435_v43  ;;  %445 = vst.msk [vmem:[#allocation2 + $0x10] sm:$0xff] %vm280_vm1, %v443_v44  ;;  %v509_v1 = vmul.f32 %v692_v54, %v443_v44 }
 0x103   : > { %444 = vst.msk [vmem:[#allocation2 + $0x8] sm:$0xff] %vm280_vm1, %v442_v45  ;;  %v508_v0 = vmul.f32 %v692_v54, %v442_v45 }
 0x108   : > { %v449_v49 = vld [vmem:[#allocation2 + $0x12] sm:$0xff] }
 0x109   : > { %v513_v61 = vmul.f32 %v689_v52, %v449_v49 }
 0x10a   : > { %v447_v55 = vld [vmem:[#allocation2 + $0xe] sm:$0xff]  ;;  %v446_v56 = vld [vmem:[#allocation2 + $0x6] sm:$0xff] }
 0x10b   : > { %v448_v57 = vld [vmem:[#allocation2 + $0xa] sm:$0xff]  ;;  %v490_v58 = vmul.f32 %v687_v48, %v447_v55  ;;  %v489_v59 = vmul.f32 %v686_v50, %v446_v56  ;;  %v523_v6 = vmul.f32 %v694_v62, %v513_v61 }
 0x10c   : > { %v512_v60 = vmul.f32 %v688_v51, %v448_v57 }
 0x10d   : > { %v499_v63 = vmul.f32 %v690_v53, %v490_v58  ;;  %v498_v2 = vmul.f32 %v690_v53, %v489_v59 }
 0x10e   : > { %v522_v5 = vmul.f32 %v694_v62, %v512_v60 }
 0x10f   : > { %v511_v3 = vadd.f32 %v509_v1, %v499_v63  ;;  %v510_v4 = vadd.f32 %v508_v0, %v498_v2 }
 0x111   : > { %v524_v8 = vadd.f32 %v522_v5, %v510_v4  ;;  %v525_v11 = vadd.f32 %v523_v6, %v511_v3 }
 0x113   : > { %v531_v12 = vadd.f32 %v695_v7, %v524_v8  ;;  %v532_v13 = vadd.f32 %v695_v7, %v525_v11 }
 0x115   : > { %v533_v14 = vpack.c.bf16 %v532_v13, %v531_v12 }
 0x117   : > { %741 = vmatmul.mubr.msk.bf16.vlgmr.msra.gmra.mxu1 %vm280_vm1, %v533_v14 }
 0x1d7   : > { %v594_v16 = vpop.f32.mrf.mxu1 }
 0x1d8   : > { %v595_v17 = vadd.f32 %v696_v15, %v594_v16 }
 0x1d9   : > { %v742_v18 = vpop.f32.mrf.mxu1 }
 0x1da   : > { %v601_v19 = vadd.f32 %v595_v17, %v868_v9 }
 0x1db   : > { %v597_v20 = vpop.f32.mrf.mxu1 }
 0x1dc   : > { %v603_v21 = vmax.f32 %v601_v19, 0.0  ;;  %v598_v22 = vadd.f32 %v696_v15, %v597_v20 }
 0x1dd   : > { %v743_v23 = vpop.f32.mrf.mxu1 }
 0x1de   : > { %605 = vst [vmem:[%s278_s8] sm:$0xff] %v603_v21  ;;  %v602_v24 = vadd.f32 %v598_v22, %v870_v10 }
 0x1e0   : > { %v604_v25 = vmax.f32 %v602_v24, 0.0 }
 0x1e2   : > { %606 = vst [vmem:[%s278_s8 + $0x8] sm:$0xff] %v604_v25 }
 0x1e3 PF: > { %s17_s24 = sadd.s32 1, %s770_s24  }
 0x1e4   : > { %p14_p4 = scmp.ge.s32.totalorder %s17_s24, 4  }
 0x1e6   :  { %16 = sbr.rel (!%p14_p4) target bundleno = 1 (0x1), region = 82 }

// kernel: esfnet_forward.19
= control target key start
LH: loop header
LB: loop body
LE: loop exit
PB: predicated region body
PF: predicated region fallthrough
CT: control target
= control target key end

     0   :  { %s816_s24 = smov 0   ;;  %s923_s0 = inlined_call_operand.vmem [shape: f32[2,16,128], index: 0, kind: input, shape index: {}]   ;;  %s924_s1 = inlined_call_operand.vmem [shape: bf16[128,32], index: 1, kind: input, shape index: {}]   ;;  %s925_s2 = inlined_call_operand.vmem [shape: f32[3,32], index: 2, kind: input, shape index: {}]   ;;  %s926_s3 = inlined_call_operand.vmem [shape: f32[3,1,32], index: 3, kind: input, shape index: {}]   ;;  %s927_s4 = inlined_call_operand.vmem [shape: f32[3,1,32], index: 4, kind: input, shape index: {}]   ;;  %s928_s5 = inlined_call_operand.vmem [shape: bf16[32,128], index: 5, kind: input, shape index: {}]   ;;  %s929_s6 = inlined_call_operand.vmem [shape: f32[1,128], index: 6, kind: input, shape index: {}]   ;;  %s930_s7 = inlined_call_operand.vmem [shape: f32[2,16,128], index: 7, kind: output, shape index: {}]  }
   0x1 LB: > { %s668_s25 = sadd.s32 4294967295, %s772_s24   ;;  %p672_p0 = scmp.ge.s32.totalorder %s772_s24, 1  ;;  %s772_s24 = sphi %s816_s24, %s17_s24  }
   0x2   : > { %p237_p1 = scmp.lt.s32.totalorder %s772_s24, 3 }
   0x4   : > { %p238_p2 = pnand %p672_p0, %p237_p1 }
   0x5   : > { %p269_p3 = scmp.lt.s32.totalorder (!%p238_p2), %s668_s25, 1 }
   0x6   : > { %241 = sbr.rel (%p238_p2) target bundleno = 475 (0x1db), region = 48 }
   0xb   : > { %v756_v0 = vld [vmem:[%s924_s1 + $0x38] sm:$0xff]   ;;  %v774_v1 = vmov 0.0   ;;  %v757_v2 = vld [vmem:[%s924_s1 + $0x30] sm:$0xff]   ;;  %vm775_vm0 = vmmov 0   ;;  %vm280_vm1 = vcmask 261120   ;;  %v758_v3 = vld [vmem:[%s924_s1 + $0x28] sm:$0xff]  }
   0xc   : > { %718 = vmatprep.subr.bf16.mxu0 %v774_v1  ;;  %738 = vmatprep.subr.bf16.mxu1 %v774_v1  ;;  %281 = vst.msk [vmem:[#allocation2] sm:$0xff] %vm280_vm1, %v774_v1  ;;  %284 = vst.msk [vmem:[#allocation2 + $0x18] sm:$0xff] %vm280_vm1, %v774_v1  ;;  %v759_v4 = vld [vmem:[%s924_s1 + $0x20] sm:$0xff]   ;;  %v760_v5 = vld [vmem:[%s924_s1 + $0x18] sm:$0xff]   ;;  %s932_s25 = smov (!%p269_p3, %s668_s25), 1 }
   0xd   : > { %719 = vmatpush3.bf16.msra.mxu0 %v756_v0  ;;  %734 = vmatprep.mubr.msk.bf16.mxu0 %vm775_vm0, %v774_v1  ;;  %287 = vst.msk [vmem:[#allocation2 + $0x40] sm:$0xff] %vm280_vm1, %v774_v1  ;;  %282 = vst.msk [vmem:[#allocation2 + $0x8] sm:$0xff] %vm280_vm1, %v774_v1  ;;  %v761_v6 = vld [vmem:[%s924_s1 + $0x10] sm:$0xff]   ;;  %s704_s15 = sshll.u32 %s932_s25, 4  ;;  %v762_v7 = vld [vmem:[%s924_s1 + $0x8] sm:$0xff]  }
   0xe   : > { %720 = vmatprep.subr.bf16.mxu0 %v774_v1  ;;  %742 = vmatprep.mubr.msk.bf16.mxu1 %vm775_vm0, %v774_v1  ;;  %285 = vst.msk [vmem:[#allocation2 + $0x30] sm:$0xff] %vm280_vm1, %v774_v1  ;;  %288 = vst.msk [vmem:[#allocation2 + $0x48] sm:$0xff] %vm280_vm1, %v774_v1  ;;  %s273_s20 = scalar_lea.vmem %s923_s0, %s704_s15  ;;  %v763_v8 = vld [vmem:[%s924_s1] sm:$0xff]   ;;  %v764_v12 = vld [vmem:[%s928_s5 + $0x8] sm:$0xff]   ;;  %s278_s8 = scalar_lea.vmem %s930_s7, %s704_s15 }
   0xf   : > { %v866_v9 = vld [vmem:[%s273_s20] sm:$0xff]  ;;  %v868_v10 = vld [vmem:[%s273_s20 + $0x8] sm:$0xff]  ;;  %739 = vmatpush3.bf16.msra.mxu1 %v764_v12 }
  0x10   : > { %v291_v11 = vpack.c.bf16 %v868_v10, %v866_v9  ;;  %v765_v13 = vld [vmem:[%s928_s5] sm:$0xff]   ;;  %740 = vmatprep.subr.bf16.mxu1 %v774_v1 }
  0x11   : > { %721 = vmatpush3.bf16.msra.mxu0 %v757_v2  ;;  %v677_v14 = vld [vmem:[%s925_s2] ss:$0 sm:$0xff]  ;;  %v688_v20 = vld [vmem:[%s926_s3 + $0x1] ss:$0 sm:$0xff]  ;;  %v690_v21 = vld [vmem:[%s926_s3 + $0x2] ss:$0 sm:$0xff] }
  0x12   : > { %722 = vmatprep.subr.bf16.mxu0 %v774_v1  ;;  %v686_v17 = vld [vmem:[%s926_s3] ss:$0 sm:$0xff]  ;;  %v691_v35 = vld [vmem:[%s925_s2 + $0x1] ss:$0 sm:$0xff]  ;;  %v696_v50 = vld [vmem:[%s927_s4 + $0x2] ss:$0 sm:$0xff] }
  0x13   : > { %741 = vmatpush3.bf16.msra.mxu1 %v765_v13  ;;  %v406_v16 = vld [vmem:[#allocation2] sm:$0xff]  ;;  %v452_v42 = vld [vmem:[#allocation2 + $0x18] sm:$0xff] }
  0x14   : > { %v408_v19 = vld [vmem:[#allocation2 + $0x40] sm:$0xff]  ;;  %v417_v24 = vmul.f32 %v686_v17, %v406_v16  ;;  %v407_v26 = vld [vmem:[#allocation2 + $0x8] sm:$0xff]  ;;  %v495_v45 = vmul.f32 0.0, %v452_v42 }
  0x15   : > { %723 = vmatpush3.bf16.msra.mxu0 %v758_v3  ;;  %v439_v28 = vmul.f32 %v690_v21, %v408_v19  ;;  %v409_v30 = vld [vmem:[#allocation2 + $0x48] sm:$0xff]  ;;  %v418_v34 = vmul.f32 %v686_v17, %v407_v26  ;;  %v455_v44 = vld [vmem:[#allocation2 + $0x30] sm:$0xff]  ;;  %v692_v46 = vld [vmem:[%s927_s4] ss:$0 sm:$0xff] }
  0x16   : > { %724 = vmatprep.subr.bf16.mxu0 %v774_v1  ;;  %v440_v38 = vmul.f32 %v690_v21, %v409_v30  ;;  %v519_v47 = vmul.f32 0.0, %v455_v44  ;;  %v694_v48 = vld [vmem:[%s927_s4 + $0x1] ss:$0 sm:$0xff]  ;;  %v504_v52 = vmul.f32 %v692_v46, %v495_v45  ;;  %v697_v63 = vld [vmem:[%s925_s2 + $0x2] ss:$0 sm:$0xff] }
  0x18   : > { %v529_v56 = vmul.f32 %v696_v50, %v519_v47 }
  0x19   : > { %725 = vmatpush3.bf16.msra.mxu0 %v759_v4  ;;  %v698_v4 = vld [vmem:[%s929_s6] ss:$0 sm:$0xff] }
  0x1a   : > { %726 = vmatprep.subr.bf16.mxu0 %v774_v1 }
  0x1d   : > { %727 = vmatpush3.bf16.msra.mxu0 %v760_v5 }
  0x1e   : > { %728 = vmatprep.subr.bf16.mxu0 %v774_v1 }
  0x21   : > { %729 = vmatpush3.bf16.msra.mxu0 %v761_v6 }
  0x22   : > { %730 = vmatprep.subr.bf16.mxu0 %v774_v1 }
  0x25   : > { %731 = vmatpush3.bf16.msra.mxu0 %v762_v7 }
  0x26   : > { %732 = vmatprep.subr.bf16.mxu0 %v774_v1 }
  0x29   : > { %733 = vmatpush3.bf16.msra.mxu0 %v763_v8 }
  0x2c   : > { %735 = vmatmul.mubr.bf16.vlgmr.msra.gmra.mxu0 %v291_v11 }
  0xec   : > { %v395_v15 = vpop.f32.mrf.mxu0 }
  0xed   : > { %v396_v18 = vadd.f32 %v677_v14, %v395_v15 }
  0xee   : > { %v736_v22 = vpop.f32.mrf.mxu0 }
  0xef   : > { %v402_v23 = vmax.f32 %v396_v18, 0.0 }
  0xf0   : > { %v398_v25 = vpop.f32.mrf.mxu0 }
  0xf1   : > { %404 = vst.msk [vmem:[#allocation2 + $0x20] sm:$0xff] %vm280_vm1, %v402_v23  ;;  %v427_v27 = vmul.f32 %v688_v20, %v402_v23  ;;  %v399_v29 = vadd.f32 %v677_v14, %v398_v25 }
  0xf2   : > { %v737_v31 = vpop.f32.mrf.mxu0 }
  0xf3   : > { %v429_v32 = vadd.f32 %v427_v27, %v417_v24  ;;  %v403_v33 = vmax.f32 %v399_v29, 0.0 }
  0xf5   : > { %v441_v36 = vadd.f32 %v439_v28, %v429_v32  ;;  %405 = vst.msk [vmem:[#allocation2 + $0x28] sm:$0xff] %vm280_vm1, %v403_v33  ;;  %v428_v37 = vmul.f32 %v688_v20, %v403_v33 }
  0xf7   : > { %v448_v39 = vadd.f32 %v691_v35, %v441_v36  ;;  %v430_v40 = vadd.f32 %v428_v37, %v418_v34 }
  0xf9   : > { %450 = vst.msk [vmem:[#allocation2 + $0x20] sm:$0xff] %vm280_vm1, %v448_v39  ;;  %v442_v41 = vadd.f32 %v440_v38, %v430_v40  ;;  %v514_v53 = vmul.f32 %v694_v48, %v448_v39 }
  0xfb   : > { %v449_v43 = vadd.f32 %v691_v35, %v442_v41  ;;  %v516_v60 = vadd.f32 %v514_v53, %v504_v52 }
  0xfd   : > { %451 = vst.msk [vmem:[#allocation2 + $0x28] sm:$0xff] %vm280_vm1, %v449_v43  ;;  %v515_v55 = vmul.f32 %v694_v48, %v449_v43 }
 0x100   : > { %v453_v49 = vld [vmem:[#allocation2 + $0x20] sm:$0xff] }
 0x101   : > { %v496_v51 = vmul.f32 0.0, %v453_v49 }
 0x103   : > { %v505_v54 = vmul.f32 %v692_v46, %v496_v51 }
 0x104   : > { %v454_v57 = vld [vmem:[#allocation2 + $0x28] sm:$0xff] }
 0x105   : > { %v517_v58 = vadd.f32 %v515_v55, %v505_v54  ;;  %v518_v59 = vmul.f32 0.0, %v454_v57 }
 0x107   : > { %v528_v61 = vmul.f32 %v696_v50, %v518_v59  ;;  %v531_v62 = vadd.f32 %v529_v56, %v517_v58 }
 0x109   : > { %v530_v0 = vadd.f32 %v528_v61, %v516_v60  ;;  %v538_v2 = vadd.f32 %v697_v63, %v531_v62 }
 0x10b   : > { %v537_v1 = vadd.f32 %v697_v63, %v530_v0 }
 0x10d   : > { %v539_v3 = vpack.c.bf16 %v538_v2, %v537_v1 }
 0x10f   : > { %743 = vmatmul.mubr.msk.bf16.vlgmr.msra.gmra.mxu1 %vm280_vm1, %v539_v3 }
 0x1cf   : > { %v600_v5 = vpop.f32.mrf.mxu1 }
 0x1d0   : > { %v601_v6 = vadd.f32 %v698_v4, %v600_v5 }
 0x1d1   : > { %v744_v7 = vpop.f32.mrf.mxu1 }
 0x1d2   : > { %v607_v8 = vadd.f32 %v601_v6, %v866_v9 }
 0x1d3   : > { %v603_v11 = vpop.f32.mrf.mxu1 }
 0x1d4   : > { %v609_v12 = vmax.f32 %v607_v8, 0.0  ;;  %v604_v13 = vadd.f32 %v698_v4, %v603_v11 }
 0x1d5   : > { %v745_v14 = vpop.f32.mrf.mxu1 }
 0x1d6   : > { %611 = vst [vmem:[%s278_s8] sm:$0xff] %v609_v12  ;;  %v608_v15 = vadd.f32 %v604_v13, %v868_v10 }
 0x1d8   : > { %v610_v16 = vmax.f32 %v608_v15, 0.0 }
 0x1da   : > { %612 = vst [vmem:[%s278_s8 + $0x8] sm:$0xff] %v610_v16 }
 0x1db PF: > { %s17_s24 = sadd.s32 1, %s772_s24  }
 0x1dc   : > { %p14_p4 = scmp.ge.s32.totalorder %s17_s24, 4  }
 0x1de   :  { %16 = sbr.rel (!%p14_p4) target bundleno = 1 (0x1), region = 82 }

// kernel: esfnet_forward.16
= control target key start
LH: loop header
LB: loop body
LE: loop exit
PB: predicated region body
PF: predicated region fallthrough
CT: control target
= control target key end

     0   :  { %s1159_s21 = smov 0   ;;  %s1349_s0 = inlined_call_operand.vmem [shape: bf16[32,576], index: 0, kind: input, shape index: {}]   ;;  %s1350_s1 = inlined_call_operand.vmem [shape: bf16[576,128], index: 1, kind: input, shape index: {}]   ;;  %s1351_s2 = inlined_call_operand.vmem [shape: f32[1,128], index: 2, kind: input, shape index: {}]   ;;  %s1352_s3 = inlined_call_operand.vmem [shape: f32[1,64], index: 3, kind: input, shape index: {}]   ;;  %s1353_s4 = inlined_call_operand.vmem [shape: f32[1,64], index: 4, kind: input, shape index: {}]   ;;  %s1354_s5 = inlined_call_operand.vmem [shape: bf16[64,128], index: 5, kind: input, shape index: {}]   ;;  %s1355_s6 = inlined_call_operand.vmem [shape: f32[32,128], index: 6, kind: output, shape index: {}]  }
   0x1 LB: > { %s917_s22 = sadd.s32 4294967295, %s1119_s21   ;;  %p921_p0 = scmp.ge.s32.totalorder %s1119_s21, 1  ;;  %s1119_s21 = sphi %s1159_s21, %s16_s21  }
   0x2   : > { %p214_p1 = scmp.lt.s32.totalorder %s1119_s21, 3 }
   0x4   : > { %p215_p2 = pnand %p921_p0, %p214_p1 }
   0x5   : > { %s922_s23 = sshll.u32 (!%p215_p2), %s917_s22, 1  ;;  %s1121_s18 = smov (!%p215_p2), 64  }
   0x6   : > { %218 = sbr.rel (%p215_p2) target bundleno = 361 (0x169), region = 44  ;;  %p246_p3 = scmp.lt.s32.totalorder (!%p215_p2), %s922_s23, 3 }
   0xb   : > { %v1068_v0 = vld [vmem:[%s1350_s1 + $0x78] sm:$0xff]   ;;  %s1357_s23 = smov (!%p246_p3, %s922_s23), 3  ;;  %v1070_v2 = vld [vmem:[%s1350_s1 + $0x70] sm:$0xff]   ;;  %v1072_v4 = vld [vmem:[%s1350_s1 + $0x68] sm:$0xff]   ;;  %v1122_v37 = vmov 0.0   ;;  %vm1123_vm0 = vmmov 0  }
   0xc   : > { %v1069_v1 = vld [vmem:[%s1350_s1 + $0x38] sm:$0xff]   ;;  %978 = vmatprep.subr.bf16.mxu0 %v1068_v0  ;;  %v1071_v3 = vld [vmem:[%s1350_s1 + $0x30] sm:$0xff]   ;;  %s1056_s8 = smul.u32 20, %s1357_s23  ;;  %v1073_v5 = vld [vmem:[%s1350_s1 + $0x28] sm:$0xff]   ;;  %vm585_vm1 = vcmask 523264   ;;  %s925_s29 = sshll.u32 %s1357_s23, 3 }
   0xd   : > { %979 = vmatpush3.bf16.msra.mxu0 %v1069_v1  ;;  %v1074_v6 = vld [vmem:[%s1350_s1 + $0xf8] sm:$0xff]   ;;  %v1076_v13 = vld [vmem:[%s1350_s1 + $0x60] sm:$0xff]   ;;  %v1078_v16 = vld [vmem:[%s1350_s1 + $0xf0] sm:$0xff]  }
   0xe   : > { %980 = vmatprep.subr.bf16.mxu0 %v1070_v2  ;;  %s1191_s15 = scalar_lea.vmem %s1349_s0, %s1056_s8  ;;  %v1075_v11 = vld [vmem:[%s1350_s1 + $0xb8] sm:$0xff]   ;;  %1000 = vmatprep.subr.bf16.mxu1 %v1074_v6  ;;  %v1077_v15 = vld [vmem:[%s1350_s1 + $0x20] sm:$0xff]   ;;  %v1079_v17 = vld [vmem:[%s1350_s1 + $0xb0] sm:$0xff]   ;;  %s256_s8 = scalar_lea.vmem %s1355_s6, %s925_s29 }
   0xf   : > { %v1197_v7 = vld [vmem:[%s1191_s15] sm:$0xff]  ;;  %v1200_v8 = vld [vmem:[%s1191_s15 + $0x14] sm:$0xff]  ;;  %v1203_v9 = vld [vmem:[%s1191_s15 + $0x8] sm:$0xff]  ;;  %1001 = vmatpush3.bf16.msra.mxu1 %v1075_v11 }
  0x10   : > { %714 = vrot.lane.b32.xlu0 %v1197_v7, %s1121_s18  ;;  %736 = vrot.lane.b32.xlu1 %v1203_v9, %s1121_s18  ;;  %v1208_v10 = vld [vmem:[%s1191_s15 + $0x1c] sm:$0xff]  ;;  %v928_v12 = vcombine.high %v1197_v7, %v1200_v8  ;;  %v1082_v20 = vld [vmem:[%s1350_s1 + $0xe8] sm:$0xff]   ;;  %v927_v34 = vcombine.low %v1197_v7, %v1200_v8  ;;  %v722_v52 = vrot.slane %v1197_v7, 4  ;;  %v723_v57 = vrot.slane %v1200_v8, 4 }
  0x11   : > { %981 = vmatpush3.bf16.msra.mxu0 %v1071_v3  ;;  %v930_v14 = vcombine.high %v1203_v9, %v1208_v10  ;;  %1002 = vmatprep.subr.bf16.mxu1 %v1078_v16  ;;  %v1080_v18 = vld [vmem:[%s1350_s1 + $0x58] sm:$0xff]   ;;  %v1083_v21 = vld [vmem:[%s1350_s1 + $0xa8] sm:$0xff]   ;;  %v1084_v22 = vld [vmem:[%s1350_s1 + $0x50] sm:$0xff]   ;;  %v929_v43 = vcombine.low %v1203_v9, %v1208_v10  ;;  %v744_v1 = vrot.slane %v1203_v9, 4 }
  0x12   : > { %982 = vmatprep.subr.bf16.mxu0 %v1072_v4  ;;  %621 = vmatprep.mubr.bf16.mxu0 %v928_v12  ;;  %v1081_v19 = vld [vmem:[%s1350_s1 + $0x18] sm:$0xff]   ;;  %v1085_v23 = vld [vmem:[%s1350_s1 + $0x10] sm:$0xff]   ;;  %v1086_v24 = vld [vmem:[%s1350_s1 + $0xe0] sm:$0xff]  }
  0x13   : > { %662 = vmatprep.mubr.bf16.mxu1 %v930_v14  ;;  %1003 = vmatpush3.bf16.msra.mxu1 %v1079_v17  ;;  %v1087_v25 = vld [vmem:[%s1350_s1 + $0xa0] sm:$0xff]   ;;  %v1088_v26 = vld [vmem:[%s1350_s1 + $0x48] sm:$0xff]   ;;  %v1090_v28 = vld [vmem:[%s1350_s1 + $0xd8] sm:$0xff]  }
  0x14   : > { %716 = vrot.lane.b32.xlu0 %v1200_v8, %s1121_s18  ;;  %738 = vrot.lane.b32.xlu1 %v1208_v10, %s1121_s18  ;;  %v1089_v27 = vld [vmem:[%s1350_s1 + $0x8] sm:$0xff]   ;;  %v1091_v29 = vld [vmem:[%s1350_s1 + $0x98] sm:$0xff]  }
  0x15   : > { %983 = vmatpush3.bf16.msra.mxu0 %v1073_v5  ;;  %1004 = vmatprep.subr.bf16.mxu1 %v1082_v20  ;;  %v1092_v30 = vld [vmem:[%s1350_s1 + $0x40] sm:$0xff]   ;;  %v1094_v32 = vld [vmem:[%s1350_s1 + $0xd0] sm:$0xff]   ;;  %v1098_v35 = vld [vmem:[%s1350_s1 + $0x118] sm:$0xff]  }
  0x16   : > { %984 = vmatprep.subr.bf16.mxu0 %v1076_v13  ;;  %v1093_v31 = vld [vmem:[%s1350_s1] sm:$0xff]   ;;  %v1095_v33 = vld [vmem:[%s1350_s1 + $0x90] sm:$0xff]   ;;  %v1099_v36 = vld [vmem:[%s1350_s1 + $0xc8] sm:$0xff]  }
  0x17   : > { %1005 = vmatpush3.bf16.msra.mxu1 %v1083_v21  ;;  %v1100_v38 = vld [vmem:[%s1350_s1 + $0x88] sm:$0xff]   ;;  %v1101_v39 = vld [vmem:[%s1350_s1 + $0x110] sm:$0xff]   ;;  %v1102_v40 = vld [vmem:[%s1350_s1 + $0xc0] sm:$0xff]  }
  0x18   : > { %1006 = vmatprep.subr.bf16.mxu1 %v1086_v24  ;;  %v1103_v41 = vld [vmem:[%s1350_s1 + $0x80] sm:$0xff]   ;;  %v1105_v42 = vld [vmem:[%s1350_s1 + $0x108] sm:$0xff]   ;;  %v1109_v44 = vld [vmem:[%s1354_s5 + $0x18] sm:$0xff]  }
  0x19   : > { %985 = vmatpush3.bf16.msra.mxu0 %v1077_v15  ;;  %v261_v45 = vld [vmem:[%s1191_s15 + $0x10] sm:$0xf]  ;;  %v1107_v46 = vld [vmem:[%s1350_s1 + $0x100] sm:$0xff]   ;;  %v1111_v50 = vld [vmem:[%s1354_s5 + $0x8] sm:$0xff]  }
  0x1a   : > { %986 = vmatprep.subr.bf16.mxu0 %v1080_v18  ;;  %v264_v47 = vld [vmem:[%s1191_s15 + $0x24] sm:$0xf]  ;;  %v1110_v48 = vld [vmem:[%s1354_s5 + $0x10] sm:$0xff]   ;;  %v969_v16 = vld [vmem:[%s1352_s3] ss:$0 sm:$0xff] }
  0x1b   : > { %1007 = vmatpush3.bf16.msra.mxu1 %v1087_v25  ;;  %v931_v49 = vcombine.low %v261_v45, %v264_v47  ;;  %v1112_v51 = vld [vmem:[%s1354_s5] sm:$0xff]  }
  0x1c   : > { %1008 = vmatprep.subr.bf16.mxu1 %v1090_v28  ;;  %v970_v20 = vld [vmem:[%s1353_s4] ss:$0 sm:$0xff] }
  0x1d   : > { %987 = vmatpush3.bf16.msra.mxu0 %v1081_v19 }
  0x1e   : > { %988 = vmatprep.subr.bf16.mxu0 %v1084_v22 }
  0x1f   : > { %1009 = vmatpush3.bf16.msra.mxu1 %v1091_v29 }
  0x20   : > { %1010 = vmatprep.subr.bf16.mxu1 %v1094_v32 }
  0x21   : > { %989 = vmatpush3.bf16.msra.mxu0 %v1085_v23 }
  0x22   : > { %990 = vmatprep.subr.bf16.mxu0 %v1088_v26 }
  0x23   : > { %1011 = vmatpush3.bf16.msra.mxu1 %v1095_v33 }
  0x24   : > { %1012 = vmatprep.subr.bf16.mxu1 %v1099_v36 }
  0x25   : > { %991 = vmatpush3.bf16.msra.mxu0 %v1089_v27 }
  0x26   : > { %992 = vmatprep.subr.bf16.mxu0 %v1092_v30 }
  0x27   : > { %1013 = vmatpush3.bf16.msra.mxu1 %v1100_v38 }
  0x28   : > { %1014 = vmatprep.subr.bf16.mxu1 %v1102_v40 }
  0x29   : > { %993 = vmatpush3.bf16.msra.mxu0 %v1093_v31  ;;  %v926_v31 = vld [vmem:[%s1351_s2] ss:$0 sm:$0xff] }
  0x2a   : > { %1032 = vmatprep.subr.bf16.mxu0 %v1122_v37 }
  0x2b   : > { %1015 = vmatpush3.bf16.msra.mxu1 %v1103_v41 }
  0x2c   : > { %622 = vmatmul.mubr.bf16.vlgmr.msra.gmra.mxu0 %v927_v34  ;;  %1044 = vmatprep.subr.bf16.mxu1 %v1122_v37 }
  0x2d   : > { %1033 = vmatpush3.bf16.msra.mxu0 %v1098_v35  ;;  %1040 = vmatprep.mubr.msk.bf16.mxu0 %vm1123_vm0, %v1122_v37 }
  0x2e   : > { %1034 = vmatprep.subr.bf16.mxu0 %v1122_v37  ;;  %663 = vmatmul.mubr.bf16.vlgmr.msra.gmra.mxu1 %v929_v43 }
  0x2f   : > { %1045 = vmatpush3.bf16.msra.mxu1 %v1109_v44  ;;  %1052 = vmatprep.mubr.msk.bf16.mxu1 %vm1123_vm0, %v1122_v37 }
  0x30   : > { %1046 = vmatprep.subr.bf16.mxu1 %v1122_v37 }
  0x31   : > { %1035 = vmatpush3.bf16.msra.mxu0 %v1101_v39 }
  0x32   : > { %1036 = vmatprep.subr.bf16.mxu0 %v1122_v37 }
  0x33   : > { %1047 = vmatpush3.bf16.msra.mxu1 %v1110_v48 }
  0x34   : > { %1048 = vmatprep.subr.bf16.mxu1 %v1122_v37 }
  0x35   : > { %1037 = vmatpush3.bf16.msra.mxu0 %v1105_v42 }
  0x36   : > { %1038 = vmatprep.subr.bf16.mxu0 %v1122_v37 }
  0x37   : > { %1049 = vmatpush3.bf16.msra.mxu1 %v1111_v50 }
  0x38   : > { %1050 = vmatprep.subr.bf16.mxu1 %v1122_v37 }
  0x39   : > { %1039 = vmatpush3.bf16.msra.mxu0 %v1107_v46 }
  0x3b   : > { %1051 = vmatpush3.bf16.msra.mxu1 %v1112_v51 }
  0x3c   : > { %1041 = vmatmul.mubr.msk.bf16.vlgmr.msra.gmra.mxu0 %vm585_vm1, %v931_v49 }
  0x82   : > { %v715_v53 = vpop.permute.xlu0 %714  ;;  %v737_v59 = vpop.permute.xlu1 %736 }
  0x83   : > { %v720_v54 = vmax.bf16 %v715_v53, %v1197_v7  ;;  %v728_v56 = vrot.slane %v715_v53, 4  ;;  %v750_v6 = vrot.slane %v737_v59, 4  ;;  %v745_v7 = vrot.slane %v1208_v10, 4 }
  0x85   : > { %v726_v55 = vmax.bf16 %v722_v52, %v720_v54 }
  0x86   : > { %v717_v58 = vpop.permute.xlu0 %716  ;;  %v739_v4 = vpop.permute.xlu1 %738 }
  0x87   : > { %v732_v60 = vmax.bf16 %v728_v56, %v726_v55  ;;  %v721_v61 = vmax.bf16 %v717_v58, %v1200_v8  ;;  %v729_v63 = vrot.slane %v717_v58, 4  ;;  %v751_v8 = vrot.slane %v739_v4, 4 }
  0x89   : > { %v727_v62 = vmax.bf16 %v723_v57, %v721_v61  ;;  %v734_v0 = vmax.bf16 %v732_v60, %v1203_v9 }
  0x8b   : > { %v733_v2 = vmax.bf16 %v729_v63, %v727_v62  ;;  %v742_v3 = vmax.bf16 %v737_v59, %v734_v0 }
  0x8d   : > { %v748_v5 = vmax.bf16 %v744_v1, %v742_v3  ;;  %v735_v11 = vmax.bf16 %v733_v2, %v1208_v10 }
  0x8f   : > { %v754_v12 = vmax.bf16 %v750_v6, %v748_v5  ;;  %v743_v13 = vmax.bf16 %v739_v4, %v735_v11 }
  0x91   : > { %v756_v14 = vmax.bf16 %v754_v12, %v261_v45  ;;  %v749_v15 = vmax.bf16 %v745_v7, %v743_v13 }
  0x93   : > { %v758_v17 = vunpack.c.l.bf16 %v756_v14  ;;  %v755_v9 = vmax.bf16 %v751_v8, %v749_v15 }
  0x95   : > { %v757_v18 = vmax.bf16 %v755_v9, %v264_v47  ;;  %v767_v19 = vmul.f32 %v969_v16, %v758_v17 }
  0x97   : > { %v759_v21 = vunpack.c.l.bf16 %v757_v18  ;;  %v776_v10 = vadd.f32 %v970_v20, %v767_v19 }
  0x99   : > { %v768_v22 = vmul.f32 %v969_v16, %v759_v21  ;;  %v778_v24 = vmax.f32 %v776_v10, 0.0 }
  0x9b   : > { %v777_v23 = vadd.f32 %v970_v20, %v768_v22 }
  0x9d   : > { %v779_v25 = vmax.f32 %v777_v23, 0.0 }
  0x9f   : > { %v780_v26 = vpack.c.bf16 %v779_v25, %v778_v24 }
  0xa1   : > { %1053 = vmatmul.mubr.msk.bf16.vlgmr.msra.gmra.mxu1 %vm585_vm1, %v780_v26 }
  0xec   : > { %v994_v27 = vpop.f32.mrf.mxu0 }
  0xee   : > { %v995_v28 = vpop.f32.mrf.mxu0  ;;  %v1016_v34 = vpop.f32.mrf.mxu1 }
  0xef   : > { %v996_v29 = vadd.f32 %v995_v28, %v994_v27 }
  0xf0   : > { %v997_v30 = vpop.f32.mrf.mxu0  ;;  %v1017_v36 = vpop.f32.mrf.mxu1 }
  0xf1   : > { %v624_v35 = vadd.f32 %v996_v29, %v926_v31  ;;  %v1018_v37 = vadd.f32 %v1017_v36, %v1016_v34 }
  0xf2   : > { %v998_v32 = vpop.f32.mrf.mxu0  ;;  %v1019_v38 = vpop.f32.mrf.mxu1 }
  0xf3   : > { %v999_v33 = vadd.f32 %v998_v32, %v997_v30  ;;  %v665_v40 = vadd.f32 %v1018_v37, %v624_v35 }
  0xf4   : > { %v1020_v41 = vpop.f32.mrf.mxu1 }
  0xf5   : > { %v627_v39 = vadd.f32 %v999_v33, %v926_v31  ;;  %v1021_v42 = vadd.f32 %v1020_v41, %v1019_v38 }
  0xf7   : > { %v668_v45 = vadd.f32 %v1021_v42, %v627_v39 }
  0xfc   : > { %v705_v43 = vpop.f32.mrf.mxu0 }
  0xfd   : > { %v706_v44 = vadd.f32 %v705_v43, %v665_v40 }
  0xfe   : > { %v1042_v46 = vpop.f32.mrf.mxu0 }
  0xff   : > { %v712_v50 = vmax.f32 %v706_v44, 0.0 }
 0x100   : > { %v708_v47 = vpop.f32.mrf.mxu0 }
 0x101   : > { %v709_v48 = vadd.f32 %v708_v47, %v668_v45 }
 0x102   : > { %v1043_v49 = vpop.f32.mrf.mxu0 }
 0x103   : > { %v713_v54 = vmax.f32 %v709_v48, 0.0 }
 0x161   : > { %v850_v51 = vpop.f32.mrf.mxu1 }
 0x162   : > { %v857_v52 = vadd.f32 %v850_v51, %v712_v50 }
 0x163   : > { %v1054_v53 = vpop.f32.mrf.mxu1 }
 0x164   : > { %859 = vst [vmem:[%s256_s8] sm:$0xff] %v857_v52 }
 0x165   : > { %v853_v55 = vpop.f32.mrf.mxu1 }
 0x166   : > { %v858_v56 = vadd.f32 %v853_v55, %v713_v54 }
 0x167   : > { %v1055_v57 = vpop.f32.mrf.mxu1 }
 0x168   : > { %860 = vst [vmem:[%s256_s8 + $0x8] sm:$0xff] %v858_v56 }
 0x169 PF: > { %s16_s21 = sadd.s32 1, %s1119_s21  }
 0x16a   : > { %p13_p4 = scmp.ge.s32.totalorder %s16_s21, 4  }
 0x16c   :  { %15 = sbr.rel (!%p13_p4) target bundleno = 1 (0x1), region = 74 }

// kernel: esfnet_forward.20
= control target key start
LH: loop header
LB: loop body
LE: loop exit
PB: predicated region body
PF: predicated region fallthrough
CT: control target
= control target key end

     0   :  { %s824_s24 = smov 0   ;;  %s929_s0 = inlined_call_operand.vmem [shape: f32[2,16,128], index: 0, kind: input, shape index: {}]   ;;  %s930_s1 = inlined_call_operand.vmem [shape: bf16[128,32], index: 1, kind: input, shape index: {}]   ;;  %s931_s2 = inlined_call_operand.vmem [shape: f32[3,32], index: 2, kind: input, shape index: {}]   ;;  %s932_s3 = inlined_call_operand.vmem [shape: f32[3,1,32], index: 3, kind: input, shape index: {}]   ;;  %s933_s4 = inlined_call_operand.vmem [shape: f32[3,1,32], index: 4, kind: input, shape index: {}]   ;;  %s934_s5 = inlined_call_operand.vmem [shape: bf16[32,128], index: 5, kind: input, shape index: {}]   ;;  %s935_s6 = inlined_call_operand.vmem [shape: f32[1,128], index: 6, kind: input, shape index: {}]   ;;  %s936_s7 = inlined_call_operand.vmem [shape: f32[2,16,128], index: 7, kind: output, shape index: {}]  }
   0x1 LB: > { %s676_s25 = sadd.s32 4294967295, %s780_s24   ;;  %p680_p0 = scmp.ge.s32.totalorder %s780_s24, 1  ;;  %s780_s24 = sphi %s824_s24, %s17_s24  }
   0x2   : > { %p237_p1 = scmp.lt.s32.totalorder %s780_s24, 3 }
   0x4   : > { %p238_p2 = pnand %p680_p0, %p237_p1 }
   0x5   : > { %p269_p3 = scmp.lt.s32.totalorder (!%p238_p2), %s676_s25, 1 }
   0x6   : > { %241 = sbr.rel (%p238_p2) target bundleno = 467 (0x1d3), region = 48 }
   0xb   : > { %v764_v0 = vld [vmem:[%s930_s1 + $0x38] sm:$0xff]   ;;  %v782_v1 = vmov 0.0   ;;  %v765_v2 = vld [vmem:[%s930_s1 + $0x30] sm:$0xff]   ;;  %vm783_vm0 = vmmov 0   ;;  %vm280_vm1 = vcmask 261120   ;;  %v766_v3 = vld [vmem:[%s930_s1 + $0x28] sm:$0xff]  }
   0xc   : > { %726 = vmatprep.subr.bf16.mxu0 %v782_v1  ;;  %746 = vmatprep.subr.bf16.mxu1 %v782_v1  ;;  %281 = vst.msk [vmem:[#allocation2] sm:$0xff] %vm280_vm1, %v782_v1  ;;  %287 = vst.msk [vmem:[#allocation2 + $0x30] sm:$0xff] %vm280_vm1, %v782_v1  ;;  %v767_v4 = vld [vmem:[%s930_s1 + $0x20] sm:$0xff]   ;;  %v768_v5 = vld [vmem:[%s930_s1 + $0x18] sm:$0xff]   ;;  %s938_s25 = smov (!%p269_p3, %s676_s25), 1 }
   0xd   : > { %727 = vmatpush3.bf16.msra.mxu0 %v764_v0  ;;  %742 = vmatprep.mubr.msk.bf16.mxu0 %vm783_vm0, %v782_v1  ;;  %295 = vst.msk [vmem:[#allocation2 + $0x80] sm:$0xff] %vm280_vm1, %v782_v1  ;;  %282 = vst.msk [vmem:[#allocation2 + $0x8] sm:$0xff] %vm280_vm1, %v782_v1  ;;  %v769_v6 = vld [vmem:[%s930_s1 + $0x10] sm:$0xff]   ;;  %s712_s15 = sshll.u32 %s938_s25, 4  ;;  %v770_v7 = vld [vmem:[%s930_s1 + $0x8] sm:$0xff]  }
   0xe   : > { %728 = vmatprep.subr.bf16.mxu0 %v782_v1  ;;  %750 = vmatprep.mubr.msk.bf16.mxu1 %vm783_vm0, %v782_v1  ;;  %288 = vst.msk [vmem:[#allocation2 + $0x38] sm:$0xff] %vm280_vm1, %v782_v1  ;;  %289 = vst.msk [vmem:[#allocation2 + $0x50] sm:$0xff] %vm280_vm1, %v782_v1  ;;  %s273_s20 = scalar_lea.vmem %s929_s0, %s712_s15  ;;  %v771_v8 = vld [vmem:[%s930_s1] sm:$0xff]   ;;  %v772_v12 = vld [vmem:[%s934_s5 + $0x8] sm:$0xff]   ;;  %s278_s8 = scalar_lea.vmem %s936_s7, %s712_s15 }
   0xf   : > { %290 = vst.msk [vmem:[#allocation2 + $0x58] sm:$0xff] %vm280_vm1, %v782_v1  ;;  %296 = vst.msk [vmem:[#allocation2 + $0x88] sm:$0xff] %vm280_vm1, %v782_v1  ;;  %v876_v9 = vld [vmem:[%s273_s20] sm:$0xff]  ;;  %v878_v10 = vld [vmem:[%s273_s20 + $0x8] sm:$0xff]  ;;  %747 = vmatpush3.bf16.msra.mxu1 %v772_v12 }
  0x10   : > { %v299_v11 = vpack.c.bf16 %v878_v10, %v876_v9  ;;  %v773_v13 = vld [vmem:[%s934_s5] sm:$0xff]   ;;  %748 = vmatprep.subr.bf16.mxu1 %v782_v1 }
  0x11   : > { %729 = vmatpush3.bf16.msra.mxu0 %v765_v2  ;;  %v685_v14 = vld [vmem:[%s931_s2] ss:$0 sm:$0xff]  ;;  %v696_v20 = vld [vmem:[%s932_s3 + $0x1] ss:$0 sm:$0xff]  ;;  %v698_v21 = vld [vmem:[%s932_s3 + $0x2] ss:$0 sm:$0xff] }
  0x12   : > { %730 = vmatprep.subr.bf16.mxu0 %v782_v1  ;;  %v694_v17 = vld [vmem:[%s932_s3] ss:$0 sm:$0xff]  ;;  %v699_v38 = vld [vmem:[%s931_s2 + $0x1] ss:$0 sm:$0xff]  ;;  %v704_v51 = vld [vmem:[%s933_s4 + $0x2] ss:$0 sm:$0xff] }
  0x13   : > { %749 = vmatpush3.bf16.msra.mxu1 %v773_v13  ;;  %v414_v16 = vld [vmem:[#allocation2] sm:$0xff]  ;;  %v460_v25 = vld [vmem:[#allocation2 + $0x30] sm:$0xff] }
  0x14   : > { %v416_v19 = vld [vmem:[#allocation2 + $0x80] sm:$0xff]  ;;  %v425_v24 = vmul.f32 %v694_v17, %v414_v16  ;;  %v415_v27 = vld [vmem:[#allocation2 + $0x8] sm:$0xff]  ;;  %v503_v31 = vmul.f32 0.0, %v460_v25 }
  0x15   : > { %731 = vmatpush3.bf16.msra.mxu0 %v766_v3  ;;  %v447_v29 = vmul.f32 %v698_v21, %v416_v19  ;;  %v700_v35 = vld [vmem:[%s933_s4] ss:$0 sm:$0xff]  ;;  %v426_v37 = vmul.f32 %v694_v17, %v415_v27  ;;  %v461_v39 = vld [vmem:[#allocation2 + $0x38] sm:$0xff]  ;;  %v462_v40 = vld [vmem:[#allocation2 + $0x50] sm:$0xff] }
  0x16   : > { %732 = vmatprep.subr.bf16.mxu0 %v782_v1  ;;  %v417_v32 = vld [vmem:[#allocation2 + $0x88] sm:$0xff]  ;;  %v512_v44 = vmul.f32 %v700_v35, %v503_v31  ;;  %v702_v45 = vld [vmem:[%s933_s4 + $0x1] ss:$0 sm:$0xff]  ;;  %v463_v46 = vld [vmem:[#allocation2 + $0x58] sm:$0xff]  ;;  %v504_v49 = vmul.f32 0.0, %v461_v39  ;;  %v526_v50 = vmul.f32 0.0, %v462_v40 }
  0x17   : > { %v448_v43 = vmul.f32 %v698_v21, %v417_v32  ;;  %v527_v54 = vmul.f32 0.0, %v463_v46  ;;  %v705_v63 = vld [vmem:[%s931_s2 + $0x2] ss:$0 sm:$0xff] }
  0x18   : > { %v513_v57 = vmul.f32 %v700_v35, %v504_v49  ;;  %v536_v58 = vmul.f32 %v704_v51, %v526_v50 }
  0x19   : > { %733 = vmatpush3.bf16.msra.mxu0 %v767_v4  ;;  %v537_v60 = vmul.f32 %v704_v51, %v527_v54  ;;  %v706_v4 = vld [vmem:[%s935_s6] ss:$0 sm:$0xff] }
  0x1a   : > { %734 = vmatprep.subr.bf16.mxu0 %v782_v1 }
  0x1d   : > { %735 = vmatpush3.bf16.msra.mxu0 %v768_v5 }
  0x1e   : > { %736 = vmatprep.subr.bf16.mxu0 %v782_v1 }
  0x21   : > { %737 = vmatpush3.bf16.msra.mxu0 %v769_v6 }
  0x22   : > { %738 = vmatprep.subr.bf16.mxu0 %v782_v1 }
  0x25   : > { %739 = vmatpush3.bf16.msra.mxu0 %v770_v7 }
  0x26   : > { %740 = vmatprep.subr.bf16.mxu0 %v782_v1 }
  0x29   : > { %741 = vmatpush3.bf16.msra.mxu0 %v771_v8 }
  0x2c   : > { %743 = vmatmul.mubr.bf16.vlgmr.msra.gmra.mxu0 %v299_v11 }
  0xec   : > { %v403_v15 = vpop.f32.mrf.mxu0 }
  0xed   : > { %v404_v18 = vadd.f32 %v685_v14, %v403_v15 }
  0xee   : > { %v744_v22 = vpop.f32.mrf.mxu0 }
  0xef   : > { %v410_v23 = vmax.f32 %v404_v18, 0.0 }
  0xf0   : > { %v406_v26 = vpop.f32.mrf.mxu0 }
  0xf1   : > { %v435_v28 = vmul.f32 %v696_v20, %v410_v23  ;;  %v407_v30 = vadd.f32 %v685_v14, %v406_v26 }
  0xf2   : > { %v745_v33 = vpop.f32.mrf.mxu0 }
  0xf3   : > { %v437_v34 = vadd.f32 %v435_v28, %v425_v24  ;;  %v411_v36 = vmax.f32 %v407_v30, 0.0 }
  0xf5   : > { %v449_v41 = vadd.f32 %v447_v29, %v437_v34  ;;  %v436_v42 = vmul.f32 %v696_v20, %v411_v36 }
  0xf7   : > { %v456_v47 = vadd.f32 %v699_v38, %v449_v41  ;;  %v438_v48 = vadd.f32 %v436_v42, %v426_v37 }
  0xf9   : > { %v522_v52 = vmul.f32 %v702_v45, %v456_v47  ;;  %v450_v53 = vadd.f32 %v448_v43, %v438_v48 }
  0xfb   : > { %v524_v55 = vadd.f32 %v522_v52, %v512_v44  ;;  %v457_v56 = vadd.f32 %v699_v38, %v450_v53 }
  0xfd   : > { %v523_v59 = vmul.f32 %v702_v45, %v457_v56  ;;  %v538_v62 = vadd.f32 %v536_v58, %v524_v55 }
  0xff   : > { %v525_v61 = vadd.f32 %v523_v59, %v513_v57  ;;  %v545_v1 = vadd.f32 %v705_v63, %v538_v62 }
 0x101   : > { %v539_v0 = vadd.f32 %v537_v60, %v525_v61 }
 0x103   : > { %v546_v2 = vadd.f32 %v705_v63, %v539_v0 }
 0x105   : > { %v547_v3 = vpack.c.bf16 %v546_v2, %v545_v1 }
 0x107   : > { %751 = vmatmul.mubr.msk.bf16.vlgmr.msra.gmra.mxu1 %vm280_vm1, %v547_v3 }
 0x1c7   : > { %v608_v5 = vpop.f32.mrf.mxu1 }
 0x1c8   : > { %v609_v6 = vadd.f32 %v706_v4, %v608_v5 }
 0x1c9   : > { %v752_v7 = vpop.f32.mrf.mxu1 }
 0x1ca   : > { %v615_v8 = vadd.f32 %v609_v6, %v876_v9 }
 0x1cb   : > { %v611_v11 = vpop.f32.mrf.mxu1 }
 0x1cc   : > { %v617_v12 = vmax.f32 %v615_v8, 0.0  ;;  %v612_v13 = vadd.f32 %v706_v4, %v611_v11 }
 0x1cd   : > { %v753_v14 = vpop.f32.mrf.mxu1 }
 0x1ce   : > { %619 = vst [vmem:[%s278_s8] sm:$0xff] %v617_v12  ;;  %v616_v15 = vadd.f32 %v612_v13, %v878_v10 }
 0x1d0   : > { %v618_v16 = vmax.f32 %v616_v15, 0.0 }
 0x1d2   : > { %620 = vst [vmem:[%s278_s8 + $0x8] sm:$0xff] %v618_v16 }
 0x1d3 PF: > { %s17_s24 = sadd.s32 1, %s780_s24  }
 0x1d4   : > { %p14_p4 = scmp.ge.s32.totalorder %s17_s24, 4  }
 0x1d6   :  { %16 = sbr.rel (!%p14_p4) target bundleno = 1 (0x1), region = 82 }

// kernel: esfnet_forward.21
= control target key start
LH: loop header
LB: loop body
LE: loop exit
PB: predicated region body
PF: predicated region fallthrough
CT: control target
= control target key end

     0   :  { %s653_s12 = smov 0   ;;  %s723_s0 = inlined_call_operand.vmem [shape: f32[2,128,16], index: 0, kind: input, shape index: {}]   ;;  %s724_s1 = inlined_call_operand.vmem [shape: bf16[2,128], index: 1, kind: input, shape index: {}]   ;;  %s725_s2 = inlined_call_operand.vmem [shape: bf16[16,1024], index: 2, kind: input, shape index: {}]   ;;  %s726_s3 = inlined_call_operand.vmem [shape: f32[2,2,1024], index: 3, kind: output, shape index: {}]  }
   0x1 LB: > { %s555_s13 = sadd.s32 4294967295, %s627_s12   ;;  %p559_p0 = scmp.ge.s32.totalorder %s627_s12, 1  ;;  %s627_s12 = sphi %s653_s12, %s13_s12  }
   0x2   : > { %p137_p1 = scmp.lt.s32.totalorder %s627_s12, 3 }
   0x4   : > { %p138_p2 = pnand %p559_p0, %p137_p1 }
   0x5   : > { %p161_p3 = scmp.lt.s32.totalorder (!%p138_p2), %s555_s13, 1 }
   0x6   : > { %141 = sbr.rel (%p138_p2) target bundleno = 469 (0x1d5), region = 32 }
   0xb   : > { %v238_v0 = vld [vmem:[%s725_s2] sm:$0xff]  ;;  %v629_v1 = vmov 0.0   ;;  %vm630_vm0 = vmmov 0   ;;  %s728_s13 = smov (!%p161_p3, %s555_s13), 1  ;;  %v631_v30 = vmov 0   ;;  %v239_v31 = vld [vmem:[%s725_s2 + $0x8] sm:$0xff]  ;;  %v467_v51 = vlaneseq }
   0xc   : > { %589 = vmatprep.subr.bf16.mxu0 %v629_v1  ;;  %605 = vmatprep.mubr.msk.bf16.mxu0 %vm630_vm0, %v629_v1  ;;  %v242_v2 = vld [vmem:[%s725_s2 + $0x20] sm:$0xff]  ;;  %s578_s18 = sshll.u32 %s728_s13, 7  ;;  %v243_v32 = vld [vmem:[%s725_s2 + $0x28] sm:$0xff]  ;;  %v240_v35 = vld [vmem:[%s725_s2 + $0x10] sm:$0xff]  ;;  %vm286_vm1 = vcmask 130048   ;;  %s579_s9 = sshll.u32 %s728_s13, 4 }
   0xd   : > { %v565_v3 = vcombine.high %v238_v0, %v242_v2  ;;  %v564_v4 = vcombine.low %v238_v0, %v242_v2  ;;  %s673_s21 = scalar_lea.vmem %s723_s0, %s578_s18  ;;  %v188_v29 = vld [vmem:[%s724_s1] sm:$0x1]  ;;  %322 = vmatprep.mubr.bf16.mxu1 %v631_v30  ;;  %v566_v33 = vcombine.low %v239_v31, %v243_v32  ;;  %v567_v34 = vcombine.high %v239_v31, %v243_v32  ;;  %v244_v36 = vld [vmem:[%s725_s2 + $0x30] sm:$0xff]  ;;  %v241_v43 = vld [vmem:[%s725_s2 + $0x18] sm:$0xff]  ;;  %s170_s14 = scalar_lea.vmem %s726_s3, %s579_s9 }
   0xe   : > { %v186_v5 = vld [vmem:[%s673_s21 + $0x70] sm:$0xff]  ;;  %v187_v6 = vld [vmem:[%s673_s21 + $0x78] sm:$0xff]  ;;  %v184_v7 = vld [vmem:[%s673_s21 + $0x60] sm:$0xff]  ;;  %v569_v39 = vcombine.high %v240_v35, %v244_v36  ;;  %v568_v45 = vcombine.low %v240_v35, %v244_v36  ;;  %v632_v49 = vmov 1983009808   ;;  %v468_v55 = vshrl.u32 %v467_v51, 7 }
   0xf   : > { %304 = vmatprep.subr.bf16.mxu1 %v565_v3  ;;  %v196_v8 = vpack.c.bf16 %v187_v6, %v186_v5  ;;  %v185_v9 = vld [vmem:[%s673_s21 + $0x68] sm:$0xff]  ;;  %v182_v11 = vld [vmem:[%s673_s21 + $0x50] sm:$0xff]  ;;  %v183_v12 = vld [vmem:[%s673_s21 + $0x58] sm:$0xff]  ;;  %v465_v50 = vunpack.c.l.s4 %v632_v49 }
  0x10   : > { %305 = vmatpush1.bf16.msra.mxu1 %v564_v4  ;;  %v195_v10 = vpack.c.bf16 %v185_v9, %v184_v7  ;;  %v194_v13 = vpack.c.bf16 %v183_v12, %v182_v11  ;;  %v180_v14 = vld [vmem:[%s673_s21 + $0x40] sm:$0xff]  ;;  %v181_v15 = vld [vmem:[%s673_s21 + $0x48] sm:$0xff]  ;;  %v178_v17 = vld [vmem:[%s673_s21 + $0x30] sm:$0xff] }
  0x11   : > { %590 = vmatpush3.bf16.msra.mxu0 %v196_v8  ;;  %v193_v16 = vpack.c.bf16 %v181_v15, %v180_v14  ;;  %v179_v18 = vld [vmem:[%s673_s21 + $0x38] sm:$0xff]  ;;  %v176_v20 = vld [vmem:[%s673_s21 + $0x20] sm:$0xff]  ;;  %v177_v21 = vld [vmem:[%s673_s21 + $0x28] sm:$0xff]  ;;  %345 = vmatprep.subr.bf16.mxu1 %v567_v34  ;;  %v466_v54 = vunpack.c.0.s8 %v465_v50 }
  0x12   : > { %591 = vmatprep.subr.bf16.mxu0 %v629_v1  ;;  %v192_v19 = vpack.c.bf16 %v179_v18, %v178_v17  ;;  %v191_v22 = vpack.c.bf16 %v177_v21, %v176_v20  ;;  %v174_v23 = vld [vmem:[%s673_s21 + $0x10] sm:$0xff]  ;;  %v175_v24 = vld [vmem:[%s673_s21 + $0x18] sm:$0xff]  ;;  %v172_v26 = vld [vmem:[%s673_s21] sm:$0xff] }
  0x13   : > { %v190_v25 = vpack.c.bf16 %v175_v24, %v174_v23  ;;  %v173_v27 = vld [vmem:[%s673_s21 + $0x8] sm:$0xff]  ;;  %v245_v44 = vld [vmem:[%s725_s2 + $0x38] sm:$0xff]  ;;  %v469_v59 = vsub.s32 %v466_v54, %v468_v55 }
  0x14   : > { %v189_v28 = vpack.c.bf16 %v173_v27, %v172_v26  ;;  %v571_v46 = vcombine.high %v241_v43, %v245_v44  ;;  %v570_v47 = vcombine.low %v241_v43, %v245_v44 }
  0x15   : > { %592 = vmatpush3.bf16.msra.mxu0 %v195_v10 }
  0x16   : > { %593 = vmatprep.subr.bf16.mxu0 %v629_v1 }
  0x19   : > { %594 = vmatpush3.bf16.msra.mxu0 %v194_v13 }
  0x1a   : > { %595 = vmatprep.subr.bf16.mxu0 %v629_v1 }
  0x1d   : > { %596 = vmatpush3.bf16.msra.mxu0 %v193_v16 }
  0x1e   : > { %597 = vmatprep.subr.bf16.mxu0 %v629_v1 }
  0x21   : > { %598 = vmatpush3.bf16.msra.mxu0 %v192_v19 }
  0x22   : > { %599 = vmatprep.subr.bf16.mxu0 %v629_v1 }
  0x25   : > { %600 = vmatpush3.bf16.msra.mxu0 %v191_v22 }
  0x26   : > { %601 = vmatprep.subr.bf16.mxu0 %v629_v1 }
  0x29   : > { %602 = vmatpush3.bf16.msra.mxu0 %v190_v25 }
  0x2a   : > { %603 = vmatprep.subr.bf16.mxu0 %v629_v1 }
  0x2d   : > { %604 = vmatpush3.bf16.msra.mxu0 %v189_v28 }
  0x30   : > { %606 = vmatmul.mubr.bf16.vlgmr.msra.gmra.mxu0 %v188_v29 }
  0xf0   : > { %v231_v37 = vpop.f32.mrf.mxu0 }
  0xf1   : > { %v237_v38 = vpack.c.bf16 %v231_v37, %v231_v37 }
  0xf2   : > { %v607_v40 = vpop.f32.mrf.mxu0 }
  0xf3   : > { %572 = vmatmul.mubr.msk.bf16.vlgmr.msra.gmra.mxu1 %vm286_vm1, %v237_v38 }
  0xf4   : > { %346 = vmatpush1.bf16.msra.mxu1 %v566_v33  ;;  %v234_v41 = vpop.f32.mrf.mxu0  ;;  %363 = vmatprep.mubr.bf16.mxu1 %v631_v30 }
  0xf5   : > { %386 = vmatprep.subr.bf16.mxu1 %v569_v39 }
  0xf6   : > { %v608_v42 = vpop.f32.mrf.mxu0 }
  0xfb   : > { %573 = vmatmul.mubr.msk.bf16.vlgmr.msra.gmra.mxu1 %vm286_vm1, %v237_v38 }
  0xfc   : > { %387 = vmatpush1.bf16.msra.mxu1 %v568_v45  ;;  %404 = vmatprep.mubr.bf16.mxu1 %v631_v30 }
  0xfd   : > { %427 = vmatprep.subr.bf16.mxu1 %v571_v46 }
 0x103   : > { %574 = vmatmul.mubr.msk.bf16.vlgmr.msra.gmra.mxu1 %vm286_vm1, %v237_v38 }
 0x104   : > { %428 = vmatpush1.bf16.msra.mxu1 %v570_v47  ;;  %445 = vmatprep.mubr.bf16.mxu1 %v631_v30 }
 0x10b   : > { %575 = vmatmul.mubr.msk.bf16.vlgmr.msra.gmra.mxu1 %vm286_vm1, %v237_v38 }
 0x1b3   : > { %v324_v48 = vpop.f32.mrf.mxu1 }
 0x1b5   : > { %v326_v52 = vpop.f32.mrf.mxu1 }
 0x1b6   : > { %v462_v58 = vcombine.low %v324_v48, %v326_v52 }
 0x1b7   : > { %v328_v53 = vpop.f32.mrf.mxu1 }
 0x1b8   : > { %v470_v63 = vrot.slane %v462_v58, %v469_v59 }
 0x1b9   : > { %v329_v56 = vpop.f32.mrf.mxu1 }
 0x1bb   : > { %v365_v57 = vpop.f32.mrf.mxu1 }
 0x1bd   : > { %v367_v60 = vpop.f32.mrf.mxu1 }
 0x1be   : > { %v463_v61 = vcombine.low %v365_v57, %v367_v60 }
 0x1bf   : > { %v369_v62 = vpop.f32.mrf.mxu1 }
 0x1c0   : > { %v477_v0 = vrot.slane %v463_v61, %v469_v59 }
 0x1c1   : > { %v370_v1 = vpop.f32.mrf.mxu1 }
 0x1c2   : > { %v478_v2 = vcombine.low %v470_v63, %v477_v0 }
 0x1c3   : > { %v406_v3 = vpop.f32.mrf.mxu1 }
 0x1c4   : > { %498 = vst [vmem:[%s170_s14] sm:$0xff] %v478_v2 }
 0x1c5   : > { %v408_v4 = vpop.f32.mrf.mxu1 }
 0x1c6   : > { %v479_v8 = vcombine.low %v406_v3, %v408_v4 }
 0x1c7   : > { %v410_v5 = vpop.f32.mrf.mxu1 }
 0x1c8   : > { %v487_v12 = vrot.slane %v479_v8, %v469_v59 }
 0x1c9   : > { %v411_v6 = vpop.f32.mrf.mxu1 }
 0x1cb   : > { %v447_v7 = vpop.f32.mrf.mxu1 }
 0x1cd   : > { %v449_v9 = vpop.f32.mrf.mxu1 }
 0x1ce   : > { %v480_v10 = vcombine.low %v447_v7, %v449_v9 }
 0x1cf   : > { %v451_v11 = vpop.f32.mrf.mxu1 }
 0x1d0   : > { %v494_v13 = vrot.slane %v480_v10, %v469_v59 }
 0x1d1   : > { %v452_v14 = vpop.f32.mrf.mxu1 }
 0x1d2   : > { %v495_v15 = vcombine.low %v487_v12, %v494_v13 }
 0x1d4   : > { %499 = vst [vmem:[%s170_s14 + $0x8] sm:$0xff] %v495_v15 }
 0x1d5 PF: > { %s13_s12 = sadd.s32 1, %s627_s12  }
 0x1d6   : > { %p10_p4 = scmp.ge.s32.totalorder %s13_s12, 4  }
 0x1d8   :  { %12 = sbr.rel (!%p10_p4) target bundleno = 1 (0x1), region = 62 }

</bundles_post_ra>
